<compile_context>
chip_gen: v7x
topology: tpu7x:2x2x1
jax: 0.10.0
libtpu: 0.0.40
codegen_flags: <defaults>
</compile_context>

<pallas_src>
from functools import partial

import jax
import jax.numpy as jnp
import numpy as np
from jax.experimental import pallas as pl
from jax.experimental.pallas import tpu as pltpu

_EPS = 1e-6
_LANE = 128


# ----------------------------- Pallas kernel -----------------------------

def glf_kernel(x_ref, ln_ref, wtap_ref, wr_ref, wi_ref, f_ref, g_ref, o_ref,
               *, H, W, C, HKP):
    HW = H * W
    x = x_ref[...]                         # (Bblk, 2C, HW) f32, lane-dense
    Bblk = x.shape[0]

    ln = ln_ref[...]                       # (6, 2C, 1) packed LayerNorm params
    pre_g, pre_b = ln[0], ln[1]
    pg_e, pg_o = ln[2][:C], ln[3][:C]      # post-norm gamma, even/odd output channels
    pb_e, pb_o = ln[4][:C], ln[5][:C]      # post-norm beta,  even/odd output channels

    # ---- pre_norm: channels_first LayerNorm over the channel axis ----
    u = jnp.mean(x, axis=1, keepdims=True)
    xc = x - u
    var = jnp.mean(xc * xc, axis=1, keepdims=True)
    xn = pre_g * (xc * jax.lax.rsqrt(var + _EPS)) + pre_b      # rsqrt -> EUP slot

    x1 = xn[:, :C]                         # depthwise-conv branch (Bblk, C, HW)
    x2 = xn[:, C:]                         # spectral branch       (Bblk, C, HW)

    # ---- depthwise 3x3 conv, padding=1: masks folded into tap weights (VPU/XLU) ----
    y1 = wtap_ref[4] * x1                  # center tap (shift 0, mask == 1)
    idx = 0
    for di in (-1, 0, 1):
        for dj in (-1, 0, 1):
            s = di * W + dj                # flat-index shift of tap (h+di, w+dj)
            if s != 0:
                rolled = pltpu.roll(x1, shift=(-s) % HW, axis=2)
                y1 = y1 + wtap_ref[idx] * rolled
            idx += 1

    # ---- global filter: fused Kronecker real-DFT matmuls (MXU, bf16 in / f32 acc) ----
    x2f = x2.reshape(Bblk * C, HW).astype(jnp.bfloat16)
    z = jnp.dot(x2f, f_ref[...], preferred_element_type=jnp.float32)   # (Bblk*C, 2*HKP)
    zr = z[:, :HKP]
    zi = z[:, HKP:]
    wr = wr_ref[...]                       # (Bblk*C, HKP), tiled over Bblk in the wrapper
    wi = wi_ref[...]
    yr = (zr * wr - zi * wi).astype(jnp.bfloat16)                      # complex multiply (f32)
    yi = (zr * wi + zi * wr).astype(jnp.bfloat16)
    yf = jnp.concatenate([yr, yi], axis=1)                             # (Bblk*C, 2*HKP)
    y2 = jnp.dot(yf, g_ref[...], preferred_element_type=jnp.float32) * (1.0 / HW)
    y2 = y2.reshape(Bblk, C, HW)

    # ---- post_norm over the interleaved 2C channels ----
    # Channel interleaving is a permutation, so the per-pixel statistics follow directly
    # from (y1, y2); gamma/beta were pre-split even/odd in the wrapper.
    tot = jnp.sum(y1, axis=1, keepdims=True) + jnp.sum(y2, axis=1, keepdims=True)
    u2 = tot * (1.0 / (2.0 * C))
    d1 = y1 - u2
    d2 = y2 - u2
    v2 = (jnp.sum(d1 * d1, axis=1, keepdims=True)
          + jnp.sum(d2 * d2, axis=1, keepdims=True)) * (1.0 / (2.0 * C))
    inv = jax.lax.rsqrt(v2 + _EPS)
    o_ref[:, 0, :, :] = pg_e * (d1 * inv) + pb_e   # even output channels (conv branch)
    o_ref[:, 1, :, :] = pg_o * (d2 * inv) + pb_o   # odd output channels (spectral branch)


# ----------------------------- plain-JAX glue -----------------------------

def _kron_dft_matrices(H, W, HKP):
    """Fused, lane-padded Kronecker real-DFT matrices for rfft2 / irfft2.

    Returns F = [fr | fi] of shape (HW, 2*HKP) and G = [gr ; gi] of shape (2*HKP, HW),
    with the Hermitian fold coefficients baked into G and the freq axis zero-padded to HKP.
    """
    Kf = W // 2 + 1
    HW, HKf = H * W, H * Kf
    ph = np.repeat(np.arange(H), W)            # (HW,)  h of flat pixel index
    pw = np.tile(np.arange(W), H)              # (HW,)  w of flat pixel index
    qk1 = np.repeat(np.arange(H), Kf)          # (HKf,) k1 of flat freq index
    qk2 = np.tile(np.arange(Kf), H)            # (HKf,) k2 of flat freq index

    theta = 2.0 * np.pi * (np.outer(ph, qk1) / H + np.outer(pw, qk2) / W)   # (HW, HKf)
    fr = np.zeros((HW, HKP), np.float32)
    fi = np.zeros((HW, HKP), np.float32)
    fr[:, :HKf] = np.cos(theta)
    fi[:, :HKf] = -np.sin(theta)

    # Hermitian-fold coefficients (DC / Nyquist columns counted once).
    ck = np.where((qk2 == 0) | ((W % 2 == 0) & (qk2 == W // 2)), 1.0, 2.0)   # (HKf,)
    gr = np.zeros((HKP, HW), np.float32)
    gi = np.zeros((HKP, HW), np.float32)
    gr[:HKf] = ck[:, None] * np.cos(theta.T)
    gi[:HKf] = -ck[:, None] * np.sin(theta.T)

    fmat = np.concatenate([fr, fi], axis=1)    # forward:  x @ F = [Re | Im]
    gmat = np.concatenate([gr, gi], axis=0)    # inverse: [Re | Im] @ G
    return jnp.asarray(fmat, jnp.bfloat16), jnp.asarray(gmat, jnp.bfloat16)


def _conv_masks(H, W):
    """(9, 1, H*W) zero-padding masks for the 3x3 depthwise-conv lane rolls."""
    HW = H * W
    p = np.arange(HW)
    h, w = p // W, p % W
    masks = []
    for di in (-1, 0, 1):
        for dj in (-1, 0, 1):
            valid = ((h + di >= 0) & (h + di < H) & (w + dj >= 0) & (w + dj < W))
            masks.append(valid.astype(np.float32))
    return jnp.asarray(np.stack(masks).reshape(9, 1, HW))


def _interp_bilinear_align_corners(x, out_h, out_w):
    # x: (N, C, Hin, Win) -> (N, C, out_h, out_w); F.interpolate(bilinear, align_corners=True)
    _, _, H, W = x.shape

    def axis_coords(n_out, n_in):
        if n_out == 1:
            src = jnp.zeros((1,), jnp.float32)
        else:
            src = jnp.arange(n_out, dtype=jnp.float32) * (n_in - 1) / (n_out - 1)
        i0 = jnp.clip(jnp.floor(src).astype(jnp.int32), 0, n_in - 1)
        i1 = jnp.clip(i0 + 1, 0, n_in - 1)
        frac = src - i0.astype(jnp.float32)
        return i0, i1, frac

    h0, h1, fh = axis_coords(out_h, H)
    w0, w1, fw = axis_coords(out_w, W)
    x00 = x[:, :, h0][:, :, :, w0]
    x01 = x[:, :, h0][:, :, :, w1]
    x10 = x[:, :, h1][:, :, :, w0]
    x11 = x[:, :, h1][:, :, :, w1]
    fh = fh[None, None, :, None]
    fw = fw[None, None, None, :]
    top = x00 * (1.0 - fw) + x01 * fw
    bot = x10 * (1.0 - fw) + x11 * fw
    return top * (1.0 - fh) + bot * fh


def _pick_bblk(B, C, dim, HW, HKP):
    """Batch-block size: fill the MXU M dim, bounded by VMEM and by >=2 grid steps."""
    target_rows = 256                                     # M target (v6e/v7x MXU width)
    bblk = max(1, min(B, target_rows // max(C, 1)))
    per_b = 4 * (6 * dim * HW + 3 * C * 2 * HKP)          # rough f32 activation bytes / batch
    budget = 8 * 2**20
    bblk = max(1, min(bblk, budget // max(per_b, 1)))
    if B >= 2 and -(-B // bblk) < 2:                      # keep >=2 steps for megacore / 2 TCs
        bblk = -(-B // 2)
    return bblk


def global_local_filter(x, params, *, single_buffer_constants=True):
    """Pallas forward of GlobalLocalFilter.  x: (B, dim, H, W) float32 (NCHW)."""
    B, dim, H, W = x.shape
    C = dim // 2
    Kf = W // 2 + 1
    HW = H * W
    HKf = H * Kf
    HKP = ((HKf + _LANE - 1) // _LANE) * _LANE            # lane-aligned padded freq axis

    bblk = _pick_bblk(B, C, dim, HW, HKP)
    nblk = -(-B // bblk)
    Bpad = nblk * bblk

    pre_g = params['pre_norm_weight'].astype(jnp.float32)
    pre_b = params['pre_norm_bias'].astype(jnp.float32)
    post_g = params['post_norm_weight'].astype(jnp.float32)
    post_b = params['post_norm_bias'].astype(jnp.float32)
    dw_w = params['dw_weight'].astype(jnp.float32)        # (C, 1, 3, 3)
    cw = params['complex_weight'].astype(jnp.float32)     # (C, h0, w0, 2)

    # Packed LayerNorm params: [pre_g, pre_b, post_g_even, post_g_odd, post_b_even, post_b_odd]
    def _pad_dim(v):
        return jnp.pad(v, (0, dim - v.shape[0]))
    ln_pack = jnp.stack([pre_g, pre_b,
                         _pad_dim(post_g[0::2]), _pad_dim(post_g[1::2]),
                         _pad_dim(post_b[0::2]), _pad_dim(post_b[1::2])]).reshape(6, dim, 1)

    # Depthwise 3x3 tap weights with the zero-padding masks folded in: (9, C, HW).
    masks = _conv_masks(H, W)
    dww = jnp.transpose(dw_w[:, 0].reshape(C, 9), (1, 0)).reshape(9, C, 1)
    wtap = dww * masks

    # Resize the complex weight to the rfft2 spectrum size if it does not match.
    if cw.shape[1] != H or cw.shape[2] != Kf:
        cw4 = jnp.transpose(cw, (3, 0, 1, 2))             # (2, C, h0, w0)
        cw4 = _interp_bilinear_align_corners(cw4, H, Kf)
        cw = jnp.transpose(cw4, (1, 2, 3, 0))             # (C, H, Kf, 2)
    wr = jnp.pad(cw[..., 0].reshape(C, HKf), ((0, 0), (0, HKP - HKf)))
    wi = jnp.pad(cw[..., 1].reshape(C, HKf), ((0, 0), (0, HKP - HKf)))
    wr_t = jnp.tile(wr, (bblk, 1))                        # broadcast over the batch block
    wi_t = jnp.tile(wi, (bblk, 1))

    fmat, gmat = _kron_dft_matrices(H, W, HKP)            # channel/batch independent, bf16

    aux = [ln_pack, wtap, wr_t, wi_t, fmat, gmat]

    def _const_spec(a):
        nd = a.ndim
        kw = {}
        if single_buffer_constants:
            kw['pipeline_mode'] = pl.Buffered(buffer_count=1)   # constants: no double-buffer
        return pl.BlockSpec(a.shape, lambda b, _nd=nd: (0,) * _nd, **kw)

    xin = x.reshape(B, dim, HW).astype(jnp.float32)
    if Bpad != B:
        xin = jnp.pad(xin, ((0, Bpad - B), (0, 0), (0, 0)))

    const_bytes = sum(int(np.prod(a.shape)) * a.dtype.itemsize for a in aux)
    io_block_bytes = 4 * bblk * (dim * HW + 2 * C * HW)
    vmem_limit = int(min(100 * 2**20,
                         max(32 * 2**20, 4 * io_block_bytes + 2 * const_bytes + 4 * 2**20)))

    flops = nblk * (8 * bblk * C * HW * HKP + 18 * bblk * C * HW)
    cost = pl.CostEstimate(flops=int(flops),
                           transcendentals=int(2 * Bpad * HW),
                           bytes_accessed=int(4 * Bpad * dim * HW * 2 + const_bytes))

    out = pl.pallas_call(
        partial(glf_kernel, H=H, W=W, C=C, HKP=HKP),
        out_shape=jax.ShapeDtypeStruct((Bpad, 2, C, HW), jnp.float32),
        grid=(nblk,),
        in_specs=[pl.BlockSpec((bblk, dim, HW), lambda b: (b, 0, 0))]
                 + [_const_spec(a) for a in aux],
        out_specs=pl.BlockSpec((bblk, 2, C, HW), lambda b: (b, 0, 0, 0)),
        compiler_params=pltpu.CompilerParams(
            dimension_semantics=("parallel",),
            vmem_limit_bytes=vmem_limit),
        cost_estimate=cost,
    )(xin, *aux)

    # Un-pad + interleave channels: out[:, 2c] = conv branch, out[:, 2c+1] = spectral.
    out = out[:B]
    return jnp.transpose(out, (0, 2, 1, 3)).reshape(B, dim, H, W)


# ----------------------------- pure-JAX reference -----------------------------

def reference_forward(x, params):
    B, dim, H, W = x.shape
    C = dim // 2
    Kf = W // 2 + 1

    def ln_cf(t, g, b):
        u = jnp.mean(t, axis=1, keepdims=True)
        s = jnp.mean((t - u) ** 2, axis=1, keepdims=True)
        th = (t - u) / jnp.sqrt(s + _EPS)
        return g[None, :, None, None] * th + b[None, :, None, None]

    xn = ln_cf(x, params['pre_norm_weight'], params['pre_norm_bias'])
    x1, x2 = xn[:, :C], xn[:, C:]
    x1 = jax.lax.conv_general_dilated(
        x1, params['dw_weight'], window_strides=(1, 1), padding=((1, 1), (1, 1)),
        dimension_numbers=('NCHW', 'OIHW', 'NCHW'),
        feature_group_count=C, precision=jax.lax.Precision.HIGHEST)

    cw = params['complex_weight']
    if cw.shape[1] != H or cw.shape[2] != Kf:
        cw4 = jnp.transpose(cw, (3, 0, 1, 2))
        cw4 = _interp_bilinear_align_corners(cw4, H, Kf)
        cw = jnp.transpose(cw4, (1, 2, 3, 0))
    wt = cw[..., 0] + 1j * cw[..., 1]

    z = jnp.fft.rfft2(x2.astype(jnp.float32), axes=(2, 3), norm='ortho')
    z = z * wt[None]
    x2r = jnp.fft.irfft2(z, s=(H, W), axes=(2, 3), norm='ortho')

    xc = jnp.concatenate([x1[:, :, None], x2r[:, :, None]], axis=2).reshape(B, dim, H, W)
    return ln_cf(xc, params['post_norm_weight'], params['post_norm_bias'])


if __name__ == "__main__":
    B, dim, H, W = 2, 4, 16, 16
    C = dim // 2
    key = jax.random.PRNGKey(0)
    kx, kdw, kcw = jax.random.split(key, 3)

    x = jax.random.normal(kx, (B, dim, H, W), jnp.float32)
    params = {
        # LayerNorm params initialized exactly like the module (ones / zeros).
        'pre_norm_weight': jnp.ones((dim,), jnp.float32),
        'pre_norm_bias': jnp.zeros((dim,), jnp.float32),
        'post_norm_weight': jnp.ones((dim,), jnp.float32),
        'post_norm_bias': jnp.zeros((dim,), jnp.float32),
        # Conv2d(dim//2, dim//2, 3, padding=1, bias=False, groups=dim//2) weight: (C, 1, 3, 3)
        'dw_weight': jax.random.normal(kdw, (C, 1, 3, 3), jnp.float32) * 0.1,
        # complex_weight: (dim//2, h=14, w=8, 2), std=0.02
        # TODO(synk): trunc_normal_(std=0.02) approximated with plain normal (same shape/std).
        'complex_weight': jax.random.normal(kcw, (C, 14, 8, 2), jnp.float32) * 0.02,
    }

    def _run_and_check(single_buffer):
        fn = jax.jit(partial(global_local_filter, single_buffer_constants=single_buffer))
        out = jax.block_until_ready(fn(x, params))
        assert out.shape == (B, dim, H, W), out.shape
        ref = jax.block_until_ready(reference_forward(x, params))
        np.testing.assert_allclose(np.asarray(out), np.asarray(ref), rtol=2e-2, atol=2e-2)
        return out

    try:
        _run_and_check(True)
    except Exception:
        # Fallback: default double-buffered constants if single-buffering is unsupported.
        _run_and_check(False)

    print("KERNEL_OK")
</pallas_src>

<mosaic_0001>
module attributes {stable_mosaic.version = 11 : i64} {
  func.func @glf_kernel(%arg0: i32, %arg1: memref<1x4x256xf32, #tpu.memory_space<vmem>>, %arg2: memref<6x4x1xf32, #tpu.memory_space<vmem>>, %arg3: memref<9x2x256xf32, #tpu.memory_space<vmem>>, %arg4: memref<2x256xf32, #tpu.memory_space<vmem>>, %arg5: memref<2x256xf32, #tpu.memory_space<vmem>>, %arg6: memref<256x512xbf16, #tpu.memory_space<vmem>>, %arg7: memref<512x256xbf16, #tpu.memory_space<vmem>>, %arg8: memref<1x2x2x256xf32, #tpu.memory_space<vmem>>) attributes {dimension_semantics = [#tpu.dimension_semantics<parallel>], iteration_bounds = array<i64: 2>, scalar_prefetch = 0 : i64, scratch_operands = 0 : i64, tpu.core_type = #tpu.core_type<tc>, window_params = [{transform_indices = @transform_0, window_bounds = array<i64: 1, 4, 256>}, {pipeline_mode = #tpu.pipeline_mode<synchronous>, transform_indices = @transform_1, window_bounds = array<i64: 6, 4, 1>}, {pipeline_mode = #tpu.pipeline_mode<synchronous>, transform_indices = @transform_2, window_bounds = array<i64: 9, 2, 256>}, {pipeline_mode = #tpu.pipeline_mode<synchronous>, transform_indices = @transform_3, window_bounds = array<i64: 2, 256>}, {pipeline_mode = #tpu.pipeline_mode<synchronous>, transform_indices = @transform_4, window_bounds = array<i64: 2, 256>}, {pipeline_mode = #tpu.pipeline_mode<synchronous>, transform_indices = @transform_5, window_bounds = array<i64: 256, 512>}, {pipeline_mode = #tpu.pipeline_mode<synchronous>, transform_indices = @transform_6, window_bounds = array<i64: 512, 256>}, {transform_indices = @transform_7, window_bounds = array<i64: 1, 2, 2, 256>}]} {
    %c0 = arith.constant 0 : index
    %c0_0 = arith.constant 0 : index
    %c0_1 = arith.constant 0 : index
    %0 = vector.load %arg1[%c0, %c0_0, %c0_1] : memref<1x4x256xf32, #tpu.memory_space<vmem>>, vector<1x4x256xf32>
    %c0_2 = arith.constant 0 : index
    %c0_3 = arith.constant 0 : index
    %c0_4 = arith.constant 0 : index
    %1 = vector.load %arg2[%c0_2, %c0_3, %c0_4] : memref<6x4x1xf32, #tpu.memory_space<vmem>>, vector<6x4x1xf32>
    %2 = vector.extract_strided_slice %1 {offsets = [0, 0, 0], sizes = [1, 4, 1], strides = [1, 1, 1]} : vector<6x4x1xf32> to vector<1x4x1xf32>
    %3 = vector.shape_cast %2 : vector<1x4x1xf32> to vector<4x1xf32>
    %4 = vector.extract_strided_slice %1 {offsets = [1, 0, 0], sizes = [1, 4, 1], strides = [1, 1, 1]} : vector<6x4x1xf32> to vector<1x4x1xf32>
    %5 = vector.shape_cast %4 : vector<1x4x1xf32> to vector<4x1xf32>
    %6 = vector.extract_strided_slice %1 {offsets = [2, 0, 0], sizes = [1, 4, 1], strides = [1, 1, 1]} : vector<6x4x1xf32> to vector<1x4x1xf32>
    %7 = vector.shape_cast %6 : vector<1x4x1xf32> to vector<4x1xf32>
    %8 = vector.extract_strided_slice %7 {offsets = [0, 0], sizes = [2, 1], strides = [1, 1]} : vector<4x1xf32> to vector<2x1xf32>
    %9 = vector.extract_strided_slice %1 {offsets = [3, 0, 0], sizes = [1, 4, 1], strides = [1, 1, 1]} : vector<6x4x1xf32> to vector<1x4x1xf32>
    %10 = vector.shape_cast %9 : vector<1x4x1xf32> to vector<4x1xf32>
    %11 = vector.extract_strided_slice %10 {offsets = [0, 0], sizes = [2, 1], strides = [1, 1]} : vector<4x1xf32> to vector<2x1xf32>
    %12 = vector.extract_strided_slice %1 {offsets = [4, 0, 0], sizes = [1, 4, 1], strides = [1, 1, 1]} : vector<6x4x1xf32> to vector<1x4x1xf32>
    %13 = vector.shape_cast %12 : vector<1x4x1xf32> to vector<4x1xf32>
    %14 = vector.extract_strided_slice %13 {offsets = [0, 0], sizes = [2, 1], strides = [1, 1]} : vector<4x1xf32> to vector<2x1xf32>
    %15 = vector.extract_strided_slice %1 {offsets = [5, 0, 0], sizes = [1, 4, 1], strides = [1, 1, 1]} : vector<6x4x1xf32> to vector<1x4x1xf32>
    %16 = vector.shape_cast %15 : vector<1x4x1xf32> to vector<4x1xf32>
    %17 = vector.extract_strided_slice %16 {offsets = [0, 0], sizes = [2, 1], strides = [1, 1]} : vector<4x1xf32> to vector<2x1xf32>
    %cst = arith.constant dense<0.000000e+00> : vector<1x256xf32>
    %18 = vector.multi_reduction <add>, %0, %cst [1] : vector<1x4x256xf32> to vector<1x256xf32>
    %19 = vector.shape_cast %18 : vector<1x256xf32> to vector<1x1x256xf32>
    %cst_5 = arith.constant 4.000000e+00 : f32
    %20 = vector.broadcast %cst_5 : f32 to vector<1x1x256xf32>
    %21 = arith.divf %19, %20 : vector<1x1x256xf32>
    %22 = vector.broadcast %21 : vector<1x1x256xf32> to vector<1x4x256xf32>
    %23 = arith.subf %0, %22 : vector<1x4x256xf32>
    %24 = arith.mulf %23, %23 : vector<1x4x256xf32>
    %cst_6 = arith.constant dense<0.000000e+00> : vector<1x256xf32>
    %25 = vector.multi_reduction <add>, %24, %cst_6 [1] : vector<1x4x256xf32> to vector<1x256xf32>
    %26 = vector.shape_cast %25 : vector<1x256xf32> to vector<1x1x256xf32>
    %cst_7 = arith.constant 4.000000e+00 : f32
    %27 = vector.broadcast %cst_7 : f32 to vector<1x1x256xf32>
    %28 = arith.divf %26, %27 : vector<1x1x256xf32>
    %cst_8 = arith.constant 9.99999997E-7 : f32
    %29 = vector.broadcast %cst_8 : f32 to vector<1x1x256xf32>
    %30 = arith.addf %28, %29 : vector<1x1x256xf32>
    %31 = math.rsqrt %30 : vector<1x1x256xf32>
    %32 = vector.broadcast %31 : vector<1x1x256xf32> to vector<1x4x256xf32>
    %33 = arith.mulf %23, %32 : vector<1x4x256xf32>
    %34 = vector.shape_cast %3 : vector<4x1xf32> to vector<1x4x1xf32>
    %35 = vector.broadcast %34 : vector<1x4x1xf32> to vector<1x4x256xf32>
    %36 = arith.mulf %35, %33 : vector<1x4x256xf32>
    %37 = vector.shape_cast %5 : vector<4x1xf32> to vector<1x4x1xf32>
    %38 = vector.broadcast %37 : vector<1x4x1xf32> to vector<1x4x256xf32>
    %39 = arith.addf %36, %38 : vector<1x4x256xf32>
    %40 = vector.extract_strided_slice %39 {offsets = [0, 0, 0], sizes = [1, 2, 256], strides = [1, 1, 1]} : vector<1x4x256xf32> to vector<1x2x256xf32>
    %41 = vector.extract_strided_slice %39 {offsets = [0, 2, 0], sizes = [1, 2, 256], strides = [1, 1, 1]} : vector<1x4x256xf32> to vector<1x2x256xf32>
    %c4 = arith.constant 4 : index
    %c0_9 = arith.constant 0 : index
    %c0_10 = arith.constant 0 : index
    %42 = vector.load %arg3[%c4, %c0_9, %c0_10] : memref<9x2x256xf32, #tpu.memory_space<vmem>>, vector<1x2x256xf32>
    %43 = vector.shape_cast %42 : vector<1x2x256xf32> to vector<2x256xf32>
    %44 = vector.shape_cast %43 : vector<2x256xf32> to vector<1x2x256xf32>
    %45 = arith.mulf %44, %40 : vector<1x2x256xf32>
    %c17_i32 = arith.constant 17 : i32
    %46 = tpu.dynamic_rotate %40 by %c17_i32 dim 2 : vector<1x2x256xf32>, i32 -> vector<1x2x256xf32>
    %c0_11 = arith.constant 0 : index
    %c0_12 = arith.constant 0 : index
    %c0_13 = arith.constant 0 : index
    %47 = vector.load %arg3[%c0_11, %c0_12, %c0_13] : memref<9x2x256xf32, #tpu.memory_space<vmem>>, vector<1x2x256xf32>
    %48 = vector.shape_cast %47 : vector<1x2x256xf32> to vector<2x256xf32>
    %49 = vector.shape_cast %48 : vector<2x256xf32> to vector<1x2x256xf32>
    %50 = arith.mulf %49, %46 : vector<1x2x256xf32>
    %51 = arith.addf %45, %50 : vector<1x2x256xf32>
    %c16_i32 = arith.constant 16 : i32
    %52 = tpu.dynamic_rotate %40 by %c16_i32 dim 2 : vector<1x2x256xf32>, i32 -> vector<1x2x256xf32>
    %c1 = arith.constant 1 : index
    %c0_14 = arith.constant 0 : index
    %c0_15 = arith.constant 0 : index
    %53 = vector.load %arg3[%c1, %c0_14, %c0_15] : memref<9x2x256xf32, #tpu.memory_space<vmem>>, vector<1x2x256xf32>
    %54 = vector.shape_cast %53 : vector<1x2x256xf32> to vector<2x256xf32>
    %55 = vector.shape_cast %54 : vector<2x256xf32> to vector<1x2x256xf32>
    %56 = arith.mulf %55, %52 : vector<1x2x256xf32>
    %57 = arith.addf %51, %56 : vector<1x2x256xf32>
    %c15_i32 = arith.constant 15 : i32
    %58 = tpu.dynamic_rotate %40 by %c15_i32 dim 2 : vector<1x2x256xf32>, i32 -> vector<1x2x256xf32>
    %c2 = arith.constant 2 : index
    %c0_16 = arith.constant 0 : index
    %c0_17 = arith.constant 0 : index
    %59 = vector.load %arg3[%c2, %c0_16, %c0_17] : memref<9x2x256xf32, #tpu.memory_space<vmem>>, vector<1x2x256xf32>
    %60 = vector.shape_cast %59 : vector<1x2x256xf32> to vector<2x256xf32>
    %61 = vector.shape_cast %60 : vector<2x256xf32> to vector<1x2x256xf32>
    %62 = arith.mulf %61, %58 : vector<1x2x256xf32>
    %63 = arith.addf %57, %62 : vector<1x2x256xf32>
    %c1_i32 = arith.constant 1 : i32
    %64 = tpu.dynamic_rotate %40 by %c1_i32 dim 2 : vector<1x2x256xf32>, i32 -> vector<1x2x256xf32>
    %c3 = arith.constant 3 : index
    %c0_18 = arith.constant 0 : index
    %c0_19 = arith.constant 0 : index
    %65 = vector.load %arg3[%c3, %c0_18, %c0_19] : memref<9x2x256xf32, #tpu.memory_space<vmem>>, vector<1x2x256xf32>
    %66 = vector.shape_cast %65 : vector<1x2x256xf32> to vector<2x256xf32>
    %67 = vector.shape_cast %66 : vector<2x256xf32> to vector<1x2x256xf32>
    %68 = arith.mulf %67, %64 : vector<1x2x256xf32>
    %69 = arith.addf %63, %68 : vector<1x2x256xf32>
    %c255_i32 = arith.constant 255 : i32
    %70 = tpu.dynamic_rotate %40 by %c255_i32 dim 2 : vector<1x2x256xf32>, i32 -> vector<1x2x256xf32>
    %c5 = arith.constant 5 : index
    %c0_20 = arith.constant 0 : index
    %c0_21 = arith.constant 0 : index
    %71 = vector.load %arg3[%c5, %c0_20, %c0_21] : memref<9x2x256xf32, #tpu.memory_space<vmem>>, vector<1x2x256xf32>
    %72 = vector.shape_cast %71 : vector<1x2x256xf32> to vector<2x256xf32>
    %73 = vector.shape_cast %72 : vector<2x256xf32> to vector<1x2x256xf32>
    %74 = arith.mulf %73, %70 : vector<1x2x256xf32>
    %75 = arith.addf %69, %74 : vector<1x2x256xf32>
    %c241_i32 = arith.constant 241 : i32
    %76 = tpu.dynamic_rotate %40 by %c241_i32 dim 2 : vector<1x2x256xf32>, i32 -> vector<1x2x256xf32>
    %c6 = arith.constant 6 : index
    %c0_22 = arith.constant 0 : index
    %c0_23 = arith.constant 0 : index
    %77 = vector.load %arg3[%c6, %c0_22, %c0_23] : memref<9x2x256xf32, #tpu.memory_space<vmem>>, vector<1x2x256xf32>
    %78 = vector.shape_cast %77 : vector<1x2x256xf32> to vector<2x256xf32>
    %79 = vector.shape_cast %78 : vector<2x256xf32> to vector<1x2x256xf32>
    %80 = arith.mulf %79, %76 : vector<1x2x256xf32>
    %81 = arith.addf %75, %80 : vector<1x2x256xf32>
    %c240_i32 = arith.constant 240 : i32
    %82 = tpu.dynamic_rotate %40 by %c240_i32 dim 2 : vector<1x2x256xf32>, i32 -> vector<1x2x256xf32>
    %c7 = arith.constant 7 : index
    %c0_24 = arith.constant 0 : index
    %c0_25 = arith.constant 0 : index
    %83 = vector.load %arg3[%c7, %c0_24, %c0_25] : memref<9x2x256xf32, #tpu.memory_space<vmem>>, vector<1x2x256xf32>
    %84 = vector.shape_cast %83 : vector<1x2x256xf32> to vector<2x256xf32>
    %85 = vector.shape_cast %84 : vector<2x256xf32> to vector<1x2x256xf32>
    %86 = arith.mulf %85, %82 : vector<1x2x256xf32>
    %87 = arith.addf %81, %86 : vector<1x2x256xf32>
    %c239_i32 = arith.constant 239 : i32
    %88 = tpu.dynamic_rotate %40 by %c239_i32 dim 2 : vector<1x2x256xf32>, i32 -> vector<1x2x256xf32>
    %c8 = arith.constant 8 : index
    %c0_26 = arith.constant 0 : index
    %c0_27 = arith.constant 0 : index
    %89 = vector.load %arg3[%c8, %c0_26, %c0_27] : memref<9x2x256xf32, #tpu.memory_space<vmem>>, vector<1x2x256xf32>
    %90 = vector.shape_cast %89 : vector<1x2x256xf32> to vector<2x256xf32>
    %91 = vector.shape_cast %90 : vector<2x256xf32> to vector<1x2x256xf32>
    %92 = arith.mulf %91, %88 : vector<1x2x256xf32>
    %93 = arith.addf %87, %92 : vector<1x2x256xf32>
    %94 = vector.shape_cast %41 : vector<1x2x256xf32> to vector<2x256xf32>
    %95 = arith.truncf %94 : vector<2x256xf32> to vector<2x256xbf16>
    %c0_28 = arith.constant 0 : index
    %c0_29 = arith.constant 0 : index
    %96 = vector.load %arg6[%c0_28, %c0_29] : memref<256x512xbf16, #tpu.memory_space<vmem>>, vector<256x512xbf16>
    %cst_30 = arith.constant dense<0.000000e+00> : vector<2x512xf32>
    %97 = tpu.matmul %95, %96, %cst_30 {dimension_numbers = #tpu.dot_dimension_numbers<[1], [0], [0], [1], [0, 0, 1, 1], [], []>} : vector<2x256xbf16>, vector<256x512xbf16>, vector<2x512xf32> -> vector<2x512xf32>
    %98 = vector.extract_strided_slice %97 {offsets = [0, 0], sizes = [2, 256], strides = [1, 1]} : vector<2x512xf32> to vector<2x256xf32>
    %99 = vector.extract_strided_slice %97 {offsets = [0, 256], sizes = [2, 256], strides = [1, 1]} : vector<2x512xf32> to vector<2x256xf32>
    %c0_31 = arith.constant 0 : index
    %c0_32 = arith.constant 0 : index
    %100 = vector.load %arg4[%c0_31, %c0_32] : memref<2x256xf32, #tpu.memory_space<vmem>>, vector<2x256xf32>
    %c0_33 = arith.constant 0 : index
    %c0_34 = arith.constant 0 : index
    %101 = vector.load %arg5[%c0_33, %c0_34] : memref<2x256xf32, #tpu.memory_space<vmem>>, vector<2x256xf32>
    %102 = arith.mulf %98, %100 : vector<2x256xf32>
    %103 = arith.mulf %99, %101 : vector<2x256xf32>
    %104 = arith.subf %102, %103 : vector<2x256xf32>
    %105 = arith.truncf %104 : vector<2x256xf32> to vector<2x256xbf16>
    %106 = arith.mulf %98, %101 : vector<2x256xf32>
    %107 = arith.mulf %99, %100 : vector<2x256xf32>
    %108 = arith.addf %106, %107 : vector<2x256xf32>
    %109 = arith.truncf %108 : vector<2x256xf32> to vector<2x256xbf16>
    %110 = tpu.concatenate %105, %109 in 1 : vector<2x256xbf16>, vector<2x256xbf16> -> vector<2x512xbf16>
    %c0_35 = arith.constant 0 : index
    %c0_36 = arith.constant 0 : index
    %111 = vector.load %arg7[%c0_35, %c0_36] : memref<512x256xbf16, #tpu.memory_space<vmem>>, vector<512x256xbf16>
    %cst_37 = arith.constant dense<0.000000e+00> : vector<2x256xf32>
    %112 = tpu.matmul %110, %111, %cst_37 {dimension_numbers = #tpu.dot_dimension_numbers<[1], [0], [0], [1], [0, 0, 1, 1], [], []>} : vector<2x512xbf16>, vector<512x256xbf16>, vector<2x256xf32> -> vector<2x256xf32>
    %cst_38 = arith.constant 3.906250e-03 : f32
    %113 = vector.broadcast %cst_38 : f32 to vector<2x256xf32>
    %114 = arith.mulf %112, %113 : vector<2x256xf32>
    %115 = vector.shape_cast %114 : vector<2x256xf32> to vector<1x2x256xf32>
    %cst_39 = arith.constant dense<0.000000e+00> : vector<1x256xf32>
    %116 = vector.multi_reduction <add>, %93, %cst_39 [1] : vector<1x2x256xf32> to vector<1x256xf32>
    %117 = vector.shape_cast %116 : vector<1x256xf32> to vector<1x1x256xf32>
    %cst_40 = arith.constant dense<0.000000e+00> : vector<1x256xf32>
    %118 = vector.multi_reduction <add>, %115, %cst_40 [1] : vector<1x2x256xf32> to vector<1x256xf32>
    %119 = vector.shape_cast %118 : vector<1x256xf32> to vector<1x1x256xf32>
    %120 = arith.addf %117, %119 : vector<1x1x256xf32>
    %cst_41 = arith.constant 2.500000e-01 : f32
    %121 = vector.broadcast %cst_41 : f32 to vector<1x1x256xf32>
    %122 = arith.mulf %120, %121 : vector<1x1x256xf32>
    %123 = vector.broadcast %122 : vector<1x1x256xf32> to vector<1x2x256xf32>
    %124 = arith.subf %93, %123 : vector<1x2x256xf32>
    %125 = vector.broadcast %122 : vector<1x1x256xf32> to vector<1x2x256xf32>
    %126 = arith.subf %115, %125 : vector<1x2x256xf32>
    %127 = arith.mulf %124, %124 : vector<1x2x256xf32>
    %cst_42 = arith.constant dense<0.000000e+00> : vector<1x256xf32>
    %128 = vector.multi_reduction <add>, %127, %cst_42 [1] : vector<1x2x256xf32> to vector<1x256xf32>
    %129 = vector.shape_cast %128 : vector<1x256xf32> to vector<1x1x256xf32>
    %130 = arith.mulf %126, %126 : vector<1x2x256xf32>
    %cst_43 = arith.constant dense<0.000000e+00> : vector<1x256xf32>
    %131 = vector.multi_reduction <add>, %130, %cst_43 [1] : vector<1x2x256xf32> to vector<1x256xf32>
    %132 = vector.shape_cast %131 : vector<1x256xf32> to vector<1x1x256xf32>
    %133 = arith.addf %129, %132 : vector<1x1x256xf32>
    %cst_44 = arith.constant 2.500000e-01 : f32
    %134 = vector.broadcast %cst_44 : f32 to vector<1x1x256xf32>
    %135 = arith.mulf %133, %134 : vector<1x1x256xf32>
    %cst_45 = arith.constant 9.99999997E-7 : f32
    %136 = vector.broadcast %cst_45 : f32 to vector<1x1x256xf32>
    %137 = arith.addf %135, %136 : vector<1x1x256xf32>
    %138 = math.rsqrt %137 : vector<1x1x256xf32>
    %139 = vector.broadcast %138 : vector<1x1x256xf32> to vector<1x2x256xf32>
    %140 = arith.mulf %124, %139 : vector<1x2x256xf32>
    %141 = vector.shape_cast %8 : vector<2x1xf32> to vector<1x2x1xf32>
    %142 = vector.broadcast %141 : vector<1x2x1xf32> to vector<1x2x256xf32>
    %143 = arith.mulf %142, %140 : vector<1x2x256xf32>
    %144 = vector.shape_cast %14 : vector<2x1xf32> to vector<1x2x1xf32>
    %145 = vector.broadcast %144 : vector<1x2x1xf32> to vector<1x2x256xf32>
    %146 = arith.addf %143, %145 : vector<1x2x256xf32>
    %c0_46 = arith.constant 0 : index
    %c0_47 = arith.constant 0 : index
    %c0_48 = arith.constant 0 : index
    %c0_49 = arith.constant 0 : index
    %147 = vector.load %arg8[%c0_46, %c0_47, %c0_48, %c0_49] : memref<1x2x2x256xf32, #tpu.memory_space<vmem>>, vector<1x1x2x256xf32>
    %148 = vector.shape_cast %147 : vector<1x1x2x256xf32> to vector<1x2x256xf32>
    %149 = vector.shape_cast %146 : vector<1x2x256xf32> to vector<1x1x2x256xf32>
    tpu.vector_store %arg8[%c0_46, %c0_47, %c0_48, %c0_49], %149 {strides = array<i32>} : memref<1x2x2x256xf32, #tpu.memory_space<vmem>>, vector<1x1x2x256xf32>,
    %150 = vector.broadcast %138 : vector<1x1x256xf32> to vector<1x2x256xf32>
    %151 = arith.mulf %126, %150 : vector<1x2x256xf32>
    %152 = vector.shape_cast %11 : vector<2x1xf32> to vector<1x2x1xf32>
    %153 = vector.broadcast %152 : vector<1x2x1xf32> to vector<1x2x256xf32>
    %154 = arith.mulf %153, %151 : vector<1x2x256xf32>
    %155 = vector.shape_cast %17 : vector<2x1xf32> to vector<1x2x1xf32>
    %156 = vector.broadcast %155 : vector<1x2x1xf32> to vector<1x2x256xf32>
    %157 = arith.addf %154, %156 : vector<1x2x256xf32>
    %c0_50 = arith.constant 0 : index
    %c1_51 = arith.constant 1 : index
    %c0_52 = arith.constant 0 : index
    %c0_53 = arith.constant 0 : index
    %158 = vector.load %arg8[%c0_50, %c1_51, %c0_52, %c0_53] : memref<1x2x2x256xf32, #tpu.memory_space<vmem>>, vector<1x1x2x256xf32>
    %159 = vector.shape_cast %158 : vector<1x1x2x256xf32> to vector<1x2x256xf32>
    %160 = vector.shape_cast %157 : vector<1x2x256xf32> to vector<1x1x2x256xf32>
    tpu.vector_store %arg8[%c0_50, %c1_51, %c0_52, %c0_53], %160 {strides = array<i32>} : memref<1x2x2x256xf32, #tpu.memory_space<vmem>>, vector<1x1x2x256xf32>,
    return
  }
  func.func @transform_0(%arg0: i32) -> (i32, i32, i32) {
    %c0_i32 = arith.constant 0 : i32
    %c0_i32_0 = arith.constant 0 : i32
    %c0_i32_1 = arith.constant 0 : i32
    return %arg0, %c0_i32, %c0_i32_0 : i32, i32, i32
  }
  func.func @transform_1(%arg0: i32) -> (i32, i32, i32) {
    %c0_i32 = arith.constant 0 : i32
    %c0_i32_0 = arith.constant 0 : i32
    %c0_i32_1 = arith.constant 0 : i32
    %c0_i32_2 = arith.constant 0 : i32
    return %c0_i32, %c0_i32_0, %c0_i32_1 : i32, i32, i32
  }
  func.func @transform_2(%arg0: i32) -> (i32, i32, i32) {
    %c0_i32 = arith.constant 0 : i32
    %c0_i32_0 = arith.constant 0 : i32
    %c0_i32_1 = arith.constant 0 : i32
    %c0_i32_2 = arith.constant 0 : i32
    return %c0_i32, %c0_i32_0, %c0_i32_1 : i32, i32, i32
  }
  func.func @transform_3(%arg0: i32) -> (i32, i32) {
    %c0_i32 = arith.constant 0 : i32
    %c0_i32_0 = arith.constant 0 : i32
    %c0_i32_1 = arith.constant 0 : i32
    return %c0_i32, %c0_i32_0 : i32, i32
  }
  func.func @transform_4(%arg0: i32) -> (i32, i32) {
    %c0_i32 = arith.constant 0 : i32
    %c0_i32_0 = arith.constant 0 : i32
    %c0_i32_1 = arith.constant 0 : i32
    return %c0_i32, %c0_i32_0 : i32, i32
  }
  func.func @transform_5(%arg0: i32) -> (i32, i32) {
    %c0_i32 = arith.constant 0 : i32
    %c0_i32_0 = arith.constant 0 : i32
    %c0_i32_1 = arith.constant 0 : i32
    return %c0_i32, %c0_i32_0 : i32, i32
  }
  func.func @transform_6(%arg0: i32) -> (i32, i32) {
    %c0_i32 = arith.constant 0 : i32
    %c0_i32_0 = arith.constant 0 : i32
    %c0_i32_1 = arith.constant 0 : i32
    return %c0_i32, %c0_i32_0 : i32, i32
  }
  func.func @transform_7(%arg0: i32) -> (i32, i32, i32, i32) {
    %c0_i32 = arith.constant 0 : i32
    %c0_i32_0 = arith.constant 0 : i32
    %c0_i32_1 = arith.constant 0 : i32
    %c0_i32_2 = arith.constant 0 : i32
    return %arg0, %c0_i32, %c0_i32_0, %c0_i32_1 : i32, i32, i32, i32
  }
}

module attributes {stable_mosaic.version = 11 : i64} {
  func.func @glf_kernel(%arg0: i32, %arg1: memref<1x4x256xf32, #tpu.memory_space<vmem>>, %arg2: memref<6x4x1xf32, #tpu.memory_space<vmem>>, %arg3: memref<9x2x256xf32, #tpu.memory_space<vmem>>, %arg4: memref<2x256xf32, #tpu.memory_space<vmem>>, %arg5: memref<2x256xf32, #tpu.memory_space<vmem>>, %arg6: memref<256x512xbf16, #tpu.memory_space<vmem>>, %arg7: memref<512x256xbf16, #tpu.memory_space<vmem>>, %arg8: memref<1x2x2x256xf32, #tpu.memory_space<vmem>>) attributes {dimension_semantics = [#tpu.dimension_semantics<parallel>], iteration_bounds = array<i64: 2>, scalar_prefetch = 0 : i64, scratch_operands = 0 : i64, tpu.core_type = #tpu.core_type<tc>, window_params = [{transform_indices = @transform_0, window_bounds = array<i64: 1, 4, 256>}, {pipeline_mode = #tpu.pipeline_mode<synchronous>, transform_indices = @transform_1, window_bounds = array<i64: 6, 4, 1>}, {pipeline_mode = #tpu.pipeline_mode<synchronous>, transform_indices = @transform_2, window_bounds = array<i64: 9, 2, 256>}, {pipeline_mode = #tpu.pipeline_mode<synchronous>, transform_indices = @transform_3, window_bounds = array<i64: 2, 256>}, {pipeline_mode = #tpu.pipeline_mode<synchronous>, transform_indices = @transform_4, window_bounds = array<i64: 2, 256>}, {pipeline_mode = #tpu.pipeline_mode<synchronous>, transform_indices = @transform_5, window_bounds = array<i64: 256, 512>}, {pipeline_mode = #tpu.pipeline_mode<synchronous>, transform_indices = @transform_6, window_bounds = array<i64: 512, 256>}, {transform_indices = @transform_7, window_bounds = array<i64: 1, 2, 2, 256>}]} {
    %c0 = arith.constant 0 : index
    %c0_0 = arith.constant 0 : index
    %c0_1 = arith.constant 0 : index
    %0 = vector.load %arg1[%c0, %c0_0, %c0_1] : memref<1x4x256xf32, #tpu.memory_space<vmem>>, vector<1x4x256xf32>
    %c0_2 = arith.constant 0 : index
    %c0_3 = arith.constant 0 : index
    %c0_4 = arith.constant 0 : index
    %1 = vector.load %arg2[%c0_2, %c0_3, %c0_4] : memref<6x4x1xf32, #tpu.memory_space<vmem>>, vector<6x4x1xf32>
    %2 = vector.extract_strided_slice %1 {offsets = [0, 0, 0], sizes = [1, 4, 1], strides = [1, 1, 1]} : vector<6x4x1xf32> to vector<1x4x1xf32>
    %3 = vector.shape_cast %2 : vector<1x4x1xf32> to vector<4x1xf32>
    %4 = vector.extract_strided_slice %1 {offsets = [1, 0, 0], sizes = [1, 4, 1], strides = [1, 1, 1]} : vector<6x4x1xf32> to vector<1x4x1xf32>
    %5 = vector.shape_cast %4 : vector<1x4x1xf32> to vector<4x1xf32>
    %6 = vector.extract_strided_slice %1 {offsets = [2, 0, 0], sizes = [1, 4, 1], strides = [1, 1, 1]} : vector<6x4x1xf32> to vector<1x4x1xf32>
    %7 = vector.shape_cast %6 : vector<1x4x1xf32> to vector<4x1xf32>
    %8 = vector.extract_strided_slice %7 {offsets = [0, 0], sizes = [2, 1], strides = [1, 1]} : vector<4x1xf32> to vector<2x1xf32>
    %9 = vector.extract_strided_slice %1 {offsets = [3, 0, 0], sizes = [1, 4, 1], strides = [1, 1, 1]} : vector<6x4x1xf32> to vector<1x4x1xf32>
    %10 = vector.shape_cast %9 : vector<1x4x1xf32> to vector<4x1xf32>
    %11 = vector.extract_strided_slice %10 {offsets = [0, 0], sizes = [2, 1], strides = [1, 1]} : vector<4x1xf32> to vector<2x1xf32>
    %12 = vector.extract_strided_slice %1 {offsets = [4, 0, 0], sizes = [1, 4, 1], strides = [1, 1, 1]} : vector<6x4x1xf32> to vector<1x4x1xf32>
    %13 = vector.shape_cast %12 : vector<1x4x1xf32> to vector<4x1xf32>
    %14 = vector.extract_strided_slice %13 {offsets = [0, 0], sizes = [2, 1], strides = [1, 1]} : vector<4x1xf32> to vector<2x1xf32>
    %15 = vector.extract_strided_slice %1 {offsets = [5, 0, 0], sizes = [1, 4, 1], strides = [1, 1, 1]} : vector<6x4x1xf32> to vector<1x4x1xf32>
    %16 = vector.shape_cast %15 : vector<1x4x1xf32> to vector<4x1xf32>
    %17 = vector.extract_strided_slice %16 {offsets = [0, 0], sizes = [2, 1], strides = [1, 1]} : vector<4x1xf32> to vector<2x1xf32>
    %cst = arith.constant dense<0.000000e+00> : vector<1x256xf32>
    %18 = vector.multi_reduction <add>, %0, %cst [1] : vector<1x4x256xf32> to vector<1x256xf32>
    %19 = vector.shape_cast %18 : vector<1x256xf32> to vector<1x1x256xf32>
    %cst_5 = arith.constant 4.000000e+00 : f32
    %20 = vector.broadcast %cst_5 : f32 to vector<1x1x256xf32>
    %21 = arith.divf %19, %20 : vector<1x1x256xf32>
    %22 = vector.broadcast %21 : vector<1x1x256xf32> to vector<1x4x256xf32>
    %23 = arith.subf %0, %22 : vector<1x4x256xf32>
    %24 = arith.mulf %23, %23 : vector<1x4x256xf32>
    %cst_6 = arith.constant dense<0.000000e+00> : vector<1x256xf32>
    %25 = vector.multi_reduction <add>, %24, %cst_6 [1] : vector<1x4x256xf32> to vector<1x256xf32>
    %26 = vector.shape_cast %25 : vector<1x256xf32> to vector<1x1x256xf32>
    %cst_7 = arith.constant 4.000000e+00 : f32
    %27 = vector.broadcast %cst_7 : f32 to vector<1x1x256xf32>
    %28 = arith.divf %26, %27 : vector<1x1x256xf32>
    %cst_8 = arith.constant 9.99999997E-7 : f32
    %29 = vector.broadcast %cst_8 : f32 to vector<1x1x256xf32>
    %30 = arith.addf %28, %29 : vector<1x1x256xf32>
    %31 = math.rsqrt %30 : vector<1x1x256xf32>
    %32 = vector.broadcast %31 : vector<1x1x256xf32> to vector<1x4x256xf32>
    %33 = arith.mulf %23, %32 : vector<1x4x256xf32>
    %34 = vector.shape_cast %3 : vector<4x1xf32> to vector<1x4x1xf32>
    %35 = vector.broadcast %34 : vector<1x4x1xf32> to vector<1x4x256xf32>
    %36 = arith.mulf %35, %33 : vector<1x4x256xf32>
    %37 = vector.shape_cast %5 : vector<4x1xf32> to vector<1x4x1xf32>
    %38 = vector.broadcast %37 : vector<1x4x1xf32> to vector<1x4x256xf32>
    %39 = arith.addf %36, %38 : vector<1x4x256xf32>
    %40 = vector.extract_strided_slice %39 {offsets = [0, 0, 0], sizes = [1, 2, 256], strides = [1, 1, 1]} : vector<1x4x256xf32> to vector<1x2x256xf32>
    %41 = vector.extract_strided_slice %39 {offsets = [0, 2, 0], sizes = [1, 2, 256], strides = [1, 1, 1]} : vector<1x4x256xf32> to vector<1x2x256xf32>
    %c4 = arith.constant 4 : index
    %c0_9 = arith.constant 0 : index
    %c0_10 = arith.constant 0 : index
    %42 = vector.load %arg3[%c4, %c0_9, %c0_10] : memref<9x2x256xf32, #tpu.memory_space<vmem>>, vector<1x2x256xf32>
    %43 = vector.shape_cast %42 : vector<1x2x256xf32> to vector<2x256xf32>
    %44 = vector.shape_cast %43 : vector<2x256xf32> to vector<1x2x256xf32>
    %45 = arith.mulf %44, %40 : vector<1x2x256xf32>
    %c17_i32 = arith.constant 17 : i32
    %46 = tpu.dynamic_rotate %40 by %c17_i32 dim 2 : vector<1x2x256xf32>, i32 -> vector<1x2x256xf32>
    %c0_11 = arith.constant 0 : index
    %c0_12 = arith.constant 0 : index
    %c0_13 = arith.constant 0 : index
    %47 = vector.load %arg3[%c0_11, %c0_12, %c0_13] : memref<9x2x256xf32, #tpu.memory_space<vmem>>, vector<1x2x256xf32>
    %48 = vector.shape_cast %47 : vector<1x2x256xf32> to vector<2x256xf32>
    %49 = vector.shape_cast %48 : vector<2x256xf32> to vector<1x2x256xf32>
    %50 = arith.mulf %49, %46 : vector<1x2x256xf32>
    %51 = arith.addf %45, %50 : vector<1x2x256xf32>
    %c16_i32 = arith.constant 16 : i32
    %52 = tpu.dynamic_rotate %40 by %c16_i32 dim 2 : vector<1x2x256xf32>, i32 -> vector<1x2x256xf32>
    %c1 = arith.constant 1 : index
    %c0_14 = arith.constant 0 : index
    %c0_15 = arith.constant 0 : index
    %53 = vector.load %arg3[%c1, %c0_14, %c0_15] : memref<9x2x256xf32, #tpu.memory_space<vmem>>, vector<1x2x256xf32>
    %54 = vector.shape_cast %53 : vector<1x2x256xf32> to vector<2x256xf32>
    %55 = vector.shape_cast %54 : vector<2x256xf32> to vector<1x2x256xf32>
    %56 = arith.mulf %55, %52 : vector<1x2x256xf32>
    %57 = arith.addf %51, %56 : vector<1x2x256xf32>
    %c15_i32 = arith.constant 15 : i32
    %58 = tpu.dynamic_rotate %40 by %c15_i32 dim 2 : vector<1x2x256xf32>, i32 -> vector<1x2x256xf32>
    %c2 = arith.constant 2 : index
    %c0_16 = arith.constant 0 : index
    %c0_17 = arith.constant 0 : index
    %59 = vector.load %arg3[%c2, %c0_16, %c0_17] : memref<9x2x256xf32, #tpu.memory_space<vmem>>, vector<1x2x256xf32>
    %60 = vector.shape_cast %59 : vector<1x2x256xf32> to vector<2x256xf32>
    %61 = vector.shape_cast %60 : vector<2x256xf32> to vector<1x2x256xf32>
    %62 = arith.mulf %61, %58 : vector<1x2x256xf32>
    %63 = arith.addf %57, %62 : vector<1x2x256xf32>
    %c1_i32 = arith.constant 1 : i32
    %64 = tpu.dynamic_rotate %40 by %c1_i32 dim 2 : vector<1x2x256xf32>, i32 -> vector<1x2x256xf32>
    %c3 = arith.constant 3 : index
    %c0_18 = arith.constant 0 : index
    %c0_19 = arith.constant 0 : index
    %65 = vector.load %arg3[%c3, %c0_18, %c0_19] : memref<9x2x256xf32, #tpu.memory_space<vmem>>, vector<1x2x256xf32>
    %66 = vector.shape_cast %65 : vector<1x2x256xf32> to vector<2x256xf32>
    %67 = vector.shape_cast %66 : vector<2x256xf32> to vector<1x2x256xf32>
    %68 = arith.mulf %67, %64 : vector<1x2x256xf32>
    %69 = arith.addf %63, %68 : vector<1x2x256xf32>
    %c255_i32 = arith.constant 255 : i32
    %70 = tpu.dynamic_rotate %40 by %c255_i32 dim 2 : vector<1x2x256xf32>, i32 -> vector<1x2x256xf32>
    %c5 = arith.constant 5 : index
    %c0_20 = arith.constant 0 : index
    %c0_21 = arith.constant 0 : index
    %71 = vector.load %arg3[%c5, %c0_20, %c0_21] : memref<9x2x256xf32, #tpu.memory_space<vmem>>, vector<1x2x256xf32>
    %72 = vector.shape_cast %71 : vector<1x2x256xf32> to vector<2x256xf32>
    %73 = vector.shape_cast %72 : vector<2x256xf32> to vector<1x2x256xf32>
    %74 = arith.mulf %73, %70 : vector<1x2x256xf32>
    %75 = arith.addf %69, %74 : vector<1x2x256xf32>
    %c241_i32 = arith.constant 241 : i32
    %76 = tpu.dynamic_rotate %40 by %c241_i32 dim 2 : vector<1x2x256xf32>, i32 -> vector<1x2x256xf32>
    %c6 = arith.constant 6 : index
    %c0_22 = arith.constant 0 : index
    %c0_23 = arith.constant 0 : index
    %77 = vector.load %arg3[%c6, %c0_22, %c0_23] : memref<9x2x256xf32, #tpu.memory_space<vmem>>, vector<1x2x256xf32>
    %78 = vector.shape_cast %77 : vector<1x2x256xf32> to vector<2x256xf32>
    %79 = vector.shape_cast %78 : vector<2x256xf32> to vector<1x2x256xf32>
    %80 = arith.mulf %79, %76 : vector<1x2x256xf32>
    %81 = arith.addf %75, %80 : vector<1x2x256xf32>
    %c240_i32 = arith.constant 240 : i32
    %82 = tpu.dynamic_rotate %40 by %c240_i32 dim 2 : vector<1x2x256xf32>, i32 -> vector<1x2x256xf32>
    %c7 = arith.constant 7 : index
    %c0_24 = arith.constant 0 : index
    %c0_25 = arith.constant 0 : index
    %83 = vector.load %arg3[%c7, %c0_24, %c0_25] : memref<9x2x256xf32, #tpu.memory_space<vmem>>, vector<1x2x256xf32>
    %84 = vector.shape_cast %83 : vector<1x2x256xf32> to vector<2x256xf32>
    %85 = vector.shape_cast %84 : vector<2x256xf32> to vector<1x2x256xf32>
    %86 = arith.mulf %85, %82 : vector<1x2x256xf32>
    %87 = arith.addf %81, %86 : vector<1x2x256xf32>
    %c239_i32 = arith.constant 239 : i32
    %88 = tpu.dynamic_rotate %40 by %c239_i32 dim 2 : vector<1x2x256xf32>, i32 -> vector<1x2x256xf32>
    %c8 = arith.constant 8 : index
    %c0_26 = arith.constant 0 : index
    %c0_27 = arith.constant 0 : index
    %89 = vector.load %arg3[%c8, %c0_26, %c0_27] : memref<9x2x256xf32, #tpu.memory_space<vmem>>, vector<1x2x256xf32>
    %90 = vector.shape_cast %89 : vector<1x2x256xf32> to vector<2x256xf32>
    %91 = vector.shape_cast %90 : vector<2x256xf32> to vector<1x2x256xf32>
    %92 = arith.mulf %91, %88 : vector<1x2x256xf32>
    %93 = arith.addf %87, %92 : vector<1x2x256xf32>
    %94 = vector.shape_cast %41 : vector<1x2x256xf32> to vector<2x256xf32>
    %95 = arith.truncf %94 : vector<2x256xf32> to vector<2x256xbf16>
    %c0_28 = arith.constant 0 : index
    %c0_29 = arith.constant 0 : index
    %96 = vector.load %arg6[%c0_28, %c0_29] : memref<256x512xbf16, #tpu.memory_space<vmem>>, vector<256x512xbf16>
    %cst_30 = arith.constant dense<0.000000e+00> : vector<2x512xf32>
    %97 = tpu.matmul %95, %96, %cst_30 {dimension_numbers = #tpu.dot_dimension_numbers<[1], [0], [0], [1], [0, 0, 1, 1], [], []>} : vector<2x256xbf16>, vector<256x512xbf16>, vector<2x512xf32> -> vector<2x512xf32>
    %98 = vector.extract_strided_slice %97 {offsets = [0, 0], sizes = [2, 256], strides = [1, 1]} : vector<2x512xf32> to vector<2x256xf32>
    %99 = vector.extract_strided_slice %97 {offsets = [0, 256], sizes = [2, 256], strides = [1, 1]} : vector<2x512xf32> to vector<2x256xf32>
    %c0_31 = arith.constant 0 : index
    %c0_32 = arith.constant 0 : index
    %100 = vector.load %arg4[%c0_31, %c0_32] : memref<2x256xf32, #tpu.memory_space<vmem>>, vector<2x256xf32>
    %c0_33 = arith.constant 0 : index
    %c0_34 = arith.constant 0 : index
    %101 = vector.load %arg5[%c0_33, %c0_34] : memref<2x256xf32, #tpu.memory_space<vmem>>, vector<2x256xf32>
    %102 = arith.mulf %98, %100 : vector<2x256xf32>
    %103 = arith.mulf %99, %101 : vector<2x256xf32>
    %104 = arith.subf %102, %103 : vector<2x256xf32>
    %105 = arith.truncf %104 : vector<2x256xf32> to vector<2x256xbf16>
    %106 = arith.mulf %98, %101 : vector<2x256xf32>
    %107 = arith.mulf %99, %100 : vector<2x256xf32>
    %108 = arith.addf %106, %107 : vector<2x256xf32>
    %109 = arith.truncf %108 : vector<2x256xf32> to vector<2x256xbf16>
    %110 = tpu.concatenate %105, %109 in 1 : vector<2x256xbf16>, vector<2x256xbf16> -> vector<2x512xbf16>
    %c0_35 = arith.constant 0 : index
    %c0_36 = arith.constant 0 : index
    %111 = vector.load %arg7[%c0_35, %c0_36] : memref<512x256xbf16, #tpu.memory_space<vmem>>, vector<512x256xbf16>
    %cst_37 = arith.constant dense<0.000000e+00> : vector<2x256xf32>
    %112 = tpu.matmul %110, %111, %cst_37 {dimension_numbers = #tpu.dot_dimension_numbers<[1], [0], [0], [1], [0, 0, 1, 1], [], []>} : vector<2x512xbf16>, vector<512x256xbf16>, vector<2x256xf32> -> vector<2x256xf32>
    %cst_38 = arith.constant 3.906250e-03 : f32
    %113 = vector.broadcast %cst_38 : f32 to vector<2x256xf32>
    %114 = arith.mulf %112, %113 : vector<2x256xf32>
    %115 = vector.shape_cast %114 : vector<2x256xf32> to vector<1x2x256xf32>
    %cst_39 = arith.constant dense<0.000000e+00> : vector<1x256xf32>
    %116 = vector.multi_reduction <add>, %93, %cst_39 [1] : vector<1x2x256xf32> to vector<1x256xf32>
    %117 = vector.shape_cast %116 : vector<1x256xf32> to vector<1x1x256xf32>
    %cst_40 = arith.constant dense<0.000000e+00> : vector<1x256xf32>
    %118 = vector.multi_reduction <add>, %115, %cst_40 [1] : vector<1x2x256xf32> to vector<1x256xf32>
    %119 = vector.shape_cast %118 : vector<1x256xf32> to vector<1x1x256xf32>
    %120 = arith.addf %117, %119 : vector<1x1x256xf32>
    %cst_41 = arith.constant 2.500000e-01 : f32
    %121 = vector.broadcast %cst_41 : f32 to vector<1x1x256xf32>
    %122 = arith.mulf %120, %121 : vector<1x1x256xf32>
    %123 = vector.broadcast %122 : vector<1x1x256xf32> to vector<1x2x256xf32>
    %124 = arith.subf %93, %123 : vector<1x2x256xf32>
    %125 = vector.broadcast %122 : vector<1x1x256xf32> to vector<1x2x256xf32>
    %126 = arith.subf %115, %125 : vector<1x2x256xf32>
    %127 = arith.mulf %124, %124 : vector<1x2x256xf32>
    %cst_42 = arith.constant dense<0.000000e+00> : vector<1x256xf32>
    %128 = vector.multi_reduction <add>, %127, %cst_42 [1] : vector<1x2x256xf32> to vector<1x256xf32>
    %129 = vector.shape_cast %128 : vector<1x256xf32> to vector<1x1x256xf32>
    %130 = arith.mulf %126, %126 : vector<1x2x256xf32>
    %cst_43 = arith.constant dense<0.000000e+00> : vector<1x256xf32>
    %131 = vector.multi_reduction <add>, %130, %cst_43 [1] : vector<1x2x256xf32> to vector<1x256xf32>
    %132 = vector.shape_cast %131 : vector<1x256xf32> to vector<1x1x256xf32>
    %133 = arith.addf %129, %132 : vector<1x1x256xf32>
    %cst_44 = arith.constant 2.500000e-01 : f32
    %134 = vector.broadcast %cst_44 : f32 to vector<1x1x256xf32>
    %135 = arith.mulf %133, %134 : vector<1x1x256xf32>
    %cst_45 = arith.constant 9.99999997E-7 : f32
    %136 = vector.broadcast %cst_45 : f32 to vector<1x1x256xf32>
    %137 = arith.addf %135, %136 : vector<1x1x256xf32>
    %138 = math.rsqrt %137 : vector<1x1x256xf32>
    %139 = vector.broadcast %138 : vector<1x1x256xf32> to vector<1x2x256xf32>
    %140 = arith.mulf %124, %139 : vector<1x2x256xf32>
    %141 = vector.shape_cast %8 : vector<2x1xf32> to vector<1x2x1xf32>
    %142 = vector.broadcast %141 : vector<1x2x1xf32> to vector<1x2x256xf32>
    %143 = arith.mulf %142, %140 : vector<1x2x256xf32>
    %144 = vector.shape_cast %14 : vector<2x1xf32> to vector<1x2x1xf32>
    %145 = vector.broadcast %144 : vector<1x2x1xf32> to vector<1x2x256xf32>
    %146 = arith.addf %143, %145 : vector<1x2x256xf32>
    %c0_46 = arith.constant 0 : index
    %c0_47 = arith.constant 0 : index
    %c0_48 = arith.constant 0 : index
    %c0_49 = arith.constant 0 : index
    %147 = vector.load %arg8[%c0_46, %c0_47, %c0_48, %c0_49] : memref<1x2x2x256xf32, #tpu.memory_space<vmem>>, vector<1x1x2x256xf32>
    %148 = vector.shape_cast %147 : vector<1x1x2x256xf32> to vector<1x2x256xf32>
    %149 = vector.shape_cast %146 : vector<1x2x256xf32> to vector<1x1x2x256xf32>
    tpu.vector_store %arg8[%c0_46, %c0_47, %c0_48, %c0_49], %149 {strides = array<i32>} : memref<1x2x2x256xf32, #tpu.memory_space<vmem>>, vector<1x1x2x256xf32>,
    %150 = vector.broadcast %138 : vector<1x1x256xf32> to vector<1x2x256xf32>
    %151 = arith.mulf %126, %150 : vector<1x2x256xf32>
    %152 = vector.shape_cast %11 : vector<2x1xf32> to vector<1x2x1xf32>
    %153 = vector.broadcast %152 : vector<1x2x1xf32> to vector<1x2x256xf32>
    %154 = arith.mulf %153, %151 : vector<1x2x256xf32>
    %155 = vector.shape_cast %17 : vector<2x1xf32> to vector<1x2x1xf32>
    %156 = vector.broadcast %155 : vector<1x2x1xf32> to vector<1x2x256xf32>
    %157 = arith.addf %154, %156 : vector<1x2x256xf32>
    %c0_50 = arith.constant 0 : index
    %c1_51 = arith.constant 1 : index
    %c0_52 = arith.constant 0 : index
    %c0_53 = arith.constant 0 : index
    %158 = vector.load %arg8[%c0_50, %c1_51, %c0_52, %c0_53] : memref<1x2x2x256xf32, #tpu.memory_space<vmem>>, vector<1x1x2x256xf32>
    %159 = vector.shape_cast %158 : vector<1x1x2x256xf32> to vector<1x2x256xf32>
    %160 = vector.shape_cast %157 : vector<1x2x256xf32> to vector<1x1x2x256xf32>
    tpu.vector_store %arg8[%c0_50, %c1_51, %c0_52, %c0_53], %160 {strides = array<i32>} : memref<1x2x2x256xf32, #tpu.memory_space<vmem>>, vector<1x1x2x256xf32>,
    return
  }
  func.func @transform_0(%arg0: i32) -> (i32, i32, i32) {
    %c0_i32 = arith.constant 0 : i32
    %c0_i32_0 = arith.constant 0 : i32
    %c0_i32_1 = arith.constant 0 : i32
    return %arg0, %c0_i32, %c0_i32_0 : i32, i32, i32
  }
  func.func @transform_1(%arg0: i32) -> (i32, i32, i32) {
    %c0_i32 = arith.constant 0 : i32
    %c0_i32_0 = arith.constant 0 : i32
    %c0_i32_1 = arith.constant 0 : i32
    %c0_i32_2 = arith.constant 0 : i32
    return %c0_i32, %c0_i32_0, %c0_i32_1 : i32, i32, i32
  }
  func.func @transform_2(%arg0: i32) -> (i32, i32, i32) {
    %c0_i32 = arith.constant 0 : i32
    %c0_i32_0 = arith.constant 0 : i32
    %c0_i32_1 = arith.constant 0 : i32
    %c0_i32_2 = arith.constant 0 : i32
    return %c0_i32, %c0_i32_0, %c0_i32_1 : i32, i32, i32
  }
  func.func @transform_3(%arg0: i32) -> (i32, i32) {
    %c0_i32 = arith.constant 0 : i32
    %c0_i32_0 = arith.constant 0 : i32
    %c0_i32_1 = arith.constant 0 : i32
    return %c0_i32, %c0_i32_0 : i32, i32
  }
  func.func @transform_4(%arg0: i32) -> (i32, i32) {
    %c0_i32 = arith.constant 0 : i32
    %c0_i32_0 = arith.constant 0 : i32
    %c0_i32_1 = arith.constant 0 : i32
    return %c0_i32, %c0_i32_0 : i32, i32
  }
  func.func @transform_5(%arg0: i32) -> (i32, i32) {
    %c0_i32 = arith.constant 0 : i32
    %c0_i32_0 = arith.constant 0 : i32
    %c0_i32_1 = arith.constant 0 : i32
    return %c0_i32, %c0_i32_0 : i32, i32
  }
  func.func @transform_6(%arg0: i32) -> (i32, i32) {
    %c0_i32 = arith.constant 0 : i32
    %c0_i32_0 = arith.constant 0 : i32
    %c0_i32_1 = arith.constant 0 : i32
    return %c0_i32, %c0_i32_0 : i32, i32
  }
  func.func @transform_7(%arg0: i32) -> (i32, i32, i32, i32) {
    %c0_i32 = arith.constant 0 : i32
    %c0_i32_0 = arith.constant 0 : i32
    %c0_i32_1 = arith.constant 0 : i32
    %c0_i32_2 = arith.constant 0 : i32
    return %arg0, %c0_i32, %c0_i32_0, %c0_i32_1 : i32, i32, i32, i32
  }
}

</mosaic_0001>

<bundles_post_ra>
// kernel: squeeze.3
= control target key start
LH: loop header
LB: loop body
LE: loop exit
PB: predicated region body
PF: predicated region fallthrough
CT: control target
= control target key end

     0   :  { %s10_s10 = smov 3  ;;  %vm12_vm0 = vcmask 23552   ;;  %s22_s11 = smov 3  ;;  %vm19_vm1 = vcmask 72752   ;;  %vm26_vm2 = vcmask 48152   ;;  %s58_s0 = inlined_call_operand.vmem [shape: f32[2,3,3], index: 0, kind: input, shape index: {}]   ;;  %s59_s1 = inlined_call_operand.vmem [shape: f32[2,9], index: 1, kind: output, shape index: {}]  }
   0x1   :  { %v34_v0 = vld [vmem:[%s58_s0 + $0x4] sm:$0xf]  ;;  %v8_v1 = vld [vmem:[%s58_s0] sm:$0xf]  ;;  %s15_s0 = smov 3  ;;  %s37_s12 = smov 6  }
   0x2   :  { %7 = vst [vmem:[#allocation1 + $0x8] sm:$0xf] %v34_v0  ;;  %9 = vst [vmem:[#allocation1] sm:$0xf] %v8_v1  ;;  %s38_s13 = smov 3  }
   0x9   :  { %v16_v2 = vld [vmem:[#allocation1 + $0x2] ss:$8 sm:%s15_s0]   ;;  %v11_v3 = vld [vmem:[#allocation1] ss:$8 sm:%s10_s10]   ;;  %v23_v4 = vld [vmem:[#allocation1 + $0x1] ss:$8 sm:%s22_s11]  }
   0xa   :  { %17 = vrot.lane.b32.xlu0 %v16_v2, %s37_s12  ;;  %13 = vst.msk [vmem:[#allocation0] sm:$0x3] %vm12_vm0, %v11_v3  }
   0xe   :  { %24 = vrot.lane.b32.xlu0 %v23_v4, %s38_s13 }
  0x7c   :  { %v18_v5 = vpop.permute.xlu0 %17  }
  0x7d   :  { %20 = vst.msk [vmem:[#allocation0] sm:$0x3] %vm19_vm1, %v18_v5  }
  0x80   :  { %v25_v6 = vpop.permute.xlu0 %24  }
  0x81   :  { %27 = vst.msk [vmem:[#allocation0] sm:$0x3] %vm26_vm2, %v25_v6  }
  0x88   :  { %v31_v7 = vld [vmem:[#allocation0] sm:$0x3] }
  0x89   :  { %33 = vst [vmem:[%s59_s1] sm:$0x3] %v31_v7 }

// kernel: squeeze.5
= control target key start
LH: loop header
LB: loop body
LE: loop exit
PB: predicated region body
PF: predicated region fallthrough
CT: control target
= control target key end

     0   :  { %s7_s6 = smov 3  ;;  %s10_s7 = smov 3  ;;  %vm12_vm0 = vcmask 15360   ;;  %vm4_vm1 = vcmask 72704   ;;  %vm16_vm2 = vcmask 56320   ;;  %vm19_vm3 = vcmask 1048560   ;;  %s245_s0 = inlined_call_operand.vmem [shape: f32[2,16,9,1], index: 0, kind: input, shape index: {}]   ;;  %s246_s1 = inlined_call_operand.vmem [shape: f32[2,144], index: 1, kind: output, shape index: {}]  }
   0x1   :  { %v131_v0 = vld [vmem:[%s245_s0 + $0xe] ss:$16 sm:%s7_s6]   ;;  %s29_s12 = smov 3  ;;  %s22_s15 = smov 3  ;;  %vm26_vm4 = vcmask 1032104   ;;  %vm33_vm5 = vcmask 958304  }
   0x2   :  { %v132_v1 = vld [vmem:[%s245_s0 + $0xe] ss:$16 sm:%s10_s7]   ;;  %v134_v3 = vld [vmem:[%s245_s0 + $0xc] ss:$16 sm:%s29_s12]   ;;  %s163_s16 = smov 126   ;;  %s164_s17 = smov 108  }
   0x3   :  { %v13_v2 = vsel %vm12_vm0, %v132_v1, %v131_v0  ;;  %31 = vrot.lane.b32.xlu1 %v134_v3, %s164_s17  ;;  %s36_s18 = smov 3  ;;  %v133_v4 = vld [vmem:[%s245_s0 + $0xd] ss:$16 sm:%s22_s15]   ;;  %s43_s23 = smov 3  ;;  %vm40_vm6 = vcmask 884504   ;;  %vm47_vm7 = vcmask 810704  }
   0x4   :  { %14 = vrot.lane.b32.xlu0 %v13_v2, %s163_s16  ;;  %v135_v5 = vld [vmem:[%s245_s0 + $0xb] ss:$16 sm:%s36_s18]   ;;  %s50_s24 = smov 3  ;;  %s165_s25 = smov 117   ;;  %vm54_vm8 = vcmask 736904   ;;  %vm61_vm9 = vcmask 663104  }
   0x5   :  { %s166_s26 = smov 99   ;;  %v136_v6 = vld [vmem:[%s245_s0 + $0xa] ss:$16 sm:%s43_s23]   ;;  %v137_v7 = vld [vmem:[%s245_s0 + $0x9] ss:$16 sm:%s50_s24]   ;;  %s57_s2 = smov 3 }
   0x6   :  { %s64_s3 = smov 3  ;;  %s167_s4 = smov 90   ;;  %v138_v8 = vld [vmem:[%s245_s0 + $0x8] ss:$16 sm:%s57_s2]   ;;  %vm68_vm10 = vcmask 589304   ;;  %vm75_vm11 = vcmask 515504  }
   0x7   :  { %38 = vrot.lane.b32.xlu1 %v135_v5, %s166_s26  ;;  %s168_s5 = smov 81   ;;  %v139_v9 = vld [vmem:[%s245_s0 + $0x7] ss:$16 sm:%s64_s3]   ;;  %s71_s10 = smov 3  ;;  %vm82_vm12 = vcmask 441704   ;;  %vm89_vm13 = vcmask 367904  }
   0x8   :  { %24 = vrot.lane.b32.xlu0 %v133_v4, %s165_s25  ;;  %s78_s11 = smov 3  ;;  %s169_s12 = smov 72   ;;  %v140_v10 = vld [vmem:[%s245_s0 + $0x6] ss:$16 sm:%s71_s10]   ;;  %vm96_vm14 = vcmask 294104   ;;  %vm103_vm15 = vcmask 220304  }
   0x9   :  { %s170_s13 = smov 63   ;;  %s2_s16 = smov 3  ;;  %v141_v11 = vld [vmem:[%s245_s0 + $0x5] ss:$16 sm:%s78_s11]   ;;  %vm110_vm0 = vcmask 146504  }
   0xa   :  { %v3_v12 = vld [vmem:[%s245_s0] ss:$16 sm:%s2_s16]   ;;  %s85_s21 = smov 3  ;;  %s92_s22 = smov 3 }
   0xb   :  { %52 = vrot.lane.b32.xlu1 %v137_v7, %s168_s5  ;;  %5 = vst.msk [vmem:[#allocation0] sm:$0x3] %vm4_vm1, %v3_v12   ;;  %s171_s23 = smov 54   ;;  %s172_s24 = smov 45   ;;  %v142_v13 = vld [vmem:[%s245_s0 + $0x4] ss:$16 sm:%s85_s21]  }
   0xc   :  { %45 = vrot.lane.b32.xlu0 %v136_v6, %s167_s4  ;;  %v143_v14 = vld [vmem:[%s245_s0 + $0x3] ss:$16 sm:%s92_s22]   ;;  %s99_s29 = smov 3  ;;  %s106_s30 = smov 3  ;;  %vm117_vm1 = vcmask 130104  }
   0xd   :  { %s173_s2 = smov 36   ;;  %s174_s3 = smov 27   ;;  %v144_v15 = vld [vmem:[%s245_s0 + $0x2] ss:$16 sm:%s99_s29]   ;;  %v145_v16 = vld [vmem:[%s245_s0 + $0x1] ss:$16 sm:%s106_s30]  }
   0xe   :  { %s113_s8 = smov 3  ;;  %s175_s9 = smov 18  }
   0xf   :  { %66 = vrot.lane.b32.xlu1 %v139_v9, %s170_s13  ;;  %s176_s10 = smov 9   ;;  %v146_v17 = vld [vmem:[%s245_s0 + $0xf] ss:$16 sm:%s113_s8]   ;;  %s177_s0 = smov 7  }
  0x10   :  { %59 = vrot.lane.b32.xlu0 %v138_v8, %s169_s12 }
  0x13   :  { %80 = vrot.lane.b32.xlu1 %v141_v11, %s172_s24 }
  0x14   :  { %73 = vrot.lane.b32.xlu0 %v140_v10, %s171_s23 }
  0x17   :  { %94 = vrot.lane.b32.xlu1 %v143_v14, %s174_s3 }
  0x18   :  { %87 = vrot.lane.b32.xlu0 %v142_v13, %s173_s2 }
  0x1b   :  { %108 = vrot.lane.b32.xlu1 %v145_v16, %s176_s10 }
  0x1c   :  { %101 = vrot.lane.b32.xlu0 %v144_v15, %s175_s9 }
  0x20   :  { %115 = vrot.lane.b32.xlu0 %v146_v17, %s177_s0 }
  0x75   :  { %v32_v19 = vpop.permute.xlu1 %31  }
  0x76   :  { %v15_v18 = vpop.permute.xlu0 %14  }
  0x77   :  { %18 = vst.msk [vmem:[#allocation0 + $0x8] sm:$0x3] %vm16_vm2, %v15_v18  }
  0x78   :  { %20 = vst.msk [vmem:[#allocation0] sm:$0x3] %vm19_vm3, %v15_v18  }
  0x79   :  { %v39_v21 = vpop.permute.xlu1 %38  }
  0x7a   :  { %v25_v20 = vpop.permute.xlu0 %24  }
  0x7b   :  { %27 = vst.msk [vmem:[#allocation0] sm:$0x3] %vm26_vm4, %v25_v20  }
  0x7c   :  { %34 = vst.msk [vmem:[#allocation0] sm:$0x3] %vm33_vm5, %v32_v19  }
  0x7d   :  { %41 = vst.msk [vmem:[#allocation0] sm:$0x3] %vm40_vm6, %v39_v21   ;;  %v53_v23 = vpop.permute.xlu1 %52  }
  0x7e   :  { %v46_v22 = vpop.permute.xlu0 %45  }
  0x7f   :  { %48 = vst.msk [vmem:[#allocation0] sm:$0x3] %vm47_vm7, %v46_v22  }
  0x80   :  { %55 = vst.msk [vmem:[#allocation0] sm:$0x3] %vm54_vm8, %v53_v23  }
  0x81   :  { %v67_v25 = vpop.permute.xlu1 %66  }
  0x82   :  { %v60_v24 = vpop.permute.xlu0 %59  }
  0x83   :  { %62 = vst.msk [vmem:[#allocation0] sm:$0x3] %vm61_vm9, %v60_v24  }
  0x84   :  { %69 = vst.msk [vmem:[#allocation0] sm:$0x3] %vm68_vm10, %v67_v25  }
  0x85   :  { %v81_v27 = vpop.permute.xlu1 %80  }
  0x86   :  { %v74_v26 = vpop.permute.xlu0 %73  }
  0x87   :  { %76 = vst.msk [vmem:[#allocation0] sm:$0x3] %vm75_vm11, %v74_v26  }
  0x88   :  { %83 = vst.msk [vmem:[#allocation0] sm:$0x3] %vm82_vm12, %v81_v27  }
  0x89   :  { %v95_v29 = vpop.permute.xlu1 %94  }
  0x8a   :  { %v88_v28 = vpop.permute.xlu0 %87  }
  0x8b   :  { %90 = vst.msk [vmem:[#allocation0] sm:$0x3] %vm89_vm13, %v88_v28  }
  0x8c   :  { %97 = vst.msk [vmem:[#allocation0] sm:$0x3] %vm96_vm14, %v95_v29  }
  0x8d   :  { %v109_v31 = vpop.permute.xlu1 %108  }
  0x8e   :  { %v102_v30 = vpop.permute.xlu0 %101  }
  0x8f   :  { %104 = vst.msk [vmem:[#allocation0] sm:$0x3] %vm103_vm15, %v102_v30  }
  0x90   :  { %111 = vst.msk [vmem:[#allocation0] sm:$0x3] %vm110_vm0, %v109_v31  }
  0x92   :  { %v116_v32 = vpop.permute.xlu0 %115  }
  0x93   :  { %119 = vst.msk [vmem:[#allocation0 + $0x8] sm:$0x3] %vm117_vm1, %v116_v32  }
  0x97   :  { %v123_v33 = vld [vmem:[#allocation0] sm:$0x3] }
  0x98   :  { %125 = vst [vmem:[%s246_s1] sm:$0x3] %v123_v33 }
  0x9a   :  { %v127_v34 = vld [vmem:[#allocation0 + $0x8] sm:$0x3] }
  0x9b   :  { %147 = vst [vmem:[%s246_s1 + $0x2] sm:$0x3] %v127_v34 }

// kernel: global_local_filter.1
= control target key start
LH: loop header
LB: loop body
LE: loop exit
PB: predicated region body
PF: predicated region fallthrough
CT: control target
= control target key end

     0   :  { %s2209_s24 = smov 0   ;;  %s2733_s0 = inlined_call_operand.vmem [shape: f32[2,4,256], index: 0, kind: input, shape index: {}]   ;;  %s2734_s1 = inlined_call_operand.vmem [shape: f32[6,4,1], index: 1, kind: input, shape index: {}]   ;;  %s2735_s2 = inlined_call_operand.vmem [shape: f32[9,2,256], index: 2, kind: input, shape index: {}]   ;;  %s2736_s3 = inlined_call_operand.vmem [shape: f32[2,256], index: 3, kind: input, shape index: {}]   ;;  %s2737_s4 = inlined_call_operand.vmem [shape: f32[2,256], index: 4, kind: input, shape index: {}]   ;;  %s2738_s5 = inlined_call_operand.vmem [shape: bf16[256,512], index: 5, kind: input, shape index: {}]   ;;  %s2739_s6 = inlined_call_operand.vmem [shape: bf16[512,256], index: 6, kind: input, shape index: {}]   ;;  %s2740_s7 = inlined_call_operand.vmem [shape: f32[2,2,2,256], index: 7, kind: output, shape index: {}]  }
   0x1 LB: > { %s1772_s25 = sadd.s32 4294967295, %s2157_s24   ;;  %p1776_p0 = scmp.ge.s32.totalorder %s2157_s24, 1  ;;  %s2157_s24 = sphi %s2209_s24, %s17_s24  }
   0x2   : > { %p237_p1 = scmp.lt.s32.totalorder %s2157_s24, 3 }
   0x4   : > { %p238_p2 = pnand %p1776_p0, %p237_p1 }
   0x5   : > { %v280_v0 = vld [vmem:[%s2734_s1] sm:$0xf] (!%p238_p2)  ;;  %v2159_v1 = vmov (!%p238_p2), 0   ;;  %v1950_v2 = vld [vmem:[%s2738_s5 + $0x4] ss:$16 sps:$4 sm:$0xff] (!%p238_p2)   ;;  %p269_p3 = scmp.lt.s32.totalorder (!%p238_p2), %s1772_s25, 1 }
   0x6   : > { %241 = sbr.rel (%p238_p2) target bundleno = 786 (0x312), region = 48  ;;  %1948 = vset.pattern.permute.xlu0 (!%p238_p2), %v2159_v1  ;;  %v1952_v3 = vld [vmem:[%s2738_s5] ss:$16 sps:$4 sm:$0xff] (!%p238_p2)   ;;  %1949 = vset.pattern.permute.xlu1 (!%p238_p2), %v2159_v1  ;;  %v1953_v4 = vld [vmem:[%s2738_s5 + $0x24] ss:$16 sps:$4 sm:$0xff] (!%p238_p2)   ;;  %vm289_vm0 = vcmask (!%p238_p2), 1043456  }
   0x7   : > { %343 = vperm.xlu0 (!%p238_p2), %1948, %v280_v0   ;;  %v281_v5 = vld [vmem:[%s2734_s1 + $0x4] sm:$0xf] (!%p238_p2)  ;;  %941 = vmatprep.subr.bf16.mxu1 (!%p238_p2), %v1950_v2  ;;  %v1955_v6 = vld [vmem:[%s2738_s5 + $0x20] ss:$16 sps:$4 sm:$0xff] (!%p238_p2)   ;;  %v2001_v54 = vld [vmem:[%s2738_s5 + $0xc] ss:$16 sps:$4 sm:$0xff] (!%p238_p2)  }
   0x8   : > { %942 = vmatpush1.bf16.msra.mxu1 (!%p238_p2), %v1952_v3  ;;  %v1956_v7 = vld [vmem:[%s2738_s5 + $0x44] ss:$16 sps:$4 sm:$0xff] (!%p238_p2)   ;;  %v1958_v8 = vld [vmem:[%s2738_s5 + $0x40] ss:$16 sps:$4 sm:$0xff] (!%p238_p2)   ;;  %s2160_s16 = smov (!%p238_p2), 16   ;;  %s2161_s17 = smov (!%p238_p2), 17  }
   0x9   : > { %943 = vmatprep.subr.bf16.mxu1 (!%p238_p2), %v1953_v4  ;;  %v1959_v9 = vld [vmem:[%s2738_s5 + $0x64] ss:$16 sps:$4 sm:$0xff] (!%p238_p2)   ;;  %v1961_v10 = vld [vmem:[%s2738_s5 + $0x60] ss:$16 sps:$4 sm:$0xff] (!%p238_p2)   ;;  %s2162_s20 = smov (!%p238_p2), 15   ;;  %s2163_s28 = smov (!%p238_p2), 1  }
   0xa   : > { %v1962_v11 = vld [vmem:[%s2738_s5 + $0x84] ss:$16 sps:$4 sm:$0xff] (!%p238_p2)   ;;  %v1964_v12 = vld [vmem:[%s2738_s5 + $0x80] ss:$16 sps:$4 sm:$0xff] (!%p238_p2)   ;;  %s2164_s10 = smov (!%p238_p2), 127   ;;  %s2165_s15 = smov (!%p238_p2), 113  }
   0xb   : > { %353 = vperm.xlu0 (!%p238_p2), %1948, %v281_v5   ;;  %v1965_v13 = vld [vmem:[%s2738_s5 + $0xa4] ss:$16 sps:$4 sm:$0xff] (!%p238_p2)   ;;  %v1967_v15 = vld [vmem:[%s2738_s5 + $0xa0] ss:$16 sps:$4 sm:$0xff] (!%p238_p2)   ;;  %vm1542_vm9 = vcmask (!%p238_p2), 1041408  }
   0xc   : > { %944 = vmatpush1.bf16.msra.mxu1 (!%p238_p2), %v1955_v6  ;;  %v1968_v16 = vld [vmem:[%s2738_s5 + $0xc4] ss:$16 sps:$4 sm:$0xff] (!%p238_p2)   ;;  %v1970_v18 = vld [vmem:[%s2738_s5 + $0xc0] ss:$16 sps:$4 sm:$0xff] (!%p238_p2)  }
   0xd   : > { %945 = vmatprep.subr.bf16.mxu1 %v1956_v7  ;;  %s2742_s25 = smov (!%p269_p3, %s1772_s25), 1  ;;  %v1971_v19 = vld [vmem:[%s2738_s5 + $0xe4] ss:$16 sps:$4 sm:$0xff]   ;;  %v1973_v22 = vld [vmem:[%s2738_s5 + $0xe0] ss:$16 sps:$4 sm:$0xff]  }
   0xe   : > { %s1923_s27 = sshll.u32 %s2742_s25, 3  ;;  %v1974_v25 = vld [vmem:[%s2738_s5 + $0x104] ss:$16 sps:$4 sm:$0xff]   ;;  %v1976_v26 = vld [vmem:[%s2738_s5 + $0x100] ss:$16 sps:$4 sm:$0xff]  }
   0xf   : > { %s273_s9 = scalar_lea.vmem %s2733_s0, %s1923_s27  ;;  %v1977_v27 = vld [vmem:[%s2738_s5 + $0x124] ss:$16 sps:$4 sm:$0xff]   ;;  %v1979_v30 = vld [vmem:[%s2738_s5 + $0x120] ss:$16 sps:$4 sm:$0xff]  }
  0x10   : > { %946 = vmatpush1.bf16.msra.mxu1 %v1958_v8  ;;  %v279_v14 = vld [vmem:[%s273_s9] sm:$0xff] }
  0x11   : > { %947 = vmatprep.subr.bf16.mxu1 %v1959_v9  ;;  %v287_v17 = vcombine.high %v279_v14, %v279_v14  ;;  %v290_v20 = vsel %vm289_vm0, %v279_v14, 0.0  ;;  %v1980_v31 = vld [vmem:[%s2738_s5 + $0x144] ss:$16 sps:$4 sm:$0xff]   ;;  %v1982_v34 = vld [vmem:[%s2738_s5 + $0x140] ss:$16 sps:$4 sm:$0xff]  }
  0x12   : > { %v291_v23 = vrot.slane %v290_v20, 4  ;;  %v1983_v35 = vld [vmem:[%s2738_s5 + $0x164] ss:$16 sps:$4 sm:$0xff]   ;;  %v1985_v38 = vld [vmem:[%s2738_s5 + $0x160] ss:$16 sps:$4 sm:$0xff]  }
  0x13   : > { %v297_v21 = vsel %vm289_vm0, %v287_v17, 0.0  ;;  %v1986_v39 = vld [vmem:[%s2738_s5 + $0x184] ss:$16 sps:$4 sm:$0xff]   ;;  %v1988_v42 = vld [vmem:[%s2738_s5 + $0x180] ss:$16 sps:$4 sm:$0xff]  }
  0x14   : > { %948 = vmatpush1.bf16.msra.mxu1 %v1961_v10  ;;  %v298_v24 = vrot.slane %v297_v21, 4  ;;  %v292_v28 = vadd.f32 %v291_v23, %v290_v20  ;;  %v1989_v43 = vld [vmem:[%s2738_s5 + $0x1a4] ss:$16 sps:$4 sm:$0xff]   ;;  %v1991_v46 = vld [vmem:[%s2738_s5 + $0x1a0] ss:$16 sps:$4 sm:$0xff]  }
  0x15   : > { %949 = vmatprep.subr.bf16.mxu1 %v1962_v11  ;;  %v1993_v47 = vld [vmem:[%s2738_s5 + $0x1c4] ss:$16 sps:$4 sm:$0xff]   ;;  %v1995_v50 = vld [vmem:[%s2738_s5 + $0x1c0] ss:$16 sps:$4 sm:$0xff]  }
  0x16   : > { %v299_v29 = vadd.f32 %v298_v24, %v297_v21  ;;  %v293_v32 = vrot.slane %v292_v28, 2  ;;  %v1996_v51 = vld [vmem:[%s2738_s5 + $0x1e4] ss:$16 sps:$4 sm:$0xff]   ;;  %v1998_v53 = vld [vmem:[%s2738_s5 + $0x1e0] ss:$16 sps:$4 sm:$0xff]  }
  0x18   : > { %950 = vmatpush1.bf16.msra.mxu1 %v1964_v12  ;;  %v300_v33 = vrot.slane %v299_v29, 2  ;;  %v294_v36 = vadd.f32 %v293_v32, %v292_v28  ;;  %v1999_v28 = vld [vmem:[%s2738_s5 + $0x8] ss:$16 sps:$4 sm:$0xff]  }
  0x19   : > { %951 = vmatprep.subr.bf16.mxu1 %v1965_v13  ;;  %v2005_v32 = vld [vmem:[%s2738_s5 + $0x48] ss:$16 sps:$4 sm:$0xff]  }
  0x1a   : > { %v301_v37 = vadd.f32 %v300_v33, %v299_v29  ;;  %v295_v40 = vrot.slane %v294_v36, 1  ;;  %v2004_v29 = vld [vmem:[%s2738_s5 + $0x2c] ss:$16 sps:$4 sm:$0xff]  }
  0x1b   : > { %v2010_v33 = vld [vmem:[%s2738_s5 + $0x6c] ss:$16 sps:$4 sm:$0xff]  }
  0x1c   : > { %952 = vmatpush1.bf16.msra.mxu1 %v1967_v15  ;;  %v302_v41 = vrot.slane %v301_v37, 1  ;;  %v296_v44 = vadd.f32 %v295_v40, %v294_v36  ;;  %v2011_v36 = vld [vmem:[%s2738_s5 + $0x88] ss:$16 sps:$4 sm:$0xff]   ;;  %v2019_v40 = vld [vmem:[%s2738_s5 + $0xcc] ss:$16 sps:$4 sm:$0xff]  }
  0x1d   : > { %953 = vmatprep.subr.bf16.mxu1 %v1968_v16 }
  0x1e   : > { %v303_v45 = vadd.f32 %v302_v41, %v301_v37  ;;  %v305_v48 = vmul.f32 0.25, %v296_v44  ;;  %v2016_v37 = vld [vmem:[%s2738_s5 + $0xac] ss:$16 sps:$4 sm:$0xff]   ;;  %v2017_v41 = vld [vmem:[%s2738_s5 + $0xc8] ss:$16 sps:$4 sm:$0xff]  }
  0x1f   : > { %v2020_v44 = vld [vmem:[%s2738_s5 + $0xe8] ss:$16 sps:$4 sm:$0xff]  }
  0x20   : > { %954 = vmatpush1.bf16.msra.mxu1 %v1970_v18  ;;  %v306_v49 = vmul.f32 0.25, %v303_v45  ;;  %v2025_v45 = vld [vmem:[%s2738_s5 + $0x10c] ss:$16 sps:$4 sm:$0xff]  }
  0x21   : > { %955 = vmatprep.subr.bf16.mxu1 %v1971_v19 }
  0x22   : > { %v309_v52 = vcombine.low %v305_v48, %v306_v49  ;;  %v2026_v48 = vld [vmem:[%s2738_s5 + $0x128] ss:$16 sps:$4 sm:$0xff]   ;;  %v2031_v49 = vld [vmem:[%s2738_s5 + $0x14c] ss:$16 sps:$4 sm:$0xff]  }
  0x24   : > { %956 = vmatpush1.bf16.msra.mxu1 %v1973_v22  ;;  %v311_v55 = vsub.f32 %v279_v14, %v309_v52  ;;  %v2032_v52 = vld [vmem:[%s2738_s5 + $0x168] ss:$16 sps:$4 sm:$0xff]  }
  0x25   : > { %957 = vmatprep.subr.bf16.mxu1 %v1974_v25 }
  0x26   : > { %v312_v56 = vmul.f32 %v311_v55, %v311_v55 }
  0x28   : > { %958 = vmatpush1.bf16.msra.mxu1 %v1976_v26  ;;  %v314_v57 = vcombine.high %v312_v56, %v312_v56  ;;  %v316_v58 = vsel %vm289_vm0, %v312_v56, 0.0  ;;  %v2038_v56 = vld [vmem:[%s2738_s5 + $0x1a8] ss:$16 sps:$4 sm:$0xff]  }
  0x29   : > { %959 = vmatprep.subr.bf16.mxu1 %v1977_v27  ;;  %v317_v60 = vrot.slane %v316_v58, 4 }
  0x2a   : > { %v323_v59 = vsel %vm289_vm0, %v314_v57, 0.0  ;;  %v2043_v57 = vld [vmem:[%s2738_s5 + $0x1cc] ss:$16 sps:$4 sm:$0xff]  }
  0x2b   : > { %v324_v61 = vrot.slane %v323_v59, 4  ;;  %v318_v62 = vadd.f32 %v317_v60, %v316_v58  ;;  %v2041_v58 = vld [vmem:[%s2738_s5 + $0x1c8] ss:$16 sps:$4 sm:$0xff]  }
  0x2c   : > { %960 = vmatpush1.bf16.msra.mxu1 %v1979_v30  ;;  %v2002_v30 = vld [vmem:[%s2738_s5 + $0x28] ss:$16 sps:$4 sm:$0xff]  }
  0x2d   : > { %961 = vmatprep.subr.bf16.mxu1 %v1980_v31  ;;  %v325_v63 = vadd.f32 %v324_v61, %v323_v59  ;;  %v319_v0 = vrot.slane %v318_v62, 2  ;;  %v2007_v31 = vld [vmem:[%s2738_s5 + $0x4c] ss:$16 sps:$4 sm:$0xff]   ;;  %v2044_v60 = vld [vmem:[%s2738_s5 + $0x1e8] ss:$16 sps:$4 sm:$0xff]  }
  0x2e   : > { %v2046_v59 = vld [vmem:[%s2738_s5 + $0x1ec] ss:$16 sps:$4 sm:$0xff]  }
  0x2f   : > { %v326_v1 = vrot.slane %v325_v63, 2  ;;  %v320_v2 = vadd.f32 %v319_v0, %v318_v62  ;;  %v2047_v61 = vld [vmem:[%s2739_s6 + $0x4] ss:$8 sps:$4 sm:$0xff]   ;;  %v2049_v62 = vld [vmem:[%s2739_s6] ss:$8 sps:$4 sm:$0xff]  }
  0x30   : > { %962 = vmatpush1.bf16.msra.mxu1 %v1982_v34  ;;  %v2008_v34 = vld [vmem:[%s2738_s5 + $0x68] ss:$16 sps:$4 sm:$0xff]   ;;  %1447 = vmatprep.subr.bf16.mxu0 %v2047_v61 }
  0x31   : > { %963 = vmatprep.subr.bf16.mxu1 %v1983_v35  ;;  %v327_v3 = vadd.f32 %v326_v1, %v325_v63  ;;  %v321_v4 = vrot.slane %v320_v2, 1  ;;  %v2013_v35 = vld [vmem:[%s2738_s5 + $0x8c] ss:$16 sps:$4 sm:$0xff]   ;;  %1448 = vmatpush1.bf16.msra.mxu0 %v2049_v62  ;;  %v2052_v0 = vld [vmem:[%s2739_s6 + $0x10] ss:$8 sps:$4 sm:$0xff]  }
  0x32   : > { %v2050_v63 = vld [vmem:[%s2739_s6 + $0x14] ss:$8 sps:$4 sm:$0xff]   ;;  %v2053_v1 = vld [vmem:[%s2739_s6 + $0x24] ss:$8 sps:$4 sm:$0xff]  }
  0x33   : > { %v328_v5 = vrot.slane %v327_v3, 1  ;;  %v322_v6 = vadd.f32 %v321_v4, %v320_v2  ;;  %1449 = vmatprep.subr.bf16.mxu0 %v2050_v63  ;;  %v2055_v2 = vld [vmem:[%s2739_s6 + $0x20] ss:$8 sps:$4 sm:$0xff]   ;;  %v2058_v4 = vld [vmem:[%s2739_s6 + $0x30] ss:$8 sps:$4 sm:$0xff]  }
  0x34   : > { %964 = vmatpush1.bf16.msra.mxu1 %v1985_v38  ;;  %v2014_v38 = vld [vmem:[%s2738_s5 + $0xa8] ss:$16 sps:$4 sm:$0xff]   ;;  %v2100_v62 = vld [vmem:[%s2739_s6 + $0x114] ss:$8 sps:$4 sm:$0xff]  }
  0x35   : > { %965 = vmatprep.subr.bf16.mxu1 %v1986_v39  ;;  %v329_v7 = vadd.f32 %v328_v5, %v327_v3  ;;  %v330_v8 = vmul.f32 0.25, %v322_v6  ;;  %v282_v39 = vld [vmem:[%s2734_s1 + $0x8] sm:$0xf]  ;;  %1450 = vmatpush1.bf16.msra.mxu0 %v2052_v0  ;;  %v2056_v3 = vld [vmem:[%s2739_s6 + $0x34] ss:$8 sps:$4 sm:$0xff]  }
  0x36   : > { %1451 = vmatprep.subr.bf16.mxu0 %v2053_v1  ;;  %v2059_v5 = vld [vmem:[%s2739_s6 + $0x44] ss:$8 sps:$4 sm:$0xff]   ;;  %v2061_v6 = vld [vmem:[%s2739_s6 + $0x40] ss:$8 sps:$4 sm:$0xff]   ;;  %v2098_v0 = vld [vmem:[%s2739_s6 + $0x110] ss:$8 sps:$4 sm:$0xff]  }
  0x37   : > { %v331_v9 = vmul.f32 0.25, %v329_v7  ;;  %v332_v10 = vadd.f32 1e-06, %v330_v8  ;;  %v2062_v7 = vld [vmem:[%s2739_s6 + $0x54] ss:$8 sps:$4 sm:$0xff]  }
  0x38   : > { %966 = vmatpush1.bf16.msra.mxu1 %v1988_v42  ;;  %v284_v42 = vld [vmem:[%s2734_s1 + $0x10] sm:$0xf]  ;;  %v2103_v1 = vld [vmem:[%s2739_s6 + $0x124] ss:$8 sps:$4 sm:$0xff]  }
  0x39   : > { %967 = vmatprep.subr.bf16.mxu1 %v1989_v43  ;;  %v333_v11 = vadd.f32 1e-06, %v331_v9  ;;  %2143 = vrsqrt.f32 %v332_v10  ;;  %v2022_v43 = vld [vmem:[%s2738_s5 + $0xec] ss:$16 sps:$4 sm:$0xff]   ;;  %1452 = vmatpush1.bf16.msra.mxu0 %v2055_v2  ;;  %v2064_v8 = vld [vmem:[%s2739_s6 + $0x50] ss:$8 sps:$4 sm:$0xff]  }
  0x3a   : > { %1453 = vmatprep.subr.bf16.mxu0 %v2056_v3  ;;  %v2065_v9 = vld [vmem:[%s2739_s6 + $0x64] ss:$8 sps:$4 sm:$0xff]   ;;  %v2067_v10 = vld [vmem:[%s2739_s6 + $0x60] ss:$8 sps:$4 sm:$0xff]   ;;  %v2106_v3 = vld [vmem:[%s2739_s6 + $0x134] ss:$8 sps:$4 sm:$0xff]  }
  0x3b   : > { %2145 = vrsqrt.f32 %v333_v11  ;;  %v2068_v11 = vld [vmem:[%s2739_s6 + $0x74] ss:$8 sps:$4 sm:$0xff]   ;;  %v2101_v2 = vld [vmem:[%s2739_s6 + $0x120] ss:$8 sps:$4 sm:$0xff]  }
  0x3c   : > { %968 = vmatpush1.bf16.msra.mxu1 %v1991_v46  ;;  %v2023_v46 = vld [vmem:[%s2738_s5 + $0x108] ss:$16 sps:$4 sm:$0xff]  }
  0x3d   : > { %969 = vmatprep.subr.bf16.mxu1 %v1993_v47  ;;  %v2028_v47 = vld [vmem:[%s2738_s5 + $0x12c] ss:$16 sps:$4 sm:$0xff]   ;;  %1454 = vmatpush1.bf16.msra.mxu0 %v2058_v4  ;;  %v2104_v4 = vld [vmem:[%s2739_s6 + $0x130] ss:$8 sps:$4 sm:$0xff]  }
  0x3e   : > { %1455 = vmatprep.subr.bf16.mxu0 %v2059_v5  ;;  %v2109_v5 = vld [vmem:[%s2739_s6 + $0x144] ss:$8 sps:$4 sm:$0xff]  }
  0x40   : > { %970 = vmatpush1.bf16.msra.mxu1 %v1995_v50  ;;  %v2029_v50 = vld [vmem:[%s2738_s5 + $0x148] ss:$16 sps:$4 sm:$0xff]  }
  0x41   : > { %971 = vmatprep.subr.bf16.mxu1 %v1996_v51  ;;  %v2034_v51 = vld [vmem:[%s2738_s5 + $0x16c] ss:$16 sps:$4 sm:$0xff]   ;;  %1456 = vmatpush1.bf16.msra.mxu0 %v2061_v6  ;;  %v2107_v6 = vld [vmem:[%s2739_s6 + $0x140] ss:$8 sps:$4 sm:$0xff]  }
  0x42   : > { %1457 = vmatprep.subr.bf16.mxu0 %v2062_v7  ;;  %v2112_v7 = vld [vmem:[%s2739_s6 + $0x154] ss:$8 sps:$4 sm:$0xff]  }
  0x43   : > { %v2144_v12 = vpop.eup %2143 }
  0x44   : > { %972 = vmatpush1.bf16.msra.mxu1 %v1998_v53  ;;  %v2037_v53 = vld [vmem:[%s2738_s5 + $0x18c] ss:$16 sps:$4 sm:$0xff]  }
  0x45   : > { %982 = vmatprep.subr.bf16.mxu1 %v2001_v54  ;;  %v2146_v13 = vpop.eup %2145  ;;  %v2035_v54 = vld [vmem:[%s2738_s5 + $0x188] ss:$16 sps:$4 sm:$0xff]   ;;  %1458 = vmatpush1.bf16.msra.mxu0 %v2064_v8 }
  0x46   : > { %v338_v14 = vcombine.low %v2144_v12, %v2146_v13  ;;  %1459 = vmatprep.subr.bf16.mxu0 %v2065_v9  ;;  %v2070_v12 = vld [vmem:[%s2739_s6 + $0x70] ss:$8 sps:$4 sm:$0xff]   ;;  %v2071_v13 = vld [vmem:[%s2739_s6 + $0x84] ss:$8 sps:$4 sm:$0xff]  }
  0x47   : > { %v2110_v8 = vld [vmem:[%s2739_s6 + $0x150] ss:$8 sps:$4 sm:$0xff]   ;;  %v2115_v9 = vld [vmem:[%s2739_s6 + $0x164] ss:$8 sps:$4 sm:$0xff]  }
  0x48   : > { %v340_v15 = vmul.f32 %v338_v14, %v311_v55  ;;  %v2040_v55 = vld [vmem:[%s2738_s5 + $0x1ac] ss:$16 sps:$4 sm:$0xff]   ;;  %v2073_v14 = vld [vmem:[%s2739_s6 + $0x80] ss:$8 sps:$4 sm:$0xff]  }
  0x49   : > { %1460 = vmatpush1.bf16.msra.mxu0 %v2067_v10  ;;  %v2113_v10 = vld [vmem:[%s2739_s6 + $0x160] ss:$8 sps:$4 sm:$0xff]  }
  0x4a   : > { %v347_v16 = vcombine.high %v340_v15, %v340_v15  ;;  %1461 = vmatprep.subr.bf16.mxu0 %v2068_v11  ;;  %v2118_v11 = vld [vmem:[%s2739_s6 + $0x174] ss:$8 sps:$4 sm:$0xff]  }
  0x4d   : > { %1462 = vmatpush1.bf16.msra.mxu0 %v2070_v12  ;;  %v2116_v12 = vld [vmem:[%s2739_s6 + $0x170] ss:$8 sps:$4 sm:$0xff]  }
  0x4e   : > { %1463 = vmatprep.subr.bf16.mxu0 %v2071_v13  ;;  %v2121_v13 = vld [vmem:[%s2739_s6 + $0x184] ss:$8 sps:$4 sm:$0xff]  }
  0x51   : > { %1464 = vmatpush1.bf16.msra.mxu0 %v2073_v14  ;;  %v2119_v14 = vld [vmem:[%s2739_s6 + $0x180] ss:$8 sps:$4 sm:$0xff]  }
  0x86   : > { %v344_v17 = vpop.permute.xlu0 %343 }
  0x87   : > { %v349_v18 = vmul.f32 %v344_v17, %v340_v15  ;;  %v350_v19 = vmul.f32 %v347_v16, %v344_v17  ;;  %v2074_v15 = vld [vmem:[%s2739_s6 + $0x94] ss:$8 sps:$4 sm:$0xff]   ;;  %v2076_v16 = vld [vmem:[%s2739_s6 + $0x90] ss:$8 sps:$4 sm:$0xff]   ;;  %v2077_v17 = vld [vmem:[%s2739_s6 + $0xa4] ss:$8 sps:$4 sm:$0xff]  }
  0x88   : > { %1465 = vmatprep.subr.bf16.mxu0 %v2074_v15  ;;  %v2124_v15 = vld [vmem:[%s2739_s6 + $0x194] ss:$8 sps:$4 sm:$0xff]  }
  0x89   : > { %1466 = vmatpush1.bf16.msra.mxu0 %v2076_v16  ;;  %v2122_v16 = vld [vmem:[%s2739_s6 + $0x190] ss:$8 sps:$4 sm:$0xff]  }
  0x8a   : > { %v354_v20 = vpop.permute.xlu0 %353  ;;  %1467 = vmatprep.subr.bf16.mxu0 %v2077_v17  ;;  %v2127_v17 = vld [vmem:[%s2739_s6 + $0x1a4] ss:$8 sps:$4 sm:$0xff]  }
  0x8b   : > { %v2334_v21 = vadd.f32 %v354_v20, %v349_v18  ;;  %v2336_v22 = vadd.f32 %v354_v20, %v350_v19  ;;  %v2079_v18 = vld [vmem:[%s2739_s6 + $0xa0] ss:$8 sps:$4 sm:$0xff]   ;;  %v2080_v19 = vld [vmem:[%s2739_s6 + $0xb4] ss:$8 sps:$4 sm:$0xff]   ;;  %v2082_v20 = vld [vmem:[%s2739_s6 + $0xb0] ss:$8 sps:$4 sm:$0xff]  }
  0x8d   : > { %395 = vrot.lane.b32.xlu0 %v2334_v21, %s2160_s16  ;;  %372 = vrot.lane.b32.xlu1 %v2334_v21, %s2161_s17  ;;  %v550_v23 = vpack.c.bf16 %v2336_v22, %v2336_v22  ;;  %v549_v24 = vpack.c.bf16 %v2334_v21, %v2334_v21  ;;  %v362_v25 = vcombine.low %v2334_v21, %v2336_v22 }
  0x8e   : > { %1468 = vmatpush1.bf16.msra.mxu0 %v2079_v18  ;;  %v2125_v18 = vld [vmem:[%s2739_s6 + $0x1a0] ss:$8 sps:$4 sm:$0xff]  }
  0x8f   : > { %v618_v26 = vrot.slane %v550_v23, 1  ;;  %v2346_v27 = vrot.slane %v549_v24, 1  ;;  %1469 = vmatprep.subr.bf16.mxu0 %v2080_v19  ;;  %v2083_v23 = vld [vmem:[%s2739_s6 + $0xc4] ss:$8 sps:$4 sm:$0xff]   ;;  %v2085_v24 = vld [vmem:[%s2739_s6 + $0xc0] ss:$8 sps:$4 sm:$0xff]  }
  0x90   : > { %v2130_v19 = vld [vmem:[%s2739_s6 + $0x1b4] ss:$8 sps:$4 sm:$0xff]  }
  0x91   : > { %417 = vrot.lane.b32.xlu0 %v2334_v21, %s2162_s20  ;;  %374 = vrot.lane.b32.xlu1 %v2336_v22, %s2161_s17 }
  0x92   : > { %973 = vmatprep.mubr.bf16.mxu1 %v618_v26  ;;  %1470 = vmatpush1.bf16.msra.mxu0 %v2082_v20  ;;  %v2128_v20 = vld [vmem:[%s2739_s6 + $0x1b0] ss:$8 sps:$4 sm:$0xff]  }
  0x93   : > { %974 = vmatmul.mubr.bf16.vlgmr.msra.gmra.mrb[0].mxu1 %v2346_v27  ;;  %1471 = vmatprep.subr.bf16.mxu0 %v2083_v23  ;;  %v2133_v23 = vld [vmem:[%s2739_s6 + $0x1c4] ss:$8 sps:$4 sm:$0xff]  }
  0x94   : > { %983 = vmatpush1.bf16.msra.mxu1 %v1999_v28  ;;  %1014 = vmatprep.mubr.bf16.mxu1 %v618_v26  ;;  %v2086_v26 = vld [vmem:[%s2739_s6 + $0xd4] ss:$8 sps:$4 sm:$0xff]   ;;  %v2089_v28 = vld [vmem:[%s2739_s6 + $0xe4] ss:$8 sps:$4 sm:$0xff]  }
  0x95   : > { %439 = vrot.lane.b32.xlu0 %v2334_v21, %s2163_s28  ;;  %397 = vrot.lane.b32.xlu1 %v2336_v22, %s2160_s16 }
  0x96   : > { %984 = vmatprep.subr.bf16.mxu1 %v2004_v29  ;;  %1472 = vmatpush1.bf16.msra.mxu0 %v2085_v24  ;;  %v2091_v29 = vld [vmem:[%s2739_s6 + $0xe0] ss:$8 sps:$4 sm:$0xff]  }
  0x97   : > { %1473 = vmatprep.subr.bf16.mxu0 %v2086_v26  ;;  %v2131_v24 = vld [vmem:[%s2739_s6 + $0x1c0] ss:$8 sps:$4 sm:$0xff]   ;;  %v2136_v26 = vld [vmem:[%s2739_s6 + $0x1d4] ss:$8 sps:$4 sm:$0xff]  }
  0x98   : > { %985 = vmatpush1.bf16.msra.mxu1 %v2002_v30  ;;  %v2092_v30 = vld [vmem:[%s2739_s6 + $0xf4] ss:$8 sps:$4 sm:$0xff]  }
  0x99   : > { %461 = vrot.lane.b32.xlu0 %v2334_v21, %s2164_s10  ;;  %419 = vrot.lane.b32.xlu1 %v2336_v22, %s2162_s20  ;;  %s2166_s20 = smov 112  }
  0x9a   : > { %986 = vmatprep.subr.bf16.mxu1 %v2007_v31  ;;  %v2094_v31 = vld [vmem:[%s2739_s6 + $0xf0] ss:$8 sps:$4 sm:$0xff]  }
  0x9c   : > { %987 = vmatpush1.bf16.msra.mxu1 %v2005_v32  ;;  %v2097_v32 = vld [vmem:[%s2739_s6 + $0x104] ss:$8 sps:$4 sm:$0xff]  }
  0x9d   : > { %483 = vrot.lane.b32.xlu0 %v2334_v21, %s2165_s15  ;;  %441 = vrot.lane.b32.xlu1 %v2336_v22, %s2163_s28  ;;  %s2167_s28 = smov 111  }
  0x9e   : > { %988 = vmatprep.subr.bf16.mxu1 %v2010_v33 }
  0xa0   : > { %989 = vmatpush1.bf16.msra.mxu1 %v2008_v34 }
  0xa1   : > { %505 = vrot.lane.b32.xlu0 %v2334_v21, %s2166_s20  ;;  %463 = vrot.lane.b32.xlu1 %v2336_v22, %s2164_s10 }
  0xa2   : > { %990 = vmatprep.subr.bf16.mxu1 %v2013_v35 }
  0xa4   : > { %991 = vmatpush1.bf16.msra.mxu1 %v2011_v36 }
  0xa5   : > { %527 = vrot.lane.b32.xlu0 %v2334_v21, %s2167_s28  ;;  %485 = vrot.lane.b32.xlu1 %v2336_v22, %s2165_s15 }
  0xa6   : > { %992 = vmatprep.subr.bf16.mxu1 %v2016_v37  ;;  %v283_v37 = vld [vmem:[%s2734_s1 + $0xc] sm:$0xf] }
  0xa8   : > { %993 = vmatpush1.bf16.msra.mxu1 %v2014_v38  ;;  %v285_v38 = vld [vmem:[%s2734_s1 + $0x14] sm:$0xf] }
  0xa9   : > { %1653 = vperm.xlu0 %1948, %v282_v39   ;;  %507 = vrot.lane.b32.xlu1 %v2336_v22, %s2166_s20  ;;  %v1853_v39 = vld.sshfl [vmem:[%s2736_s3] sm:$0x33 pattern:$0x76325410] }
  0xaa   : > { %994 = vmatprep.subr.bf16.mxu1 %v2019_v40  ;;  %v1854_v40 = vld.sshfl [vmem:[%s2737_s4] sm:$0x33 pattern:$0x76325410] }
  0xac   : > { %995 = vmatpush1.bf16.msra.mxu1 %v2017_v41  ;;  %v1033_v41 = vcombine.high %v1853_v39, %v1853_v39 }
  0xad   : > { %1671 = vperm.xlu0 %1948, %v284_v42   ;;  %529 = vrot.lane.b32.xlu1 %v2336_v22, %s2167_s28  ;;  %v1046_v42 = vcombine.high %v1854_v40, %v1854_v40  ;;  %v1783_v22 = vld [vmem:[%s2735_s2 + $0x8] sm:$0xf]  ;;  %s278_s28 = scalar_lea.vmem %s2740_s7, %s1923_s27 }
  0xae   : > { %996 = vmatprep.subr.bf16.mxu1 %v2022_v43 }
  0xb0   : > { %997 = vmatpush1.bf16.msra.mxu1 %v2020_v44 }
  0xb1   : > { %998 = vmatprep.subr.bf16.mxu1 %v2025_v45  ;;  %1692 = vperm.xlu1 %1949, %v283_v37  }
  0xb4   : > { %999 = vmatpush1.bf16.msra.mxu1 %v2023_v46 }
  0xb5   : > { %1000 = vmatprep.subr.bf16.mxu1 %v2028_v47  ;;  %1699 = vperm.xlu1 %1949, %v285_v38  }
  0xb8   : > { %1001 = vmatpush1.bf16.msra.mxu1 %v2026_v48 }
  0xb9   : > { %1002 = vmatprep.subr.bf16.mxu1 %v2031_v49 }
  0xbc   : > { %1003 = vmatpush1.bf16.msra.mxu1 %v2029_v50 }
  0xbd   : > { %1004 = vmatprep.subr.bf16.mxu1 %v2034_v51 }
  0xc0   : > { %1005 = vmatpush1.bf16.msra.mxu1 %v2032_v52 }
  0xc1   : > { %1006 = vmatprep.subr.bf16.mxu1 %v2037_v53 }
  0xc4   : > { %1007 = vmatpush1.bf16.msra.mxu1 %v2035_v54 }
  0xc5   : > { %1008 = vmatprep.subr.bf16.mxu1 %v2040_v55 }
  0xc8   : > { %1009 = vmatpush1.bf16.msra.mxu1 %v2038_v56 }
  0xc9   : > { %1010 = vmatprep.subr.bf16.mxu1 %v2043_v57 }
  0xcc   : > { %1011 = vmatpush1.bf16.msra.mxu1 %v2041_v58 }
  0xcd   : > { %1012 = vmatprep.subr.bf16.mxu1 %v2046_v59 }
  0xd0   : > { %1013 = vmatpush1.bf16.msra.mxu1 %v2044_v60  ;;  %v2095_v60 = vld [vmem:[%s2739_s6 + $0x100] ss:$8 sps:$4 sm:$0xff]  }
  0xd3   : > { %1015 = vmatmul.mubr.bf16.vlgmr.msra.gmra.mrb[4].mxu1 %v2346_v27  ;;  %v2088_v27 = vld [vmem:[%s2739_s6 + $0xd0] ss:$8 sps:$4 sm:$0xff]  }
  0xd4   : > { %1474 = vmatpush1.bf16.msra.mxu0 %v2088_v27  ;;  %v2134_v27 = vld [vmem:[%s2739_s6 + $0x1d0] ss:$8 sps:$4 sm:$0xff]  }
  0xd5   : > { %1475 = vmatprep.subr.bf16.mxu0 %v2089_v28  ;;  %v2139_v28 = vld [vmem:[%s2739_s6 + $0x1e4] ss:$8 sps:$4 sm:$0xff]  }
  0xd8   : > { %1476 = vmatpush1.bf16.msra.mxu0 %v2091_v29  ;;  %v2137_v29 = vld [vmem:[%s2739_s6 + $0x1e0] ss:$8 sps:$4 sm:$0xff]  }
  0xd9   : > { %1477 = vmatprep.subr.bf16.mxu0 %v2092_v30  ;;  %v2142_v30 = vld [vmem:[%s2739_s6 + $0x1f4] ss:$8 sps:$4 sm:$0xff]  }
  0xdc   : > { %1478 = vmatpush1.bf16.msra.mxu0 %v2094_v31  ;;  %v2140_v31 = vld [vmem:[%s2739_s6 + $0x1f0] ss:$8 sps:$4 sm:$0xff]  }
  0xdd   : > { %1488 = vmatprep.subr.bf16.mxu0 %v2097_v32 }
 0x166   : > { %v975_v33 = vpop.f32.mrb[0].mxu1 }
 0x167   : > { %v977_v34 = vpop.f32.mrb[1].mxu1  ;;  %v1036_v44 = vmul.f32 %v1853_v39, %v975_v33  ;;  %v1055_v45 = vmul.f32 %v1854_v40, %v975_v33  ;;  %v373_v33 = vpop.permute.xlu1 %372 }
 0x168   : > { %v979_v35 = vpop.f32.mrb[2].mxu1  ;;  %v1037_v49 = vmul.f32 %v1033_v41, %v977_v34  ;;  %v1056_v50 = vmul.f32 %v1046_v42, %v977_v34 }
 0x169   : > { %v980_v36 = vpop.f32.mrb[3].mxu1 }
 0x16a   : > { %v396_v36 = vpop.permute.xlu0 %395 }
 0x16b   : > { %v375_v34 = vpop.permute.xlu1 %374 }
 0x16e   : > { %v418_v38 = vpop.permute.xlu0 %417 }
 0x16f   : > { %v398_v35 = vpop.permute.xlu1 %397 }
 0x173   : > { %v420_v37 = vpop.permute.xlu1 %419 }
 0x1a6   : > { %v1016_v43 = vpop.f32.mrb[4].mxu1 }
 0x1a7   : > { %v1049_v46 = vmul.f32 %v1854_v40, %v1016_v43  ;;  %v1057_v47 = vmul.f32 %v1853_v39, %v1016_v43  ;;  %v1018_v48 = vpop.f32.mrb[5].mxu1  ;;  %v442_v39 = vpop.permute.xlu1 %441 }
 0x1a8   : > { %v1050_v51 = vmul.f32 %v1046_v42, %v1018_v48  ;;  %v1058_v52 = vmul.f32 %v1033_v41, %v1018_v48  ;;  %v1020_v53 = vpop.f32.mrb[6].mxu1  ;;  %v440_v40 = vpop.permute.xlu0 %439  ;;  %v366_v41 = vlaneseq }
 0x1a9   : > { %v1051_v54 = vsub.f32 %v1036_v44, %v1049_v46  ;;  %v2574_v55 = vadd.f32 %v1057_v47, %v1055_v45  ;;  %v1021_v56 = vpop.f32.mrb[7].mxu1  ;;  %v2168_v45 = vmov 1983009808  }
 0x1aa   : > { %v1060_v57 = vadd.f32 %v1058_v52, %v1056_v50  ;;  %v1052_v58 = vsub.f32 %v1037_v49, %v1050_v51  ;;  %v377_v42 = vand.u32 127, %v366_v41  ;;  %v364_v46 = vunpack.c.l.s4 %v2168_v45 }
 0x1ab   : > { %v1053_v61 = vpack.c.bf16 %v1051_v54, %v1051_v54  ;;  %v1061_v32 = vpack.c.bf16 %v2574_v55, %v2574_v55  ;;  %v464_v43 = vpop.permute.xlu1 %463  ;;  %v367_v51 = vshrl.u32 %v366_v41, 7 }
 0x1ac   : > { %v1054_v59 = vpack.c.bf16 %v1052_v58, %v1052_v58  ;;  %v1062_v63 = vpack.c.bf16 %v1060_v57, %v1060_v57  ;;  %v462_v44 = vpop.permute.xlu0 %461  ;;  %vm378_vm1 = vcmp.lt.s32.totalorder %v377_v42, 17  ;;  %vm399_vm2 = vcmp.lt.s32.totalorder %v377_v42, 16 }
 0x1ad   : > { %v379_v48 = vsel %vm378_vm1, %v373_v33, %v375_v34  ;;  %v380_v49 = vsel %vm378_vm1, %v375_v34, %v373_v33  ;;  %v365_v50 = vunpack.c.0.s8 %v364_v46  ;;  %vm421_vm3 = vcmp.lt.s32.totalorder %v377_v42, 15 }
 0x1ae   : > { %1479 = vmatprep.mubr.bf16.mxu0 %v1054_v59  ;;  %v400_v53 = vsel %vm399_vm2, %v396_v36, %v398_v35  ;;  %v401_v54 = vsel %vm399_vm2, %v398_v35, %v396_v36  ;;  %v384_v55 = vcombine.low %v380_v49, %v379_v48  ;;  %vm443_vm4 = vcmp.lt.s32.totalorder %v377_v42, 1  ;;  %v1786_v36 = vld [vmem:[%s2735_s2 + $0x18] sm:$0xf] }
 0x1af   : > { %1480 = vmatmul.mubr.bf16.vlgmr.msra.gmra.mrb[0].mxu0 %v1053_v61  ;;  %v486_v47 = vpop.permute.xlu1 %485  ;;  %v422_v56 = vsel %vm421_vm3, %v418_v38, %v420_v37  ;;  %v423_v57 = vsel %vm421_vm3, %v420_v37, %v418_v38  ;;  %v2671_v58 = vsub.s32 %v365_v50, %v367_v51  ;;  %v406_v59 = vcombine.low %v401_v54, %v400_v53 }
 0x1b0   : > { %1489 = vmatpush1.bf16.msra.mxu0 %v2095_v60  ;;  %1520 = vmatprep.mubr.bf16.mxu0 %v1062_v63  ;;  %v484_v52 = vpop.permute.xlu0 %483  ;;  %vm465_vm5 = vcmp.lt.s32.totalorder %v377_v42, 127  ;;  %v444_v61 = vsel %vm443_vm4, %v440_v40, %v442_v39  ;;  %vm487_vm6 = vcmp.lt.s32.totalorder %v377_v42, 113  ;;  %vm509_vm7 = vcmp.lt.s32.totalorder %v377_v42, 112 }
 0x1b1   : > { %1490 = vmatprep.subr.bf16.mxu0 %v2100_v62  ;;  %v445_v62 = vsel %vm443_vm4, %v442_v39, %v440_v40  ;;  %v391_v63 = vrot.slane %v384_v55, %v2671_v58  ;;  %vm531_vm8 = vcmp.lt.s32.totalorder %v377_v42, 111  ;;  %v1787_v40 = vld [vmem:[%s2735_s2 + $0x1c] sm:$0xf] }
 0x1b3   : > { %v508_v60 = vpop.permute.xlu1 %507 }
 0x1b4   : > { %1491 = vmatpush1.bf16.msra.mxu0 %v2098_v0  ;;  %v428_v0 = vcombine.low %v423_v57, %v422_v56 }
 0x1b5   : > { %1492 = vmatprep.subr.bf16.mxu0 %v2103_v1  ;;  %v506_v1 = vpop.permute.xlu0 %505 }
 0x1b7   : > { %v530_v21 = vpop.permute.xlu1 %529 }
 0x1b8   : > { %1493 = vmatpush1.bf16.msra.mxu0 %v2101_v2  ;;  %v381_v2 = vld [vmem:[%s2735_s2] sm:$0xf] }
 0x1b9   : > { %1494 = vmatprep.subr.bf16.mxu0 %v2106_v3  ;;  %v466_v3 = vsel %vm465_vm5, %v462_v44, %v464_v43 }
 0x1bc   : > { %1495 = vmatpush1.bf16.msra.mxu0 %v2104_v4  ;;  %v467_v4 = vsel %vm465_vm5, %v464_v43, %v462_v44  ;;  %v1788_v44 = vld [vmem:[%s2735_s2 + $0x20] sm:$0xf] }
 0x1bd   : > { %1496 = vmatprep.subr.bf16.mxu0 %v2109_v5  ;;  %v369_v5 = vrot.slane %v362_v25, %v2671_v58  ;;  %v510_v25 = vsel %vm509_vm7, %v506_v1, %v508_v60 }
 0x1c0   : > { %1497 = vmatpush1.bf16.msra.mxu0 %v2107_v6  ;;  %v413_v6 = vrot.slane %v406_v59, %v2671_v58 }
 0x1c1   : > { %1498 = vmatprep.subr.bf16.mxu0 %v2112_v7  ;;  %v450_v7 = vcombine.low %v445_v62, %v444_v61 }
 0x1c4   : > { %1499 = vmatpush1.bf16.msra.mxu0 %v2110_v8  ;;  %v1781_v8 = vld [vmem:[%s2735_s2 + $0x10] sm:$0xf] }
 0x1c5   : > { %1500 = vmatprep.subr.bf16.mxu0 %v2115_v9  ;;  %v1782_v9 = vld [vmem:[%s2735_s2 + $0x4] sm:$0xf] }
 0x1c8   : > { %1501 = vmatpush1.bf16.msra.mxu0 %v2113_v10  ;;  %v488_v10 = vsel %vm487_vm6, %v484_v52, %v486_v47 }
 0x1c9   : > { %1502 = vmatprep.subr.bf16.mxu0 %v2118_v11  ;;  %v489_v11 = vsel %vm487_vm6, %v486_v47, %v484_v52 }
 0x1cc   : > { %1503 = vmatpush1.bf16.msra.mxu0 %v2116_v12  ;;  %v393_v12 = vmul.f32 %v391_v63, %v381_v2 }
 0x1cd   : > { %1504 = vmatprep.subr.bf16.mxu0 %v2121_v13  ;;  %v435_v13 = vrot.slane %v428_v0, %v2671_v58 }
 0x1d0   : > { %1505 = vmatpush1.bf16.msra.mxu0 %v2119_v14  ;;  %v472_v14 = vcombine.low %v466_v3, %v467_v4 }
 0x1d1   : > { %1506 = vmatprep.subr.bf16.mxu0 %v2124_v15  ;;  %v511_v15 = vsel %vm509_vm7, %v508_v60, %v506_v1 }
 0x1d4   : > { %1507 = vmatpush1.bf16.msra.mxu0 %v2122_v16  ;;  %v371_v16 = vmul.f32 %v1781_v8, %v369_v5 }
 0x1d5   : > { %1508 = vmatprep.subr.bf16.mxu0 %v2127_v17  ;;  %v415_v17 = vmul.f32 %v1782_v9, %v413_v6 }
 0x1d8   : > { %1509 = vmatpush1.bf16.msra.mxu0 %v2125_v18  ;;  %v457_v18 = vrot.slane %v450_v7, %v2671_v58 }
 0x1d9   : > { %1510 = vmatprep.subr.bf16.mxu0 %v2130_v19  ;;  %v528_v19 = vpop.permute.xlu0 %527 }
 0x1dc   : > { %1511 = vmatpush1.bf16.msra.mxu0 %v2128_v20  ;;  %v494_v20 = vcombine.low %v488_v10, %v489_v11 }
 0x1dd   : > { %1512 = vmatprep.subr.bf16.mxu0 %v2133_v23  ;;  %v1784_v23 = vld [vmem:[%s2735_s2 + $0xc] sm:$0xf] }
 0x1de   : > { %v459_v33 = vmul.f32 %v1784_v23, %v457_v18  ;;  %v501_v34 = vrot.slane %v494_v20, %v2671_v58 }
 0x1e0   : > { %1513 = vmatpush1.bf16.msra.mxu0 %v2131_v24  ;;  %v532_v24 = vsel %vm531_vm8, %v528_v19, %v530_v21  ;;  %v503_v42 = vmul.f32 %v1786_v36, %v501_v34 }
 0x1e1   : > { %1514 = vmatprep.subr.bf16.mxu0 %v2136_v26  ;;  %v533_v26 = vsel %vm531_vm8, %v530_v21, %v528_v19 }
 0x1e2   : > { %v538_v35 = vcombine.low %v532_v24, %v533_v26 }
 0x1e4   : > { %1515 = vmatpush1.bf16.msra.mxu0 %v2134_v27  ;;  %v394_v27 = vadd.f32 %v393_v12, %v371_v16  ;;  %v545_v43 = vrot.slane %v538_v35, %v2671_v58 }
 0x1e5   : > { %1516 = vmatprep.subr.bf16.mxu0 %v2139_v28  ;;  %v437_v28 = vmul.f32 %v1783_v22, %v435_v13 }
 0x1e6   : > { %v547_v48 = vmul.f32 %v1788_v44, %v545_v43 }
 0x1e8   : > { %1517 = vmatpush1.bf16.msra.mxu0 %v2137_v29  ;;  %v479_v29 = vrot.slane %v472_v14, %v2671_v58 }
 0x1e9   : > { %1518 = vmatprep.subr.bf16.mxu0 %v2142_v30  ;;  %v516_v30 = vcombine.low %v510_v25, %v511_v15 }
 0x1eb   : > { %v523_v39 = vrot.slane %v516_v30, %v2671_v58 }
 0x1ec   : > { %1519 = vmatpush1.bf16.msra.mxu0 %v2140_v31  ;;  %v1785_v31 = vld [vmem:[%s2735_s2 + $0x14] sm:$0xf] }
 0x1ed   : > { %v481_v38 = vmul.f32 %v1785_v31, %v479_v29  ;;  %v525_v46 = vmul.f32 %v1787_v40, %v523_v39 }
 0x1ef   : > { %1521 = vmatmul.mubr.bf16.vlgmr.msra.gmra.mrb[0].mxu0 %v1061_v32  ;;  %v416_v32 = vadd.f32 %v415_v17, %v394_v27 }
 0x1f1   : > { %v438_v37 = vadd.f32 %v437_v28, %v416_v32 }
 0x1f3   : > { %v460_v41 = vadd.f32 %v459_v33, %v438_v37 }
 0x1f5   : > { %v482_v45 = vadd.f32 %v481_v38, %v460_v41 }
 0x1f7   : > { %v504_v47 = vadd.f32 %v503_v42, %v482_v45 }
 0x1f9   : > { %v526_v49 = vadd.f32 %v525_v46, %v504_v47 }
 0x1fb   : > { %v548_v50 = vadd.f32 %v547_v48, %v526_v49 }
 0x1fd   : > { %v1538_v51 = vrot.slane %v548_v50, %v2671_v58 }
 0x1ff   : > { %v1539_v52 = vcombine.high %v1538_v51, %v1538_v51  ;;  %v1543_v53 = vsel %vm1542_vm9, %v1538_v51, 0.0 }
 0x200   : > { %v1544_v55 = vrot.slane %v1543_v53, 4 }
 0x201   : > { %v1550_v54 = vsel %vm1542_vm9, %v1539_v52, 0.0 }
 0x202   : > { %v1551_v56 = vrot.slane %v1550_v54, 4  ;;  %v1545_v57 = vadd.f32 %v1544_v55, %v1543_v53 }
 0x204   : > { %v1552_v59 = vadd.f32 %v1551_v56, %v1550_v54  ;;  %v1546_v63 = vrot.slane %v1545_v57, 2 }
 0x206   : > { %v1553_v3 = vrot.slane %v1552_v59, 2  ;;  %v1547_v8 = vadd.f32 %v1546_v63, %v1545_v57 }
 0x208   : > { %v1554_v10 = vadd.f32 %v1553_v3, %v1552_v59  ;;  %v1548_v14 = vrot.slane %v1547_v8, 1 }
 0x20a   : > { %v1555_v22 = vrot.slane %v1554_v10, 1  ;;  %v1549_v17 = vadd.f32 %v1548_v14, %v1547_v8 }
 0x20c   : > { %v1556_v19 = vadd.f32 %v1555_v22, %v1554_v10 }
 0x2c2   : > { %v1522_v60 = vpop.f32.mrb[0].mxu0 }
 0x2c3   : > { %v1529_v61 = vmul.f32 0.00390625, %v1522_v60  ;;  %v1524_v62 = vpop.f32.mrb[1].mxu0 }
 0x2c4   : > { %v1530_v0 = vmul.f32 0.00390625, %v1524_v62  ;;  %v1526_v1 = vpop.f32.mrb[2].mxu0 }
 0x2c5   : > { %v1557_v2 = vsel %vm1542_vm9, %v1529_v61, 0.0  ;;  %v1527_v4 = vpop.f32.mrb[3].mxu0 }
 0x2c6   : > { %v1558_v5 = vrot.slane %v1557_v2, 4  ;;  %v1564_v6 = vsel %vm1542_vm9, %v1530_v0, 0.0 }
 0x2c7   : > { %v1565_v7 = vrot.slane %v1564_v6, 4 }
 0x2c8   : > { %v1559_v9 = vadd.f32 %v1558_v5, %v1557_v2 }
 0x2c9   : > { %v1566_v11 = vadd.f32 %v1565_v7, %v1564_v6 }
 0x2ca   : > { %v1560_v12 = vrot.slane %v1559_v9, 2 }
 0x2cb   : > { %v1567_v13 = vrot.slane %v1566_v11, 2 }
 0x2cc   : > { %v1561_v21 = vadd.f32 %v1560_v12, %v1559_v9  ;;  %v1693_v9 = vpop.permute.xlu1 %1692 }
 0x2cd   : > { %v1568_v25 = vadd.f32 %v1567_v13, %v1566_v11 }
 0x2ce   : > { %v1562_v15 = vrot.slane %v1561_v21, 1 }
 0x2cf   : > { %v1569_v16 = vrot.slane %v1568_v25, 1 }
 0x2d0   : > { %v1563_v18 = vadd.f32 %v1562_v15, %v1561_v21  ;;  %v1700_v22 = vpop.permute.xlu1 %1699 }
 0x2d1   : > { %v1570_v20 = vadd.f32 %v1569_v16, %v1568_v25 }
 0x2d2   : > { %v1571_v23 = vadd.f32 %v1563_v18, %v1549_v17 }
 0x2d3   : > { %v1572_v24 = vadd.f32 %v1570_v20, %v1556_v19  ;;  %v1654_v19 = vpop.permute.xlu0 %1653 }
 0x2d4   : > { %v1573_v26 = vmul.f32 0.25, %v1571_v23 }
 0x2d5   : > { %v1574_v27 = vmul.f32 0.25, %v1572_v24 }
 0x2d6   : > { %v1587_v28 = vsub.f32 %v1529_v61, %v1573_v26 }
 0x2d7   : > { %v1577_v29 = vcombine.low %v1573_v26, %v1574_v27  ;;  %v1588_v30 = vsub.f32 %v1530_v0, %v1574_v27 }
 0x2d8   : > { %v1615_v31 = vmul.f32 %v1587_v28, %v1587_v28 }
 0x2d9   : > { %v1584_v32 = vrot.slane %v1577_v29, %v2671_v58  ;;  %v1616_v33 = vmul.f32 %v1588_v30, %v1588_v30 }
 0x2da   : > { %v1617_v34 = vsel %vm1542_vm9, %v1615_v31, 0.0 }
 0x2db   : > { %v1618_v35 = vrot.slane %v1617_v34, 4  ;;  %v1586_v36 = vsub.f32 %v548_v50, %v1584_v32  ;;  %v1624_v37 = vsel %vm1542_vm9, %v1616_v33, 0.0 }
 0x2dc   : > { %v1625_v38 = vrot.slane %v1624_v37, 4 }
 0x2dd   : > { %v1619_v39 = vadd.f32 %v1618_v35, %v1617_v34  ;;  %v1589_v40 = vmul.f32 %v1586_v36, %v1586_v36 }
 0x2de   : > { %v1626_v41 = vadd.f32 %v1625_v38, %v1624_v37 }
 0x2df   : > { %v1597_v42 = vrot.slane %v1589_v40, %v2671_v58  ;;  %v1620_v43 = vrot.slane %v1619_v39, 2 }
 0x2e0   : > { %v1627_v47 = vrot.slane %v1626_v41, 2 }
 0x2e1   : > { %v1598_v44 = vcombine.high %v1597_v42, %v1597_v42  ;;  %v1601_v45 = vsel %vm1542_vm9, %v1597_v42, 0.0  ;;  %v1621_v49 = vadd.f32 %v1620_v43, %v1619_v39 }
 0x2e2   : > { %v1602_v46 = vrot.slane %v1601_v45, 4  ;;  %v1628_v54 = vadd.f32 %v1627_v47, %v1626_v41 }
 0x2e3   : > { %v1608_v48 = vsel %vm1542_vm9, %v1598_v44, 0.0  ;;  %v1622_v55 = vrot.slane %v1621_v49, 1 }
 0x2e4   : > { %v1603_v51 = vadd.f32 %v1602_v46, %v1601_v45  ;;  %v1609_v52 = vrot.slane %v1608_v48, 4  ;;  %v1629_v61 = vrot.slane %v1628_v54, 1 }
 0x2e5   : > { %v1623_v62 = vadd.f32 %v1622_v55, %v1621_v49 }
 0x2e6   : > { %v1604_v50 = vrot.slane %v1603_v51, 2  ;;  %v1610_v53 = vadd.f32 %v1609_v52, %v1608_v48  ;;  %v1630_v2 = vadd.f32 %v1629_v61, %v1628_v54 }
 0x2e8   : > { %v1605_v56 = vadd.f32 %v1604_v50, %v1603_v51  ;;  %v1611_v57 = vrot.slane %v1610_v53, 2 }
 0x2ea   : > { %v1606_v59 = vrot.slane %v1605_v56, 1  ;;  %v1612_v60 = vadd.f32 %v1611_v57, %v1610_v53 }
 0x2ec   : > { %v1607_v63 = vadd.f32 %v1606_v59, %v1605_v56  ;;  %v1613_v0 = vrot.slane %v1612_v60, 1 }
 0x2ee   : > { %v1614_v1 = vadd.f32 %v1613_v0, %v1612_v60  ;;  %v1631_v3 = vadd.f32 %v1623_v62, %v1607_v63 }
 0x2f0   : > { %v1632_v4 = vadd.f32 %v1630_v2, %v1614_v1  ;;  %v1633_v5 = vmul.f32 0.25, %v1631_v3 }
 0x2f2   : > { %v1634_v6 = vmul.f32 0.25, %v1632_v4  ;;  %v1635_v7 = vadd.f32 1e-06, %v1633_v5 }
 0x2f4   : > { %v1636_v8 = vadd.f32 1e-06, %v1634_v6  ;;  %2147 = vrsqrt.f32 %v1635_v7 }
 0x2f6   : > { %2149 = vrsqrt.f32 %v1636_v8 }
 0x2fe   : > { %v2148_v10 = vpop.eup %2147 }
 0x2ff   : > { %v1688_v11 = vmul.f32 %v2148_v10, %v1587_v28  ;;  %v1672_v28 = vpop.permute.xlu0 %1671 }
 0x300   : > { %v2150_v12 = vpop.eup %2149 }
 0x301   : > { %v1641_v13 = vcombine.low %v2148_v10, %v2150_v12  ;;  %v1689_v14 = vmul.f32 %v2150_v12, %v1588_v30  ;;  %v1695_v21 = vmul.f32 %v1693_v9, %v1688_v11 }
 0x303   : > { %v1648_v25 = vrot.slane %v1641_v13, %v2671_v58  ;;  %v1696_v15 = vmul.f32 %v1693_v9, %v1689_v14  ;;  %v1702_v17 = vadd.f32 %v1700_v22, %v1695_v21 }
 0x305   : > { %v1650_v16 = vmul.f32 %v1648_v25, %v1586_v36  ;;  %v1703_v18 = vadd.f32 %v1700_v22, %v1696_v15 }
 0x307   : > { %v1663_v20 = vrot.slane %v1650_v16, %v2671_v58  ;;  %v1706_v23 = vcombine.low %v1702_v17, %v1703_v18 }
 0x309   : > { %v1664_v24 = vcombine.high %v1663_v20, %v1663_v20  ;;  %v1667_v26 = vmul.f32 %v1663_v20, %v1654_v19  ;;  %1925 = vst.sshfl [vmem:[%s278_s28 + $0x4] sm:$0x33 pattern:$0x76325410] %v1706_v23 }
 0x30b   : > { %v1668_v27 = vmul.f32 %v1664_v24, %v1654_v19  ;;  %v1674_v29 = vadd.f32 %v1672_v28, %v1667_v26 }
 0x30d   : > { %v1675_v30 = vadd.f32 %v1672_v28, %v1668_v27 }
 0x30f   : > { %v1678_v31 = vcombine.low %v1674_v29, %v1675_v30 }
 0x311   : > { %1919 = vst.sshfl [vmem:[%s278_s28] sm:$0x33 pattern:$0x76325410] %v1678_v31 }
 0x312 PF: > { %s17_s24 = sadd.s32 1, %s2157_s24  }
 0x313   : > { %p14_p4 = scmp.ge.s32.totalorder %s17_s24, 4  }
 0x315   :  { %16 = sbr.rel (!%p14_p4) target bundleno = 1 (0x1), region = 87 }

// kernel: squeeze.3
= control target key start
LH: loop header
LB: loop body
LE: loop exit
PB: predicated region body
PF: predicated region fallthrough
CT: control target
= control target key end

     0   :  { %s10_s10 = smov 3  ;;  %vm12_vm0 = vcmask 23552   ;;  %s22_s11 = smov 3  ;;  %vm19_vm1 = vcmask 72752   ;;  %vm26_vm2 = vcmask 48152   ;;  %s58_s0 = inlined_call_operand.vmem [shape: f32[2,3,3], index: 0, kind: input, shape index: {}]   ;;  %s59_s1 = inlined_call_operand.vmem [shape: f32[2,9], index: 1, kind: output, shape index: {}]  }
   0x1   :  { %v34_v0 = vld [vmem:[%s58_s0 + $0x4] sm:$0xf]  ;;  %v8_v1 = vld [vmem:[%s58_s0] sm:$0xf]  ;;  %s15_s0 = smov 3  ;;  %s37_s12 = smov 6  }
   0x2   :  { %7 = vst [vmem:[#allocation1 + $0x8] sm:$0xf] %v34_v0  ;;  %9 = vst [vmem:[#allocation1] sm:$0xf] %v8_v1  ;;  %s38_s13 = smov 3  }
   0x9   :  { %v16_v2 = vld [vmem:[#allocation1 + $0x2] ss:$8 sm:%s15_s0]   ;;  %v11_v3 = vld [vmem:[#allocation1] ss:$8 sm:%s10_s10]   ;;  %v23_v4 = vld [vmem:[#allocation1 + $0x1] ss:$8 sm:%s22_s11]  }
   0xa   :  { %17 = vrot.lane.b32.xlu0 %v16_v2, %s37_s12  ;;  %13 = vst.msk [vmem:[#allocation0] sm:$0x3] %vm12_vm0, %v11_v3  }
   0xe   :  { %24 = vrot.lane.b32.xlu0 %v23_v4, %s38_s13 }
  0x7c   :  { %v18_v5 = vpop.permute.xlu0 %17  }
  0x7d   :  { %20 = vst.msk [vmem:[#allocation0] sm:$0x3] %vm19_vm1, %v18_v5  }
  0x80   :  { %v25_v6 = vpop.permute.xlu0 %24  }
  0x81   :  { %27 = vst.msk [vmem:[#allocation0] sm:$0x3] %vm26_vm2, %v25_v6  }
  0x88   :  { %v31_v7 = vld [vmem:[#allocation0] sm:$0x3] }
  0x89   :  { %33 = vst [vmem:[%s59_s1] sm:$0x3] %v31_v7 }

// kernel: squeeze.5
= control target key start
LH: loop header
LB: loop body
LE: loop exit
PB: predicated region body
PF: predicated region fallthrough
CT: control target
= control target key end

     0   :  { %s7_s6 = smov 3  ;;  %s10_s7 = smov 3  ;;  %vm12_vm0 = vcmask 15360   ;;  %vm4_vm1 = vcmask 72704   ;;  %vm16_vm2 = vcmask 56320   ;;  %vm19_vm3 = vcmask 1048560   ;;  %s245_s0 = inlined_call_operand.vmem [shape: f32[2,16,9,1], index: 0, kind: input, shape index: {}]   ;;  %s246_s1 = inlined_call_operand.vmem [shape: f32[2,144], index: 1, kind: output, shape index: {}]  }
   0x1   :  { %v131_v0 = vld [vmem:[%s245_s0 + $0xe] ss:$16 sm:%s7_s6]   ;;  %s29_s12 = smov 3  ;;  %s22_s15 = smov 3  ;;  %vm26_vm4 = vcmask 1032104   ;;  %vm33_vm5 = vcmask 958304  }
   0x2   :  { %v132_v1 = vld [vmem:[%s245_s0 + $0xe] ss:$16 sm:%s10_s7]   ;;  %v134_v3 = vld [vmem:[%s245_s0 + $0xc] ss:$16 sm:%s29_s12]   ;;  %s163_s16 = smov 126   ;;  %s164_s17 = smov 108  }
   0x3   :  { %v13_v2 = vsel %vm12_vm0, %v132_v1, %v131_v0  ;;  %31 = vrot.lane.b32.xlu1 %v134_v3, %s164_s17  ;;  %s36_s18 = smov 3  ;;  %v133_v4 = vld [vmem:[%s245_s0 + $0xd] ss:$16 sm:%s22_s15]   ;;  %s43_s23 = smov 3  ;;  %vm40_vm6 = vcmask 884504   ;;  %vm47_vm7 = vcmask 810704  }
   0x4   :  { %14 = vrot.lane.b32.xlu0 %v13_v2, %s163_s16  ;;  %v135_v5 = vld [vmem:[%s245_s0 + $0xb] ss:$16 sm:%s36_s18]   ;;  %s50_s24 = smov 3  ;;  %s165_s25 = smov 117   ;;  %vm54_vm8 = vcmask 736904   ;;  %vm61_vm9 = vcmask 663104  }
   0x5   :  { %s166_s26 = smov 99   ;;  %v136_v6 = vld [vmem:[%s245_s0 + $0xa] ss:$16 sm:%s43_s23]   ;;  %v137_v7 = vld [vmem:[%s245_s0 + $0x9] ss:$16 sm:%s50_s24]   ;;  %s57_s2 = smov 3 }
   0x6   :  { %s64_s3 = smov 3  ;;  %s167_s4 = smov 90   ;;  %v138_v8 = vld [vmem:[%s245_s0 + $0x8] ss:$16 sm:%s57_s2]   ;;  %vm68_vm10 = vcmask 589304   ;;  %vm75_vm11 = vcmask 515504  }
   0x7   :  { %38 = vrot.lane.b32.xlu1 %v135_v5, %s166_s26  ;;  %s168_s5 = smov 81   ;;  %v139_v9 = vld [vmem:[%s245_s0 + $0x7] ss:$16 sm:%s64_s3]   ;;  %s71_s10 = smov 3  ;;  %vm82_vm12 = vcmask 441704   ;;  %vm89_vm13 = vcmask 367904  }
   0x8   :  { %24 = vrot.lane.b32.xlu0 %v133_v4, %s165_s25  ;;  %s78_s11 = smov 3  ;;  %s169_s12 = smov 72   ;;  %v140_v10 = vld [vmem:[%s245_s0 + $0x6] ss:$16 sm:%s71_s10]   ;;  %vm96_vm14 = vcmask 294104   ;;  %vm103_vm15 = vcmask 220304  }
   0x9   :  { %s170_s13 = smov 63   ;;  %s2_s16 = smov 3  ;;  %v141_v11 = vld [vmem:[%s245_s0 + $0x5] ss:$16 sm:%s78_s11]   ;;  %vm110_vm0 = vcmask 146504  }
   0xa   :  { %v3_v12 = vld [vmem:[%s245_s0] ss:$16 sm:%s2_s16]   ;;  %s85_s21 = smov 3  ;;  %s92_s22 = smov 3 }
   0xb   :  { %52 = vrot.lane.b32.xlu1 %v137_v7, %s168_s5  ;;  %5 = vst.msk [vmem:[#allocation0] sm:$0x3] %vm4_vm1, %v3_v12   ;;  %s171_s23 = smov 54   ;;  %s172_s24 = smov 45   ;;  %v142_v13 = vld [vmem:[%s245_s0 + $0x4] ss:$16 sm:%s85_s21]  }
   0xc   :  { %45 = vrot.lane.b32.xlu0 %v136_v6, %s167_s4  ;;  %v143_v14 = vld [vmem:[%s245_s0 + $0x3] ss:$16 sm:%s92_s22]   ;;  %s99_s29 = smov 3  ;;  %s106_s30 = smov 3  ;;  %vm117_vm1 = vcmask 130104  }
   0xd   :  { %s173_s2 = smov 36   ;;  %s174_s3 = smov 27   ;;  %v144_v15 = vld [vmem:[%s245_s0 + $0x2] ss:$16 sm:%s99_s29]   ;;  %v145_v16 = vld [vmem:[%s245_s0 + $0x1] ss:$16 sm:%s106_s30]  }
   0xe   :  { %s113_s8 = smov 3  ;;  %s175_s9 = smov 18  }
   0xf   :  { %66 = vrot.lane.b32.xlu1 %v139_v9, %s170_s13  ;;  %s176_s10 = smov 9   ;;  %v146_v17 = vld [vmem:[%s245_s0 + $0xf] ss:$16 sm:%s113_s8]   ;;  %s177_s0 = smov 7  }
  0x10   :  { %59 = vrot.lane.b32.xlu0 %v138_v8, %s169_s12 }
  0x13   :  { %80 = vrot.lane.b32.xlu1 %v141_v11, %s172_s24 }
  0x14   :  { %73 = vrot.lane.b32.xlu0 %v140_v10, %s171_s23 }
  0x17   :  { %94 = vrot.lane.b32.xlu1 %v143_v14, %s174_s3 }
  0x18   :  { %87 = vrot.lane.b32.xlu0 %v142_v13, %s173_s2 }
  0x1b   :  { %108 = vrot.lane.b32.xlu1 %v145_v16, %s176_s10 }
  0x1c   :  { %101 = vrot.lane.b32.xlu0 %v144_v15, %s175_s9 }
  0x20   :  { %115 = vrot.lane.b32.xlu0 %v146_v17, %s177_s0 }
  0x75   :  { %v32_v19 = vpop.permute.xlu1 %31  }
  0x76   :  { %v15_v18 = vpop.permute.xlu0 %14  }
  0x77   :  { %18 = vst.msk [vmem:[#allocation0 + $0x8] sm:$0x3] %vm16_vm2, %v15_v18  }
  0x78   :  { %20 = vst.msk [vmem:[#allocation0] sm:$0x3] %vm19_vm3, %v15_v18  }
  0x79   :  { %v39_v21 = vpop.permute.xlu1 %38  }
  0x7a   :  { %v25_v20 = vpop.permute.xlu0 %24  }
  0x7b   :  { %27 = vst.msk [vmem:[#allocation0] sm:$0x3] %vm26_vm4, %v25_v20  }
  0x7c   :  { %34 = vst.msk [vmem:[#allocation0] sm:$0x3] %vm33_vm5, %v32_v19  }
  0x7d   :  { %41 = vst.msk [vmem:[#allocation0] sm:$0x3] %vm40_vm6, %v39_v21   ;;  %v53_v23 = vpop.permute.xlu1 %52  }
  0x7e   :  { %v46_v22 = vpop.permute.xlu0 %45  }
  0x7f   :  { %48 = vst.msk [vmem:[#allocation0] sm:$0x3] %vm47_vm7, %v46_v22  }
  0x80   :  { %55 = vst.msk [vmem:[#allocation0] sm:$0x3] %vm54_vm8, %v53_v23  }
  0x81   :  { %v67_v25 = vpop.permute.xlu1 %66  }
  0x82   :  { %v60_v24 = vpop.permute.xlu0 %59  }
  0x83   :  { %62 = vst.msk [vmem:[#allocation0] sm:$0x3] %vm61_vm9, %v60_v24  }
  0x84   :  { %69 = vst.msk [vmem:[#allocation0] sm:$0x3] %vm68_vm10, %v67_v25  }
  0x85   :  { %v81_v27 = vpop.permute.xlu1 %80  }
  0x86   :  { %v74_v26 = vpop.permute.xlu0 %73  }
  0x87   :  { %76 = vst.msk [vmem:[#allocation0] sm:$0x3] %vm75_vm11, %v74_v26  }
  0x88   :  { %83 = vst.msk [vmem:[#allocation0] sm:$0x3] %vm82_vm12, %v81_v27  }
  0x89   :  { %v95_v29 = vpop.permute.xlu1 %94  }
  0x8a   :  { %v88_v28 = vpop.permute.xlu0 %87  }
  0x8b   :  { %90 = vst.msk [vmem:[#allocation0] sm:$0x3] %vm89_vm13, %v88_v28  }
  0x8c   :  { %97 = vst.msk [vmem:[#allocation0] sm:$0x3] %vm96_vm14, %v95_v29  }
  0x8d   :  { %v109_v31 = vpop.permute.xlu1 %108  }
  0x8e   :  { %v102_v30 = vpop.permute.xlu0 %101  }
  0x8f   :  { %104 = vst.msk [vmem:[#allocation0] sm:$0x3] %vm103_vm15, %v102_v30  }
  0x90   :  { %111 = vst.msk [vmem:[#allocation0] sm:$0x3] %vm110_vm0, %v109_v31  }
  0x92   :  { %v116_v32 = vpop.permute.xlu0 %115  }
  0x93   :  { %119 = vst.msk [vmem:[#allocation0 + $0x8] sm:$0x3] %vm117_vm1, %v116_v32  }
  0x97   :  { %v123_v33 = vld [vmem:[#allocation0] sm:$0x3] }
  0x98   :  { %125 = vst [vmem:[%s246_s1] sm:$0x3] %v123_v33 }
  0x9a   :  { %v127_v34 = vld [vmem:[#allocation0 + $0x8] sm:$0x3] }
  0x9b   :  { %147 = vst [vmem:[%s246_s1 + $0x2] sm:$0x3] %v127_v34 }

// kernel: global_local_filter.1
= control target key start
LH: loop header
LB: loop body
LE: loop exit
PB: predicated region body
PF: predicated region fallthrough
CT: control target
= control target key end

     0   :  { %s2209_s24 = smov 0   ;;  %s2733_s0 = inlined_call_operand.vmem [shape: f32[2,4,256], index: 0, kind: input, shape index: {}]   ;;  %s2734_s1 = inlined_call_operand.vmem [shape: f32[6,4,1], index: 1, kind: input, shape index: {}]   ;;  %s2735_s2 = inlined_call_operand.vmem [shape: f32[9,2,256], index: 2, kind: input, shape index: {}]   ;;  %s2736_s3 = inlined_call_operand.vmem [shape: f32[2,256], index: 3, kind: input, shape index: {}]   ;;  %s2737_s4 = inlined_call_operand.vmem [shape: f32[2,256], index: 4, kind: input, shape index: {}]   ;;  %s2738_s5 = inlined_call_operand.vmem [shape: bf16[256,512], index: 5, kind: input, shape index: {}]   ;;  %s2739_s6 = inlined_call_operand.vmem [shape: bf16[512,256], index: 6, kind: input, shape index: {}]   ;;  %s2740_s7 = inlined_call_operand.vmem [shape: f32[2,2,2,256], index: 7, kind: output, shape index: {}]  }
   0x1 LB: > { %s1772_s25 = sadd.s32 4294967295, %s2157_s24   ;;  %p1776_p0 = scmp.ge.s32.totalorder %s2157_s24, 1  ;;  %s2157_s24 = sphi %s2209_s24, %s17_s24  }
   0x2   : > { %p237_p1 = scmp.lt.s32.totalorder %s2157_s24, 3 }
   0x4   : > { %p238_p2 = pnand %p1776_p0, %p237_p1 }
   0x5   : > { %v280_v0 = vld [vmem:[%s2734_s1] sm:$0xf] (!%p238_p2)  ;;  %v2159_v1 = vmov (!%p238_p2), 0   ;;  %v1950_v2 = vld [vmem:[%s2738_s5 + $0x4] ss:$16 sps:$4 sm:$0xff] (!%p238_p2)   ;;  %p269_p3 = scmp.lt.s32.totalorder (!%p238_p2), %s1772_s25, 1 }
   0x6   : > { %241 = sbr.rel (%p238_p2) target bundleno = 786 (0x312), region = 48  ;;  %1948 = vset.pattern.permute.xlu0 (!%p238_p2), %v2159_v1  ;;  %v1952_v3 = vld [vmem:[%s2738_s5] ss:$16 sps:$4 sm:$0xff] (!%p238_p2)   ;;  %1949 = vset.pattern.permute.xlu1 (!%p238_p2), %v2159_v1  ;;  %v1953_v4 = vld [vmem:[%s2738_s5 + $0x24] ss:$16 sps:$4 sm:$0xff] (!%p238_p2)   ;;  %vm289_vm0 = vcmask (!%p238_p2), 1043456  }
   0x7   : > { %343 = vperm.xlu0 (!%p238_p2), %1948, %v280_v0   ;;  %v281_v5 = vld [vmem:[%s2734_s1 + $0x4] sm:$0xf] (!%p238_p2)  ;;  %941 = vmatprep.subr.bf16.mxu1 (!%p238_p2), %v1950_v2  ;;  %v1955_v6 = vld [vmem:[%s2738_s5 + $0x20] ss:$16 sps:$4 sm:$0xff] (!%p238_p2)   ;;  %v2001_v54 = vld [vmem:[%s2738_s5 + $0xc] ss:$16 sps:$4 sm:$0xff] (!%p238_p2)  }
   0x8   : > { %942 = vmatpush1.bf16.msra.mxu1 (!%p238_p2), %v1952_v3  ;;  %v1956_v7 = vld [vmem:[%s2738_s5 + $0x44] ss:$16 sps:$4 sm:$0xff] (!%p238_p2)   ;;  %v1958_v8 = vld [vmem:[%s2738_s5 + $0x40] ss:$16 sps:$4 sm:$0xff] (!%p238_p2)   ;;  %s2160_s16 = smov (!%p238_p2), 16   ;;  %s2161_s17 = smov (!%p238_p2), 17  }
   0x9   : > { %943 = vmatprep.subr.bf16.mxu1 (!%p238_p2), %v1953_v4  ;;  %v1959_v9 = vld [vmem:[%s2738_s5 + $0x64] ss:$16 sps:$4 sm:$0xff] (!%p238_p2)   ;;  %v1961_v10 = vld [vmem:[%s2738_s5 + $0x60] ss:$16 sps:$4 sm:$0xff] (!%p238_p2)   ;;  %s2162_s20 = smov (!%p238_p2), 15   ;;  %s2163_s28 = smov (!%p238_p2), 1  }
   0xa   : > { %v1962_v11 = vld [vmem:[%s2738_s5 + $0x84] ss:$16 sps:$4 sm:$0xff] (!%p238_p2)   ;;  %v1964_v12 = vld [vmem:[%s2738_s5 + $0x80] ss:$16 sps:$4 sm:$0xff] (!%p238_p2)   ;;  %s2164_s10 = smov (!%p238_p2), 127   ;;  %s2165_s15 = smov (!%p238_p2), 113  }
   0xb   : > { %353 = vperm.xlu0 (!%p238_p2), %1948, %v281_v5   ;;  %v1965_v13 = vld [vmem:[%s2738_s5 + $0xa4] ss:$16 sps:$4 sm:$0xff] (!%p238_p2)   ;;  %v1967_v15 = vld [vmem:[%s2738_s5 + $0xa0] ss:$16 sps:$4 sm:$0xff] (!%p238_p2)   ;;  %vm1542_vm9 = vcmask (!%p238_p2), 1041408  }
   0xc   : > { %944 = vmatpush1.bf16.msra.mxu1 (!%p238_p2), %v1955_v6  ;;  %v1968_v16 = vld [vmem:[%s2738_s5 + $0xc4] ss:$16 sps:$4 sm:$0xff] (!%p238_p2)   ;;  %v1970_v18 = vld [vmem:[%s2738_s5 + $0xc0] ss:$16 sps:$4 sm:$0xff] (!%p238_p2)  }
   0xd   : > { %945 = vmatprep.subr.bf16.mxu1 %v1956_v7  ;;  %s2742_s25 = smov (!%p269_p3, %s1772_s25), 1  ;;  %v1971_v19 = vld [vmem:[%s2738_s5 + $0xe4] ss:$16 sps:$4 sm:$0xff]   ;;  %v1973_v22 = vld [vmem:[%s2738_s5 + $0xe0] ss:$16 sps:$4 sm:$0xff]  }
   0xe   : > { %s1923_s27 = sshll.u32 %s2742_s25, 3  ;;  %v1974_v25 = vld [vmem:[%s2738_s5 + $0x104] ss:$16 sps:$4 sm:$0xff]   ;;  %v1976_v26 = vld [vmem:[%s2738_s5 + $0x100] ss:$16 sps:$4 sm:$0xff]  }
   0xf   : > { %s273_s9 = scalar_lea.vmem %s2733_s0, %s1923_s27  ;;  %v1977_v27 = vld [vmem:[%s2738_s5 + $0x124] ss:$16 sps:$4 sm:$0xff]   ;;  %v1979_v30 = vld [vmem:[%s2738_s5 + $0x120] ss:$16 sps:$4 sm:$0xff]  }
  0x10   : > { %946 = vmatpush1.bf16.msra.mxu1 %v1958_v8  ;;  %v279_v14 = vld [vmem:[%s273_s9] sm:$0xff] }
  0x11   : > { %947 = vmatprep.subr.bf16.mxu1 %v1959_v9  ;;  %v287_v17 = vcombine.high %v279_v14, %v279_v14  ;;  %v290_v20 = vsel %vm289_vm0, %v279_v14, 0.0  ;;  %v1980_v31 = vld [vmem:[%s2738_s5 + $0x144] ss:$16 sps:$4 sm:$0xff]   ;;  %v1982_v34 = vld [vmem:[%s2738_s5 + $0x140] ss:$16 sps:$4 sm:$0xff]  }
  0x12   : > { %v291_v23 = vrot.slane %v290_v20, 4  ;;  %v1983_v35 = vld [vmem:[%s2738_s5 + $0x164] ss:$16 sps:$4 sm:$0xff]   ;;  %v1985_v38 = vld [vmem:[%s2738_s5 + $0x160] ss:$16 sps:$4 sm:$0xff]  }
  0x13   : > { %v297_v21 = vsel %vm289_vm0, %v287_v17, 0.0  ;;  %v1986_v39 = vld [vmem:[%s2738_s5 + $0x184] ss:$16 sps:$4 sm:$0xff]   ;;  %v1988_v42 = vld [vmem:[%s2738_s5 + $0x180] ss:$16 sps:$4 sm:$0xff]  }
  0x14   : > { %948 = vmatpush1.bf16.msra.mxu1 %v1961_v10  ;;  %v298_v24 = vrot.slane %v297_v21, 4  ;;  %v292_v28 = vadd.f32 %v291_v23, %v290_v20  ;;  %v1989_v43 = vld [vmem:[%s2738_s5 + $0x1a4] ss:$16 sps:$4 sm:$0xff]   ;;  %v1991_v46 = vld [vmem:[%s2738_s5 + $0x1a0] ss:$16 sps:$4 sm:$0xff]  }
  0x15   : > { %949 = vmatprep.subr.bf16.mxu1 %v1962_v11  ;;  %v1993_v47 = vld [vmem:[%s2738_s5 + $0x1c4] ss:$16 sps:$4 sm:$0xff]   ;;  %v1995_v50 = vld [vmem:[%s2738_s5 + $0x1c0] ss:$16 sps:$4 sm:$0xff]  }
  0x16   : > { %v299_v29 = vadd.f32 %v298_v24, %v297_v21  ;;  %v293_v32 = vrot.slane %v292_v28, 2  ;;  %v1996_v51 = vld [vmem:[%s2738_s5 + $0x1e4] ss:$16 sps:$4 sm:$0xff]   ;;  %v1998_v53 = vld [vmem:[%s2738_s5 + $0x1e0] ss:$16 sps:$4 sm:$0xff]  }
  0x18   : > { %950 = vmatpush1.bf16.msra.mxu1 %v1964_v12  ;;  %v300_v33 = vrot.slane %v299_v29, 2  ;;  %v294_v36 = vadd.f32 %v293_v32, %v292_v28  ;;  %v1999_v28 = vld [vmem:[%s2738_s5 + $0x8] ss:$16 sps:$4 sm:$0xff]  }
  0x19   : > { %951 = vmatprep.subr.bf16.mxu1 %v1965_v13  ;;  %v2005_v32 = vld [vmem:[%s2738_s5 + $0x48] ss:$16 sps:$4 sm:$0xff]  }
  0x1a   : > { %v301_v37 = vadd.f32 %v300_v33, %v299_v29  ;;  %v295_v40 = vrot.slane %v294_v36, 1  ;;  %v2004_v29 = vld [vmem:[%s2738_s5 + $0x2c] ss:$16 sps:$4 sm:$0xff]  }
  0x1b   : > { %v2010_v33 = vld [vmem:[%s2738_s5 + $0x6c] ss:$16 sps:$4 sm:$0xff]  }
  0x1c   : > { %952 = vmatpush1.bf16.msra.mxu1 %v1967_v15  ;;  %v302_v41 = vrot.slane %v301_v37, 1  ;;  %v296_v44 = vadd.f32 %v295_v40, %v294_v36  ;;  %v2011_v36 = vld [vmem:[%s2738_s5 + $0x88] ss:$16 sps:$4 sm:$0xff]   ;;  %v2019_v40 = vld [vmem:[%s2738_s5 + $0xcc] ss:$16 sps:$4 sm:$0xff]  }
  0x1d   : > { %953 = vmatprep.subr.bf16.mxu1 %v1968_v16 }
  0x1e   : > { %v303_v45 = vadd.f32 %v302_v41, %v301_v37  ;;  %v305_v48 = vmul.f32 0.25, %v296_v44  ;;  %v2016_v37 = vld [vmem:[%s2738_s5 + $0xac] ss:$16 sps:$4 sm:$0xff]   ;;  %v2017_v41 = vld [vmem:[%s2738_s5 + $0xc8] ss:$16 sps:$4 sm:$0xff]  }
  0x1f   : > { %v2020_v44 = vld [vmem:[%s2738_s5 + $0xe8] ss:$16 sps:$4 sm:$0xff]  }
  0x20   : > { %954 = vmatpush1.bf16.msra.mxu1 %v1970_v18  ;;  %v306_v49 = vmul.f32 0.25, %v303_v45  ;;  %v2025_v45 = vld [vmem:[%s2738_s5 + $0x10c] ss:$16 sps:$4 sm:$0xff]  }
  0x21   : > { %955 = vmatprep.subr.bf16.mxu1 %v1971_v19 }
  0x22   : > { %v309_v52 = vcombine.low %v305_v48, %v306_v49  ;;  %v2026_v48 = vld [vmem:[%s2738_s5 + $0x128] ss:$16 sps:$4 sm:$0xff]   ;;  %v2031_v49 = vld [vmem:[%s2738_s5 + $0x14c] ss:$16 sps:$4 sm:$0xff]  }
  0x24   : > { %956 = vmatpush1.bf16.msra.mxu1 %v1973_v22  ;;  %v311_v55 = vsub.f32 %v279_v14, %v309_v52  ;;  %v2032_v52 = vld [vmem:[%s2738_s5 + $0x168] ss:$16 sps:$4 sm:$0xff]  }
  0x25   : > { %957 = vmatprep.subr.bf16.mxu1 %v1974_v25 }
  0x26   : > { %v312_v56 = vmul.f32 %v311_v55, %v311_v55 }
  0x28   : > { %958 = vmatpush1.bf16.msra.mxu1 %v1976_v26  ;;  %v314_v57 = vcombine.high %v312_v56, %v312_v56  ;;  %v316_v58 = vsel %vm289_vm0, %v312_v56, 0.0  ;;  %v2038_v56 = vld [vmem:[%s2738_s5 + $0x1a8] ss:$16 sps:$4 sm:$0xff]  }
  0x29   : > { %959 = vmatprep.subr.bf16.mxu1 %v1977_v27  ;;  %v317_v60 = vrot.slane %v316_v58, 4 }
  0x2a   : > { %v323_v59 = vsel %vm289_vm0, %v314_v57, 0.0  ;;  %v2043_v57 = vld [vmem:[%s2738_s5 + $0x1cc] ss:$16 sps:$4 sm:$0xff]  }
  0x2b   : > { %v324_v61 = vrot.slane %v323_v59, 4  ;;  %v318_v62 = vadd.f32 %v317_v60, %v316_v58  ;;  %v2041_v58 = vld [vmem:[%s2738_s5 + $0x1c8] ss:$16 sps:$4 sm:$0xff]  }
  0x2c   : > { %960 = vmatpush1.bf16.msra.mxu1 %v1979_v30  ;;  %v2002_v30 = vld [vmem:[%s2738_s5 + $0x28] ss:$16 sps:$4 sm:$0xff]  }
  0x2d   : > { %961 = vmatprep.subr.bf16.mxu1 %v1980_v31  ;;  %v325_v63 = vadd.f32 %v324_v61, %v323_v59  ;;  %v319_v0 = vrot.slane %v318_v62, 2  ;;  %v2007_v31 = vld [vmem:[%s2738_s5 + $0x4c] ss:$16 sps:$4 sm:$0xff]   ;;  %v2044_v60 = vld [vmem:[%s2738_s5 + $0x1e8] ss:$16 sps:$4 sm:$0xff]  }
  0x2e   : > { %v2046_v59 = vld [vmem:[%s2738_s5 + $0x1ec] ss:$16 sps:$4 sm:$0xff]  }
  0x2f   : > { %v326_v1 = vrot.slane %v325_v63, 2  ;;  %v320_v2 = vadd.f32 %v319_v0, %v318_v62  ;;  %v2047_v61 = vld [vmem:[%s2739_s6 + $0x4] ss:$8 sps:$4 sm:$0xff]   ;;  %v2049_v62 = vld [vmem:[%s2739_s6] ss:$8 sps:$4 sm:$0xff]  }
  0x30   : > { %962 = vmatpush1.bf16.msra.mxu1 %v1982_v34  ;;  %v2008_v34 = vld [vmem:[%s2738_s5 + $0x68] ss:$16 sps:$4 sm:$0xff]   ;;  %1447 = vmatprep.subr.bf16.mxu0 %v2047_v61 }
  0x31   : > { %963 = vmatprep.subr.bf16.mxu1 %v1983_v35  ;;  %v327_v3 = vadd.f32 %v326_v1, %v325_v63  ;;  %v321_v4 = vrot.slane %v320_v2, 1  ;;  %v2013_v35 = vld [vmem:[%s2738_s5 + $0x8c] ss:$16 sps:$4 sm:$0xff]   ;;  %1448 = vmatpush1.bf16.msra.mxu0 %v2049_v62  ;;  %v2052_v0 = vld [vmem:[%s2739_s6 + $0x10] ss:$8 sps:$4 sm:$0xff]  }
  0x32   : > { %v2050_v63 = vld [vmem:[%s2739_s6 + $0x14] ss:$8 sps:$4 sm:$0xff]   ;;  %v2053_v1 = vld [vmem:[%s2739_s6 + $0x24] ss:$8 sps:$4 sm:$0xff]  }
  0x33   : > { %v328_v5 = vrot.slane %v327_v3, 1  ;;  %v322_v6 = vadd.f32 %v321_v4, %v320_v2  ;;  %1449 = vmatprep.subr.bf16.mxu0 %v2050_v63  ;;  %v2055_v2 = vld [vmem:[%s2739_s6 + $0x20] ss:$8 sps:$4 sm:$0xff]   ;;  %v2058_v4 = vld [vmem:[%s2739_s6 + $0x30] ss:$8 sps:$4 sm:$0xff]  }
  0x34   : > { %964 = vmatpush1.bf16.msra.mxu1 %v1985_v38  ;;  %v2014_v38 = vld [vmem:[%s2738_s5 + $0xa8] ss:$16 sps:$4 sm:$0xff]   ;;  %v2100_v62 = vld [vmem:[%s2739_s6 + $0x114] ss:$8 sps:$4 sm:$0xff]  }
  0x35   : > { %965 = vmatprep.subr.bf16.mxu1 %v1986_v39  ;;  %v329_v7 = vadd.f32 %v328_v5, %v327_v3  ;;  %v330_v8 = vmul.f32 0.25, %v322_v6  ;;  %v282_v39 = vld [vmem:[%s2734_s1 + $0x8] sm:$0xf]  ;;  %1450 = vmatpush1.bf16.msra.mxu0 %v2052_v0  ;;  %v2056_v3 = vld [vmem:[%s2739_s6 + $0x34] ss:$8 sps:$4 sm:$0xff]  }
  0x36   : > { %1451 = vmatprep.subr.bf16.mxu0 %v2053_v1  ;;  %v2059_v5 = vld [vmem:[%s2739_s6 + $0x44] ss:$8 sps:$4 sm:$0xff]   ;;  %v2061_v6 = vld [vmem:[%s2739_s6 + $0x40] ss:$8 sps:$4 sm:$0xff]   ;;  %v2098_v0 = vld [vmem:[%s2739_s6 + $0x110] ss:$8 sps:$4 sm:$0xff]  }
  0x37   : > { %v331_v9 = vmul.f32 0.25, %v329_v7  ;;  %v332_v10 = vadd.f32 1e-06, %v330_v8  ;;  %v2062_v7 = vld [vmem:[%s2739_s6 + $0x54] ss:$8 sps:$4 sm:$0xff]  }
  0x38   : > { %966 = vmatpush1.bf16.msra.mxu1 %v1988_v42  ;;  %v284_v42 = vld [vmem:[%s2734_s1 + $0x10] sm:$0xf]  ;;  %v2103_v1 = vld [vmem:[%s2739_s6 + $0x124] ss:$8 sps:$4 sm:$0xff]  }
  0x39   : > { %967 = vmatprep.subr.bf16.mxu1 %v1989_v43  ;;  %v333_v11 = vadd.f32 1e-06, %v331_v9  ;;  %2143 = vrsqrt.f32 %v332_v10  ;;  %v2022_v43 = vld [vmem:[%s2738_s5 + $0xec] ss:$16 sps:$4 sm:$0xff]   ;;  %1452 = vmatpush1.bf16.msra.mxu0 %v2055_v2  ;;  %v2064_v8 = vld [vmem:[%s2739_s6 + $0x50] ss:$8 sps:$4 sm:$0xff]  }
  0x3a   : > { %1453 = vmatprep.subr.bf16.mxu0 %v2056_v3  ;;  %v2065_v9 = vld [vmem:[%s2739_s6 + $0x64] ss:$8 sps:$4 sm:$0xff]   ;;  %v2067_v10 = vld [vmem:[%s2739_s6 + $0x60] ss:$8 sps:$4 sm:$0xff]   ;;  %v2106_v3 = vld [vmem:[%s2739_s6 + $0x134] ss:$8 sps:$4 sm:$0xff]  }
  0x3b   : > { %2145 = vrsqrt.f32 %v333_v11  ;;  %v2068_v11 = vld [vmem:[%s2739_s6 + $0x74] ss:$8 sps:$4 sm:$0xff]   ;;  %v2101_v2 = vld [vmem:[%s2739_s6 + $0x120] ss:$8 sps:$4 sm:$0xff]  }
  0x3c   : > { %968 = vmatpush1.bf16.msra.mxu1 %v1991_v46  ;;  %v2023_v46 = vld [vmem:[%s2738_s5 + $0x108] ss:$16 sps:$4 sm:$0xff]  }
  0x3d   : > { %969 = vmatprep.subr.bf16.mxu1 %v1993_v47  ;;  %v2028_v47 = vld [vmem:[%s2738_s5 + $0x12c] ss:$16 sps:$4 sm:$0xff]   ;;  %1454 = vmatpush1.bf16.msra.mxu0 %v2058_v4  ;;  %v2104_v4 = vld [vmem:[%s2739_s6 + $0x130] ss:$8 sps:$4 sm:$0xff]  }
  0x3e   : > { %1455 = vmatprep.subr.bf16.mxu0 %v2059_v5  ;;  %v2109_v5 = vld [vmem:[%s2739_s6 + $0x144] ss:$8 sps:$4 sm:$0xff]  }
  0x40   : > { %970 = vmatpush1.bf16.msra.mxu1 %v1995_v50  ;;  %v2029_v50 = vld [vmem:[%s2738_s5 + $0x148] ss:$16 sps:$4 sm:$0xff]  }
  0x41   : > { %971 = vmatprep.subr.bf16.mxu1 %v1996_v51  ;;  %v2034_v51 = vld [vmem:[%s2738_s5 + $0x16c] ss:$16 sps:$4 sm:$0xff]   ;;  %1456 = vmatpush1.bf16.msra.mxu0 %v2061_v6  ;;  %v2107_v6 = vld [vmem:[%s2739_s6 + $0x140] ss:$8 sps:$4 sm:$0xff]  }
  0x42   : > { %1457 = vmatprep.subr.bf16.mxu0 %v2062_v7  ;;  %v2112_v7 = vld [vmem:[%s2739_s6 + $0x154] ss:$8 sps:$4 sm:$0xff]  }
  0x43   : > { %v2144_v12 = vpop.eup %2143 }
  0x44   : > { %972 = vmatpush1.bf16.msra.mxu1 %v1998_v53  ;;  %v2037_v53 = vld [vmem:[%s2738_s5 + $0x18c] ss:$16 sps:$4 sm:$0xff]  }
  0x45   : > { %982 = vmatprep.subr.bf16.mxu1 %v2001_v54  ;;  %v2146_v13 = vpop.eup %2145  ;;  %v2035_v54 = vld [vmem:[%s2738_s5 + $0x188] ss:$16 sps:$4 sm:$0xff]   ;;  %1458 = vmatpush1.bf16.msra.mxu0 %v2064_v8 }
  0x46   : > { %v338_v14 = vcombine.low %v2144_v12, %v2146_v13  ;;  %1459 = vmatprep.subr.bf16.mxu0 %v2065_v9  ;;  %v2070_v12 = vld [vmem:[%s2739_s6 + $0x70] ss:$8 sps:$4 sm:$0xff]   ;;  %v2071_v13 = vld [vmem:[%s2739_s6 + $0x84] ss:$8 sps:$4 sm:$0xff]  }
  0x47   : > { %v2110_v8 = vld [vmem:[%s2739_s6 + $0x150] ss:$8 sps:$4 sm:$0xff]   ;;  %v2115_v9 = vld [vmem:[%s2739_s6 + $0x164] ss:$8 sps:$4 sm:$0xff]  }
  0x48   : > { %v340_v15 = vmul.f32 %v338_v14, %v311_v55  ;;  %v2040_v55 = vld [vmem:[%s2738_s5 + $0x1ac] ss:$16 sps:$4 sm:$0xff]   ;;  %v2073_v14 = vld [vmem:[%s2739_s6 + $0x80] ss:$8 sps:$4 sm:$0xff]  }
  0x49   : > { %1460 = vmatpush1.bf16.msra.mxu0 %v2067_v10  ;;  %v2113_v10 = vld [vmem:[%s2739_s6 + $0x160] ss:$8 sps:$4 sm:$0xff]  }
  0x4a   : > { %v347_v16 = vcombine.high %v340_v15, %v340_v15  ;;  %1461 = vmatprep.subr.bf16.mxu0 %v2068_v11  ;;  %v2118_v11 = vld [vmem:[%s2739_s6 + $0x174] ss:$8 sps:$4 sm:$0xff]  }
  0x4d   : > { %1462 = vmatpush1.bf16.msra.mxu0 %v2070_v12  ;;  %v2116_v12 = vld [vmem:[%s2739_s6 + $0x170] ss:$8 sps:$4 sm:$0xff]  }
  0x4e   : > { %1463 = vmatprep.subr.bf16.mxu0 %v2071_v13  ;;  %v2121_v13 = vld [vmem:[%s2739_s6 + $0x184] ss:$8 sps:$4 sm:$0xff]  }
  0x51   : > { %1464 = vmatpush1.bf16.msra.mxu0 %v2073_v14  ;;  %v2119_v14 = vld [vmem:[%s2739_s6 + $0x180] ss:$8 sps:$4 sm:$0xff]  }
  0x86   : > { %v344_v17 = vpop.permute.xlu0 %343 }
  0x87   : > { %v349_v18 = vmul.f32 %v344_v17, %v340_v15  ;;  %v350_v19 = vmul.f32 %v347_v16, %v344_v17  ;;  %v2074_v15 = vld [vmem:[%s2739_s6 + $0x94] ss:$8 sps:$4 sm:$0xff]   ;;  %v2076_v16 = vld [vmem:[%s2739_s6 + $0x90] ss:$8 sps:$4 sm:$0xff]   ;;  %v2077_v17 = vld [vmem:[%s2739_s6 + $0xa4] ss:$8 sps:$4 sm:$0xff]  }
  0x88   : > { %1465 = vmatprep.subr.bf16.mxu0 %v2074_v15  ;;  %v2124_v15 = vld [vmem:[%s2739_s6 + $0x194] ss:$8 sps:$4 sm:$0xff]  }
  0x89   : > { %1466 = vmatpush1.bf16.msra.mxu0 %v2076_v16  ;;  %v2122_v16 = vld [vmem:[%s2739_s6 + $0x190] ss:$8 sps:$4 sm:$0xff]  }
  0x8a   : > { %v354_v20 = vpop.permute.xlu0 %353  ;;  %1467 = vmatprep.subr.bf16.mxu0 %v2077_v17  ;;  %v2127_v17 = vld [vmem:[%s2739_s6 + $0x1a4] ss:$8 sps:$4 sm:$0xff]  }
  0x8b   : > { %v2334_v21 = vadd.f32 %v354_v20, %v349_v18  ;;  %v2336_v22 = vadd.f32 %v354_v20, %v350_v19  ;;  %v2079_v18 = vld [vmem:[%s2739_s6 + $0xa0] ss:$8 sps:$4 sm:$0xff]   ;;  %v2080_v19 = vld [vmem:[%s2739_s6 + $0xb4] ss:$8 sps:$4 sm:$0xff]   ;;  %v2082_v20 = vld [vmem:[%s2739_s6 + $0xb0] ss:$8 sps:$4 sm:$0xff]  }
  0x8d   : > { %395 = vrot.lane.b32.xlu0 %v2334_v21, %s2160_s16  ;;  %372 = vrot.lane.b32.xlu1 %v2334_v21, %s2161_s17  ;;  %v550_v23 = vpack.c.bf16 %v2336_v22, %v2336_v22  ;;  %v549_v24 = vpack.c.bf16 %v2334_v21, %v2334_v21  ;;  %v362_v25 = vcombine.low %v2334_v21, %v2336_v22 }
  0x8e   : > { %1468 = vmatpush1.bf16.msra.mxu0 %v2079_v18  ;;  %v2125_v18 = vld [vmem:[%s2739_s6 + $0x1a0] ss:$8 sps:$4 sm:$0xff]  }
  0x8f   : > { %v618_v26 = vrot.slane %v550_v23, 1  ;;  %v2346_v27 = vrot.slane %v549_v24, 1  ;;  %1469 = vmatprep.subr.bf16.mxu0 %v2080_v19  ;;  %v2083_v23 = vld [vmem:[%s2739_s6 + $0xc4] ss:$8 sps:$4 sm:$0xff]   ;;  %v2085_v24 = vld [vmem:[%s2739_s6 + $0xc0] ss:$8 sps:$4 sm:$0xff]  }
  0x90   : > { %v2130_v19 = vld [vmem:[%s2739_s6 + $0x1b4] ss:$8 sps:$4 sm:$0xff]  }
  0x91   : > { %417 = vrot.lane.b32.xlu0 %v2334_v21, %s2162_s20  ;;  %374 = vrot.lane.b32.xlu1 %v2336_v22, %s2161_s17 }
  0x92   : > { %973 = vmatprep.mubr.bf16.mxu1 %v618_v26  ;;  %1470 = vmatpush1.bf16.msra.mxu0 %v2082_v20  ;;  %v2128_v20 = vld [vmem:[%s2739_s6 + $0x1b0] ss:$8 sps:$4 sm:$0xff]  }
  0x93   : > { %974 = vmatmul.mubr.bf16.vlgmr.msra.gmra.mrb[0].mxu1 %v2346_v27  ;;  %1471 = vmatprep.subr.bf16.mxu0 %v2083_v23  ;;  %v2133_v23 = vld [vmem:[%s2739_s6 + $0x1c4] ss:$8 sps:$4 sm:$0xff]  }
  0x94   : > { %983 = vmatpush1.bf16.msra.mxu1 %v1999_v28  ;;  %1014 = vmatprep.mubr.bf16.mxu1 %v618_v26  ;;  %v2086_v26 = vld [vmem:[%s2739_s6 + $0xd4] ss:$8 sps:$4 sm:$0xff]   ;;  %v2089_v28 = vld [vmem:[%s2739_s6 + $0xe4] ss:$8 sps:$4 sm:$0xff]  }
  0x95   : > { %439 = vrot.lane.b32.xlu0 %v2334_v21, %s2163_s28  ;;  %397 = vrot.lane.b32.xlu1 %v2336_v22, %s2160_s16 }
  0x96   : > { %984 = vmatprep.subr.bf16.mxu1 %v2004_v29  ;;  %1472 = vmatpush1.bf16.msra.mxu0 %v2085_v24  ;;  %v2091_v29 = vld [vmem:[%s2739_s6 + $0xe0] ss:$8 sps:$4 sm:$0xff]  }
  0x97   : > { %1473 = vmatprep.subr.bf16.mxu0 %v2086_v26  ;;  %v2131_v24 = vld [vmem:[%s2739_s6 + $0x1c0] ss:$8 sps:$4 sm:$0xff]   ;;  %v2136_v26 = vld [vmem:[%s2739_s6 + $0x1d4] ss:$8 sps:$4 sm:$0xff]  }
  0x98   : > { %985 = vmatpush1.bf16.msra.mxu1 %v2002_v30  ;;  %v2092_v30 = vld [vmem:[%s2739_s6 + $0xf4] ss:$8 sps:$4 sm:$0xff]  }
  0x99   : > { %461 = vrot.lane.b32.xlu0 %v2334_v21, %s2164_s10  ;;  %419 = vrot.lane.b32.xlu1 %v2336_v22, %s2162_s20  ;;  %s2166_s20 = smov 112  }
  0x9a   : > { %986 = vmatprep.subr.bf16.mxu1 %v2007_v31  ;;  %v2094_v31 = vld [vmem:[%s2739_s6 + $0xf0] ss:$8 sps:$4 sm:$0xff]  }
  0x9c   : > { %987 = vmatpush1.bf16.msra.mxu1 %v2005_v32  ;;  %v2097_v32 = vld [vmem:[%s2739_s6 + $0x104] ss:$8 sps:$4 sm:$0xff]  }
  0x9d   : > { %483 = vrot.lane.b32.xlu0 %v2334_v21, %s2165_s15  ;;  %441 = vrot.lane.b32.xlu1 %v2336_v22, %s2163_s28  ;;  %s2167_s28 = smov 111  }
  0x9e   : > { %988 = vmatprep.subr.bf16.mxu1 %v2010_v33 }
  0xa0   : > { %989 = vmatpush1.bf16.msra.mxu1 %v2008_v34 }
  0xa1   : > { %505 = vrot.lane.b32.xlu0 %v2334_v21, %s2166_s20  ;;  %463 = vrot.lane.b32.xlu1 %v2336_v22, %s2164_s10 }
  0xa2   : > { %990 = vmatprep.subr.bf16.mxu1 %v2013_v35 }
  0xa4   : > { %991 = vmatpush1.bf16.msra.mxu1 %v2011_v36 }
  0xa5   : > { %527 = vrot.lane.b32.xlu0 %v2334_v21, %s2167_s28  ;;  %485 = vrot.lane.b32.xlu1 %v2336_v22, %s2165_s15 }
  0xa6   : > { %992 = vmatprep.subr.bf16.mxu1 %v2016_v37  ;;  %v283_v37 = vld [vmem:[%s2734_s1 + $0xc] sm:$0xf] }
  0xa8   : > { %993 = vmatpush1.bf16.msra.mxu1 %v2014_v38  ;;  %v285_v38 = vld [vmem:[%s2734_s1 + $0x14] sm:$0xf] }
  0xa9   : > { %1653 = vperm.xlu0 %1948, %v282_v39   ;;  %507 = vrot.lane.b32.xlu1 %v2336_v22, %s2166_s20  ;;  %v1853_v39 = vld.sshfl [vmem:[%s2736_s3] sm:$0x33 pattern:$0x76325410] }
  0xaa   : > { %994 = vmatprep.subr.bf16.mxu1 %v2019_v40  ;;  %v1854_v40 = vld.sshfl [vmem:[%s2737_s4] sm:$0x33 pattern:$0x76325410] }
  0xac   : > { %995 = vmatpush1.bf16.msra.mxu1 %v2017_v41  ;;  %v1033_v41 = vcombine.high %v1853_v39, %v1853_v39 }
  0xad   : > { %1671 = vperm.xlu0 %1948, %v284_v42   ;;  %529 = vrot.lane.b32.xlu1 %v2336_v22, %s2167_s28  ;;  %v1046_v42 = vcombine.high %v1854_v40, %v1854_v40  ;;  %v1783_v22 = vld [vmem:[%s2735_s2 + $0x8] sm:$0xf]  ;;  %s278_s28 = scalar_lea.vmem %s2740_s7, %s1923_s27 }
  0xae   : > { %996 = vmatprep.subr.bf16.mxu1 %v2022_v43 }
  0xb0   : > { %997 = vmatpush1.bf16.msra.mxu1 %v2020_v44 }
  0xb1   : > { %998 = vmatprep.subr.bf16.mxu1 %v2025_v45  ;;  %1692 = vperm.xlu1 %1949, %v283_v37  }
  0xb4   : > { %999 = vmatpush1.bf16.msra.mxu1 %v2023_v46 }
  0xb5   : > { %1000 = vmatprep.subr.bf16.mxu1 %v2028_v47  ;;  %1699 = vperm.xlu1 %1949, %v285_v38  }
  0xb8   : > { %1001 = vmatpush1.bf16.msra.mxu1 %v2026_v48 }
  0xb9   : > { %1002 = vmatprep.subr.bf16.mxu1 %v2031_v49 }
  0xbc   : > { %1003 = vmatpush1.bf16.msra.mxu1 %v2029_v50 }
  0xbd   : > { %1004 = vmatprep.subr.bf16.mxu1 %v2034_v51 }
  0xc0   : > { %1005 = vmatpush1.bf16.msra.mxu1 %v2032_v52 }
  0xc1   : > { %1006 = vmatprep.subr.bf16.mxu1 %v2037_v53 }
  0xc4   : > { %1007 = vmatpush1.bf16.msra.mxu1 %v2035_v54 }
  0xc5   : > { %1008 = vmatprep.subr.bf16.mxu1 %v2040_v55 }
  0xc8   : > { %1009 = vmatpush1.bf16.msra.mxu1 %v2038_v56 }
  0xc9   : > { %1010 = vmatprep.subr.bf16.mxu1 %v2043_v57 }
  0xcc   : > { %1011 = vmatpush1.bf16.msra.mxu1 %v2041_v58 }
  0xcd   : > { %1012 = vmatprep.subr.bf16.mxu1 %v2046_v59 }
  0xd0   : > { %1013 = vmatpush1.bf16.msra.mxu1 %v2044_v60  ;;  %v2095_v60 = vld [vmem:[%s2739_s6 + $0x100] ss:$8 sps:$4 sm:$0xff]  }
  0xd3   : > { %1015 = vmatmul.mubr.bf16.vlgmr.msra.gmra.mrb[4].mxu1 %v2346_v27  ;;  %v2088_v27 = vld [vmem:[%s2739_s6 + $0xd0] ss:$8 sps:$4 sm:$0xff]  }
  0xd4   : > { %1474 = vmatpush1.bf16.msra.mxu0 %v2088_v27  ;;  %v2134_v27 = vld [vmem:[%s2739_s6 + $0x1d0] ss:$8 sps:$4 sm:$0xff]  }
  0xd5   : > { %1475 = vmatprep.subr.bf16.mxu0 %v2089_v28  ;;  %v2139_v28 = vld [vmem:[%s2739_s6 + $0x1e4] ss:$8 sps:$4 sm:$0xff]  }
  0xd8   : > { %1476 = vmatpush1.bf16.msra.mxu0 %v2091_v29  ;;  %v2137_v29 = vld [vmem:[%s2739_s6 + $0x1e0] ss:$8 sps:$4 sm:$0xff]  }
  0xd9   : > { %1477 = vmatprep.subr.bf16.mxu0 %v2092_v30  ;;  %v2142_v30 = vld [vmem:[%s2739_s6 + $0x1f4] ss:$8 sps:$4 sm:$0xff]  }
  0xdc   : > { %1478 = vmatpush1.bf16.msra.mxu0 %v2094_v31  ;;  %v2140_v31 = vld [vmem:[%s2739_s6 + $0x1f0] ss:$8 sps:$4 sm:$0xff]  }
  0xdd   : > { %1488 = vmatprep.subr.bf16.mxu0 %v2097_v32 }
 0x166   : > { %v975_v33 = vpop.f32.mrb[0].mxu1 }
 0x167   : > { %v977_v34 = vpop.f32.mrb[1].mxu1  ;;  %v1036_v44 = vmul.f32 %v1853_v39, %v975_v33  ;;  %v1055_v45 = vmul.f32 %v1854_v40, %v975_v33  ;;  %v373_v33 = vpop.permute.xlu1 %372 }
 0x168   : > { %v979_v35 = vpop.f32.mrb[2].mxu1  ;;  %v1037_v49 = vmul.f32 %v1033_v41, %v977_v34  ;;  %v1056_v50 = vmul.f32 %v1046_v42, %v977_v34 }
 0x169   : > { %v980_v36 = vpop.f32.mrb[3].mxu1 }
 0x16a   : > { %v396_v36 = vpop.permute.xlu0 %395 }
 0x16b   : > { %v375_v34 = vpop.permute.xlu1 %374 }
 0x16e   : > { %v418_v38 = vpop.permute.xlu0 %417 }
 0x16f   : > { %v398_v35 = vpop.permute.xlu1 %397 }
 0x173   : > { %v420_v37 = vpop.permute.xlu1 %419 }
 0x1a6   : > { %v1016_v43 = vpop.f32.mrb[4].mxu1 }
 0x1a7   : > { %v1049_v46 = vmul.f32 %v1854_v40, %v1016_v43  ;;  %v1057_v47 = vmul.f32 %v1853_v39, %v1016_v43  ;;  %v1018_v48 = vpop.f32.mrb[5].mxu1  ;;  %v442_v39 = vpop.permute.xlu1 %441 }
 0x1a8   : > { %v1050_v51 = vmul.f32 %v1046_v42, %v1018_v48  ;;  %v1058_v52 = vmul.f32 %v1033_v41, %v1018_v48  ;;  %v1020_v53 = vpop.f32.mrb[6].mxu1  ;;  %v440_v40 = vpop.permute.xlu0 %439  ;;  %v366_v41 = vlaneseq }
 0x1a9   : > { %v1051_v54 = vsub.f32 %v1036_v44, %v1049_v46  ;;  %v2574_v55 = vadd.f32 %v1057_v47, %v1055_v45  ;;  %v1021_v56 = vpop.f32.mrb[7].mxu1  ;;  %v2168_v45 = vmov 1983009808  }
 0x1aa   : > { %v1060_v57 = vadd.f32 %v1058_v52, %v1056_v50  ;;  %v1052_v58 = vsub.f32 %v1037_v49, %v1050_v51  ;;  %v377_v42 = vand.u32 127, %v366_v41  ;;  %v364_v46 = vunpack.c.l.s4 %v2168_v45 }
 0x1ab   : > { %v1053_v61 = vpack.c.bf16 %v1051_v54, %v1051_v54  ;;  %v1061_v32 = vpack.c.bf16 %v2574_v55, %v2574_v55  ;;  %v464_v43 = vpop.permute.xlu1 %463  ;;  %v367_v51 = vshrl.u32 %v366_v41, 7 }
 0x1ac   : > { %v1054_v59 = vpack.c.bf16 %v1052_v58, %v1052_v58  ;;  %v1062_v63 = vpack.c.bf16 %v1060_v57, %v1060_v57  ;;  %v462_v44 = vpop.permute.xlu0 %461  ;;  %vm378_vm1 = vcmp.lt.s32.totalorder %v377_v42, 17  ;;  %vm399_vm2 = vcmp.lt.s32.totalorder %v377_v42, 16 }
 0x1ad   : > { %v379_v48 = vsel %vm378_vm1, %v373_v33, %v375_v34  ;;  %v380_v49 = vsel %vm378_vm1, %v375_v34, %v373_v33  ;;  %v365_v50 = vunpack.c.0.s8 %v364_v46  ;;  %vm421_vm3 = vcmp.lt.s32.totalorder %v377_v42, 15 }
 0x1ae   : > { %1479 = vmatprep.mubr.bf16.mxu0 %v1054_v59  ;;  %v400_v53 = vsel %vm399_vm2, %v396_v36, %v398_v35  ;;  %v401_v54 = vsel %vm399_vm2, %v398_v35, %v396_v36  ;;  %v384_v55 = vcombine.low %v380_v49, %v379_v48  ;;  %vm443_vm4 = vcmp.lt.s32.totalorder %v377_v42, 1  ;;  %v1786_v36 = vld [vmem:[%s2735_s2 + $0x18] sm:$0xf] }
 0x1af   : > { %1480 = vmatmul.mubr.bf16.vlgmr.msra.gmra.mrb[0].mxu0 %v1053_v61  ;;  %v486_v47 = vpop.permute.xlu1 %485  ;;  %v422_v56 = vsel %vm421_vm3, %v418_v38, %v420_v37  ;;  %v423_v57 = vsel %vm421_vm3, %v420_v37, %v418_v38  ;;  %v2671_v58 = vsub.s32 %v365_v50, %v367_v51  ;;  %v406_v59 = vcombine.low %v401_v54, %v400_v53 }
 0x1b0   : > { %1489 = vmatpush1.bf16.msra.mxu0 %v2095_v60  ;;  %1520 = vmatprep.mubr.bf16.mxu0 %v1062_v63  ;;  %v484_v52 = vpop.permute.xlu0 %483  ;;  %vm465_vm5 = vcmp.lt.s32.totalorder %v377_v42, 127  ;;  %v444_v61 = vsel %vm443_vm4, %v440_v40, %v442_v39  ;;  %vm487_vm6 = vcmp.lt.s32.totalorder %v377_v42, 113  ;;  %vm509_vm7 = vcmp.lt.s32.totalorder %v377_v42, 112 }
 0x1b1   : > { %1490 = vmatprep.subr.bf16.mxu0 %v2100_v62  ;;  %v445_v62 = vsel %vm443_vm4, %v442_v39, %v440_v40  ;;  %v391_v63 = vrot.slane %v384_v55, %v2671_v58  ;;  %vm531_vm8 = vcmp.lt.s32.totalorder %v377_v42, 111  ;;  %v1787_v40 = vld [vmem:[%s2735_s2 + $0x1c] sm:$0xf] }
 0x1b3   : > { %v508_v60 = vpop.permute.xlu1 %507 }
 0x1b4   : > { %1491 = vmatpush1.bf16.msra.mxu0 %v2098_v0  ;;  %v428_v0 = vcombine.low %v423_v57, %v422_v56 }
 0x1b5   : > { %1492 = vmatprep.subr.bf16.mxu0 %v2103_v1  ;;  %v506_v1 = vpop.permute.xlu0 %505 }
 0x1b7   : > { %v530_v21 = vpop.permute.xlu1 %529 }
 0x1b8   : > { %1493 = vmatpush1.bf16.msra.mxu0 %v2101_v2  ;;  %v381_v2 = vld [vmem:[%s2735_s2] sm:$0xf] }
 0x1b9   : > { %1494 = vmatprep.subr.bf16.mxu0 %v2106_v3  ;;  %v466_v3 = vsel %vm465_vm5, %v462_v44, %v464_v43 }
 0x1bc   : > { %1495 = vmatpush1.bf16.msra.mxu0 %v2104_v4  ;;  %v467_v4 = vsel %vm465_vm5, %v464_v43, %v462_v44  ;;  %v1788_v44 = vld [vmem:[%s2735_s2 + $0x20] sm:$0xf] }
 0x1bd   : > { %1496 = vmatprep.subr.bf16.mxu0 %v2109_v5  ;;  %v369_v5 = vrot.slane %v362_v25, %v2671_v58  ;;  %v510_v25 = vsel %vm509_vm7, %v506_v1, %v508_v60 }
 0x1c0   : > { %1497 = vmatpush1.bf16.msra.mxu0 %v2107_v6  ;;  %v413_v6 = vrot.slane %v406_v59, %v2671_v58 }
 0x1c1   : > { %1498 = vmatprep.subr.bf16.mxu0 %v2112_v7  ;;  %v450_v7 = vcombine.low %v445_v62, %v444_v61 }
 0x1c4   : > { %1499 = vmatpush1.bf16.msra.mxu0 %v2110_v8  ;;  %v1781_v8 = vld [vmem:[%s2735_s2 + $0x10] sm:$0xf] }
 0x1c5   : > { %1500 = vmatprep.subr.bf16.mxu0 %v2115_v9  ;;  %v1782_v9 = vld [vmem:[%s2735_s2 + $0x4] sm:$0xf] }
 0x1c8   : > { %1501 = vmatpush1.bf16.msra.mxu0 %v2113_v10  ;;  %v488_v10 = vsel %vm487_vm6, %v484_v52, %v486_v47 }
 0x1c9   : > { %1502 = vmatprep.subr.bf16.mxu0 %v2118_v11  ;;  %v489_v11 = vsel %vm487_vm6, %v486_v47, %v484_v52 }
 0x1cc   : > { %1503 = vmatpush1.bf16.msra.mxu0 %v2116_v12  ;;  %v393_v12 = vmul.f32 %v391_v63, %v381_v2 }
 0x1cd   : > { %1504 = vmatprep.subr.bf16.mxu0 %v2121_v13  ;;  %v435_v13 = vrot.slane %v428_v0, %v2671_v58 }
 0x1d0   : > { %1505 = vmatpush1.bf16.msra.mxu0 %v2119_v14  ;;  %v472_v14 = vcombine.low %v466_v3, %v467_v4 }
 0x1d1   : > { %1506 = vmatprep.subr.bf16.mxu0 %v2124_v15  ;;  %v511_v15 = vsel %vm509_vm7, %v508_v60, %v506_v1 }
 0x1d4   : > { %1507 = vmatpush1.bf16.msra.mxu0 %v2122_v16  ;;  %v371_v16 = vmul.f32 %v1781_v8, %v369_v5 }
 0x1d5   : > { %1508 = vmatprep.subr.bf16.mxu0 %v2127_v17  ;;  %v415_v17 = vmul.f32 %v1782_v9, %v413_v6 }
 0x1d8   : > { %1509 = vmatpush1.bf16.msra.mxu0 %v2125_v18  ;;  %v457_v18 = vrot.slane %v450_v7, %v2671_v58 }
 0x1d9   : > { %1510 = vmatprep.subr.bf16.mxu0 %v2130_v19  ;;  %v528_v19 = vpop.permute.xlu0 %527 }
 0x1dc   : > { %1511 = vmatpush1.bf16.msra.mxu0 %v2128_v20  ;;  %v494_v20 = vcombine.low %v488_v10, %v489_v11 }
 0x1dd   : > { %1512 = vmatprep.subr.bf16.mxu0 %v2133_v23  ;;  %v1784_v23 = vld [vmem:[%s2735_s2 + $0xc] sm:$0xf] }
 0x1de   : > { %v459_v33 = vmul.f32 %v1784_v23, %v457_v18  ;;  %v501_v34 = vrot.slane %v494_v20, %v2671_v58 }
 0x1e0   : > { %1513 = vmatpush1.bf16.msra.mxu0 %v2131_v24  ;;  %v532_v24 = vsel %vm531_vm8, %v528_v19, %v530_v21  ;;  %v503_v42 = vmul.f32 %v1786_v36, %v501_v34 }
 0x1e1   : > { %1514 = vmatprep.subr.bf16.mxu0 %v2136_v26  ;;  %v533_v26 = vsel %vm531_vm8, %v530_v21, %v528_v19 }
 0x1e2   : > { %v538_v35 = vcombine.low %v532_v24, %v533_v26 }
 0x1e4   : > { %1515 = vmatpush1.bf16.msra.mxu0 %v2134_v27  ;;  %v394_v27 = vadd.f32 %v393_v12, %v371_v16  ;;  %v545_v43 = vrot.slane %v538_v35, %v2671_v58 }
 0x1e5   : > { %1516 = vmatprep.subr.bf16.mxu0 %v2139_v28  ;;  %v437_v28 = vmul.f32 %v1783_v22, %v435_v13 }
 0x1e6   : > { %v547_v48 = vmul.f32 %v1788_v44, %v545_v43 }
 0x1e8   : > { %1517 = vmatpush1.bf16.msra.mxu0 %v2137_v29  ;;  %v479_v29 = vrot.slane %v472_v14, %v2671_v58 }
 0x1e9   : > { %1518 = vmatprep.subr.bf16.mxu0 %v2142_v30  ;;  %v516_v30 = vcombine.low %v510_v25, %v511_v15 }
 0x1eb   : > { %v523_v39 = vrot.slane %v516_v30, %v2671_v58 }
 0x1ec   : > { %1519 = vmatpush1.bf16.msra.mxu0 %v2140_v31  ;;  %v1785_v31 = vld [vmem:[%s2735_s2 + $0x14] sm:$0xf] }
 0x1ed   : > { %v481_v38 = vmul.f32 %v1785_v31, %v479_v29  ;;  %v525_v46 = vmul.f32 %v1787_v40, %v523_v39 }
 0x1ef   : > { %1521 = vmatmul.mubr.bf16.vlgmr.msra.gmra.mrb[0].mxu0 %v1061_v32  ;;  %v416_v32 = vadd.f32 %v415_v17, %v394_v27 }
 0x1f1   : > { %v438_v37 = vadd.f32 %v437_v28, %v416_v32 }
 0x1f3   : > { %v460_v41 = vadd.f32 %v459_v33, %v438_v37 }
 0x1f5   : > { %v482_v45 = vadd.f32 %v481_v38, %v460_v41 }
 0x1f7   : > { %v504_v47 = vadd.f32 %v503_v42, %v482_v45 }
 0x1f9   : > { %v526_v49 = vadd.f32 %v525_v46, %v504_v47 }
 0x1fb   : > { %v548_v50 = vadd.f32 %v547_v48, %v526_v49 }
 0x1fd   : > { %v1538_v51 = vrot.slane %v548_v50, %v2671_v58 }
 0x1ff   : > { %v1539_v52 = vcombine.high %v1538_v51, %v1538_v51  ;;  %v1543_v53 = vsel %vm1542_vm9, %v1538_v51, 0.0 }
 0x200   : > { %v1544_v55 = vrot.slane %v1543_v53, 4 }
 0x201   : > { %v1550_v54 = vsel %vm1542_vm9, %v1539_v52, 0.0 }
 0x202   : > { %v1551_v56 = vrot.slane %v1550_v54, 4  ;;  %v1545_v57 = vadd.f32 %v1544_v55, %v1543_v53 }
 0x204   : > { %v1552_v59 = vadd.f32 %v1551_v56, %v1550_v54  ;;  %v1546_v63 = vrot.slane %v1545_v57, 2 }
 0x206   : > { %v1553_v3 = vrot.slane %v1552_v59, 2  ;;  %v1547_v8 = vadd.f32 %v1546_v63, %v1545_v57 }
 0x208   : > { %v1554_v10 = vadd.f32 %v1553_v3, %v1552_v59  ;;  %v1548_v14 = vrot.slane %v1547_v8, 1 }
 0x20a   : > { %v1555_v22 = vrot.slane %v1554_v10, 1  ;;  %v1549_v17 = vadd.f32 %v1548_v14, %v1547_v8 }
 0x20c   : > { %v1556_v19 = vadd.f32 %v1555_v22, %v1554_v10 }
 0x2c2   : > { %v1522_v60 = vpop.f32.mrb[0].mxu0 }
 0x2c3   : > { %v1529_v61 = vmul.f32 0.00390625, %v1522_v60  ;;  %v1524_v62 = vpop.f32.mrb[1].mxu0 }
 0x2c4   : > { %v1530_v0 = vmul.f32 0.00390625, %v1524_v62  ;;  %v1526_v1 = vpop.f32.mrb[2].mxu0 }
 0x2c5   : > { %v1557_v2 = vsel %vm1542_vm9, %v1529_v61, 0.0  ;;  %v1527_v4 = vpop.f32.mrb[3].mxu0 }
 0x2c6   : > { %v1558_v5 = vrot.slane %v1557_v2, 4  ;;  %v1564_v6 = vsel %vm1542_vm9, %v1530_v0, 0.0 }
 0x2c7   : > { %v1565_v7 = vrot.slane %v1564_v6, 4 }
 0x2c8   : > { %v1559_v9 = vadd.f32 %v1558_v5, %v1557_v2 }
 0x2c9   : > { %v1566_v11 = vadd.f32 %v1565_v7, %v1564_v6 }
 0x2ca   : > { %v1560_v12 = vrot.slane %v1559_v9, 2 }
 0x2cb   : > { %v1567_v13 = vrot.slane %v1566_v11, 2 }
 0x2cc   : > { %v1561_v21 = vadd.f32 %v1560_v12, %v1559_v9  ;;  %v1693_v9 = vpop.permute.xlu1 %1692 }
 0x2cd   : > { %v1568_v25 = vadd.f32 %v1567_v13, %v1566_v11 }
 0x2ce   : > { %v1562_v15 = vrot.slane %v1561_v21, 1 }
 0x2cf   : > { %v1569_v16 = vrot.slane %v1568_v25, 1 }
 0x2d0   : > { %v1563_v18 = vadd.f32 %v1562_v15, %v1561_v21  ;;  %v1700_v22 = vpop.permute.xlu1 %1699 }
 0x2d1   : > { %v1570_v20 = vadd.f32 %v1569_v16, %v1568_v25 }
 0x2d2   : > { %v1571_v23 = vadd.f32 %v1563_v18, %v1549_v17 }
 0x2d3   : > { %v1572_v24 = vadd.f32 %v1570_v20, %v1556_v19  ;;  %v1654_v19 = vpop.permute.xlu0 %1653 }
 0x2d4   : > { %v1573_v26 = vmul.f32 0.25, %v1571_v23 }
 0x2d5   : > { %v1574_v27 = vmul.f32 0.25, %v1572_v24 }
 0x2d6   : > { %v1587_v28 = vsub.f32 %v1529_v61, %v1573_v26 }
 0x2d7   : > { %v1577_v29 = vcombine.low %v1573_v26, %v1574_v27  ;;  %v1588_v30 = vsub.f32 %v1530_v0, %v1574_v27 }
 0x2d8   : > { %v1615_v31 = vmul.f32 %v1587_v28, %v1587_v28 }
 0x2d9   : > { %v1584_v32 = vrot.slane %v1577_v29, %v2671_v58  ;;  %v1616_v33 = vmul.f32 %v1588_v30, %v1588_v30 }
 0x2da   : > { %v1617_v34 = vsel %vm1542_vm9, %v1615_v31, 0.0 }
 0x2db   : > { %v1618_v35 = vrot.slane %v1617_v34, 4  ;;  %v1586_v36 = vsub.f32 %v548_v50, %v1584_v32  ;;  %v1624_v37 = vsel %vm1542_vm9, %v1616_v33, 0.0 }
 0x2dc   : > { %v1625_v38 = vrot.slane %v1624_v37, 4 }
 0x2dd   : > { %v1619_v39 = vadd.f32 %v1618_v35, %v1617_v34  ;;  %v1589_v40 = vmul.f32 %v1586_v36, %v1586_v36 }
 0x2de   : > { %v1626_v41 = vadd.f32 %v1625_v38, %v1624_v37 }
 0x2df   : > { %v1597_v42 = vrot.slane %v1589_v40, %v2671_v58  ;;  %v1620_v43 = vrot.slane %v1619_v39, 2 }
 0x2e0   : > { %v1627_v47 = vrot.slane %v1626_v41, 2 }
 0x2e1   : > { %v1598_v44 = vcombine.high %v1597_v42, %v1597_v42  ;;  %v1601_v45 = vsel %vm1542_vm9, %v1597_v42, 0.0  ;;  %v1621_v49 = vadd.f32 %v1620_v43, %v1619_v39 }
 0x2e2   : > { %v1602_v46 = vrot.slane %v1601_v45, 4  ;;  %v1628_v54 = vadd.f32 %v1627_v47, %v1626_v41 }
 0x2e3   : > { %v1608_v48 = vsel %vm1542_vm9, %v1598_v44, 0.0  ;;  %v1622_v55 = vrot.slane %v1621_v49, 1 }
 0x2e4   : > { %v1603_v51 = vadd.f32 %v1602_v46, %v1601_v45  ;;  %v1609_v52 = vrot.slane %v1608_v48, 4  ;;  %v1629_v61 = vrot.slane %v1628_v54, 1 }
 0x2e5   : > { %v1623_v62 = vadd.f32 %v1622_v55, %v1621_v49 }
 0x2e6   : > { %v1604_v50 = vrot.slane %v1603_v51, 2  ;;  %v1610_v53 = vadd.f32 %v1609_v52, %v1608_v48  ;;  %v1630_v2 = vadd.f32 %v1629_v61, %v1628_v54 }
 0x2e8   : > { %v1605_v56 = vadd.f32 %v1604_v50, %v1603_v51  ;;  %v1611_v57 = vrot.slane %v1610_v53, 2 }
 0x2ea   : > { %v1606_v59 = vrot.slane %v1605_v56, 1  ;;  %v1612_v60 = vadd.f32 %v1611_v57, %v1610_v53 }
 0x2ec   : > { %v1607_v63 = vadd.f32 %v1606_v59, %v1605_v56  ;;  %v1613_v0 = vrot.slane %v1612_v60, 1 }
 0x2ee   : > { %v1614_v1 = vadd.f32 %v1613_v0, %v1612_v60  ;;  %v1631_v3 = vadd.f32 %v1623_v62, %v1607_v63 }
 0x2f0   : > { %v1632_v4 = vadd.f32 %v1630_v2, %v1614_v1  ;;  %v1633_v5 = vmul.f32 0.25, %v1631_v3 }
 0x2f2   : > { %v1634_v6 = vmul.f32 0.25, %v1632_v4  ;;  %v1635_v7 = vadd.f32 1e-06, %v1633_v5 }
 0x2f4   : > { %v1636_v8 = vadd.f32 1e-06, %v1634_v6  ;;  %2147 = vrsqrt.f32 %v1635_v7 }
 0x2f6   : > { %2149 = vrsqrt.f32 %v1636_v8 }
 0x2fe   : > { %v2148_v10 = vpop.eup %2147 }
 0x2ff   : > { %v1688_v11 = vmul.f32 %v2148_v10, %v1587_v28  ;;  %v1672_v28 = vpop.permute.xlu0 %1671 }
 0x300   : > { %v2150_v12 = vpop.eup %2149 }
 0x301   : > { %v1641_v13 = vcombine.low %v2148_v10, %v2150_v12  ;;  %v1689_v14 = vmul.f32 %v2150_v12, %v1588_v30  ;;  %v1695_v21 = vmul.f32 %v1693_v9, %v1688_v11 }
 0x303   : > { %v1648_v25 = vrot.slane %v1641_v13, %v2671_v58  ;;  %v1696_v15 = vmul.f32 %v1693_v9, %v1689_v14  ;;  %v1702_v17 = vadd.f32 %v1700_v22, %v1695_v21 }
 0x305   : > { %v1650_v16 = vmul.f32 %v1648_v25, %v1586_v36  ;;  %v1703_v18 = vadd.f32 %v1700_v22, %v1696_v15 }
 0x307   : > { %v1663_v20 = vrot.slane %v1650_v16, %v2671_v58  ;;  %v1706_v23 = vcombine.low %v1702_v17, %v1703_v18 }
 0x309   : > { %v1664_v24 = vcombine.high %v1663_v20, %v1663_v20  ;;  %v1667_v26 = vmul.f32 %v1663_v20, %v1654_v19  ;;  %1925 = vst.sshfl [vmem:[%s278_s28 + $0x4] sm:$0x33 pattern:$0x76325410] %v1706_v23 }
 0x30b   : > { %v1668_v27 = vmul.f32 %v1664_v24, %v1654_v19  ;;  %v1674_v29 = vadd.f32 %v1672_v28, %v1667_v26 }
 0x30d   : > { %v1675_v30 = vadd.f32 %v1672_v28, %v1668_v27 }
 0x30f   : > { %v1678_v31 = vcombine.low %v1674_v29, %v1675_v30 }
 0x311   : > { %1919 = vst.sshfl [vmem:[%s278_s28] sm:$0x33 pattern:$0x76325410] %v1678_v31 }
 0x312 PF: > { %s17_s24 = sadd.s32 1, %s2157_s24  }
 0x313   : > { %p14_p4 = scmp.ge.s32.totalorder %s17_s24, 4  }
 0x315   :  { %16 = sbr.rel (!%p14_p4) target bundleno = 1 (0x1), region = 87 }

</bundles_post_ra>
